<compile_context>
chip_gen: v7x
topology: tpu7x:2x2x1
jax: 0.10.0
libtpu: 0.0.40
codegen_flags: <defaults>
</compile_context>

<pallas_src>
import jax
import jax.numpy as jnp
from jax import lax
from jax.experimental import pallas as pl
from jax.experimental.pallas import tpu as pltpu

H_IN = 10           # fixed by the PyTorch module (size_linear_unit(10))
H_OUT = H_IN - 2    # 8
S = H_OUT * H_OUT   # 64 spatial positions
C_OUT = 16          # conv output channels
BN = 8              # samples per grid step  -> 512 conv rows per block


# ------------------------------ fused kernel -------------------------------

def fused_kernel(x_ref, wc_ref, bc_ref, w1_ref, b1_ref, w2_ref, b2_ref, o_ref):
    # x_ref : (10, 10, BN, C)   input block, HWNC layout
    # wc_ref: (9, C, 16)        conv weight per tap, tap index = dh*3 + dw
    # bc_ref: (1, 16)
    # w1_ref: (64, 16, O)       fc1 weight, spatial-major (pre-permuted at init)
    # b1_ref: (1, O)
    # w2_ref: (O, O)
    # b2_ref: (1, O)
    # o_ref : (BN, O)
    bn = x_ref.shape[2]
    c_in = x_ref.shape[3]

    # ---- conv3x3 (VALID) as 9 accumulating MXU dots; rows ordered (s, n) ----
    acc = jnp.zeros((S * bn, C_OUT), jnp.float32)
    for dh in range(3):
        for dw in range(3):
            tap = x_ref[dh:dh + H_OUT, dw:dw + H_OUT, :, :]      # (8, 8, bn, C)
            tap2 = tap.reshape(S * bn, c_in)                     # (512, C)
            acc = acc + jnp.dot(tap2, wc_ref[dh * 3 + dw],
                                preferred_element_type=jnp.float32)
    conv = jnp.maximum(acc + bc_ref[...], 0.0)                   # (512, 16), VMEM only

    # ---- fc1: batched over the 64 spatial positions, then reduce over them --
    conv3 = conv.reshape(S, bn, C_OUT)                           # (64, bn, 16)
    h3 = jnp.einsum('snc,sco->sno', conv3, w1_ref[...],
                    preferred_element_type=jnp.float32)          # (64, bn, O)
    h = jnp.maximum(jnp.sum(h3, axis=0) + b1_ref[...], 0.0)      # (bn, O)

    # ---- fc2 ----------------------------------------------------------------
    y = jnp.dot(h, w2_ref[...], preferred_element_type=jnp.float32) + b2_ref[...]
    o_ref[...] = y.astype(o_ref.dtype)


# ------------------------------ wrapper (JAX) -------------------------------

@jax.jit
def representation_network(x, params):
    # x: (N, C, 10, 10) float32 NCHW
    conv_w, conv_b, fc1_w, fc1_b, fc2_w, fc2_b = params
    n, c = x.shape[0], x.shape[1]
    o = fc2_w.shape[1]

    # pad batch to a multiple of BN so blocks stay sublane-aligned (8 rows)
    n_pad = (-n) % BN
    if n_pad:
        x = jnp.concatenate([x, jnp.zeros((n_pad, c, H_IN, H_IN), x.dtype)], axis=0)
    n_full = n + n_pad

    xk = jnp.transpose(x, (2, 3, 0, 1))                          # (10, 10, n_full, C)

    out = pl.pallas_call(
        fused_kernel,
        out_shape=jax.ShapeDtypeStruct((n_full, o), jnp.float32),
        grid=(n_full // BN,),
        in_specs=[
            pl.BlockSpec((H_IN, H_IN, BN, c), lambda i: (0, 0, i, 0)),  # stream batch
            pl.BlockSpec(conv_w.shape, lambda i: (0, 0, 0)),            # resident
            pl.BlockSpec(conv_b.shape, lambda i: (0, 0)),
            pl.BlockSpec(fc1_w.shape, lambda i: (0, 0, 0)),
            pl.BlockSpec(fc1_b.shape, lambda i: (0, 0)),
            pl.BlockSpec(fc2_w.shape, lambda i: (0, 0)),
            pl.BlockSpec(fc2_b.shape, lambda i: (0, 0)),
        ],
        out_specs=pl.BlockSpec((BN, o), lambda i: (i, 0)),
        compiler_params=pltpu.CompilerParams(
            dimension_semantics=("parallel",)),
    )(xk, conv_w, conv_b, fc1_w, fc1_b, fc2_w, fc2_b)
    return out[:n]


def init_params(key, in_channels, out_channels):
    k1, k2, k3, k4, k5, k6 = jax.random.split(key, 6)
    # conv weight in kernel layout (9, C, 16): [dh*3+dw, ci, co]
    conv_w = 0.1 * jax.random.normal(k1, (9, in_channels, C_OUT), jnp.float32)
    conv_b = 0.1 * jax.random.normal(k2, (1, C_OUT), jnp.float32)
    # fc1 weight generated in the PyTorch "math" layout (1024, O) whose row order
    # is channel-major (c*64 + s), exactly like nn.Flatten on (N, 16, 8, 8) ...
    fc1_math = 0.05 * jax.random.normal(k3, (C_OUT * S, out_channels), jnp.float32)
    # ... then pre-permuted ONCE into the kernel's spatial-major (64, 16, O):
    fc1_w = jnp.transpose(fc1_math.reshape(C_OUT, S, out_channels), (1, 0, 2))
    fc1_b = 0.05 * jax.random.normal(k4, (1, out_channels), jnp.float32)
    fc2_w = 0.05 * jax.random.normal(k5, (out_channels, out_channels), jnp.float32)
    fc2_b = 0.05 * jax.random.normal(k6, (1, out_channels), jnp.float32)
    return conv_w, conv_b, fc1_w, fc1_b, fc2_w, fc2_b


def reference(x, params):
    # pure-JAX reference mirroring the PyTorch module exactly
    conv_w, conv_b, fc1_w, fc1_b, fc2_w, fc2_b = params
    c = x.shape[1]
    w_oihw = jnp.transpose(conv_w.reshape(3, 3, c, C_OUT), (3, 2, 0, 1))
    y = lax.conv_general_dilated(
        x, w_oihw, window_strides=(1, 1), padding="VALID",
        dimension_numbers=("NCHW", "OIHW", "NCHW"))
    y = jnp.maximum(y + conv_b.reshape(1, C_OUT, 1, 1), 0.0)
    f = y.reshape(x.shape[0], -1)                                  # PyTorch flatten
    fc1_math = jnp.transpose(fc1_w, (1, 0, 2)).reshape(C_OUT * S, -1)
    h = jnp.maximum(f @ fc1_math + fc1_b, 0.0)
    return h @ fc2_w + fc2_b


# --------------------------------- main -------------------------------------

if __name__ == "__main__":
    N, in_channels, out_channels = 2, 4, 32
    key = jax.random.PRNGKey(0)
    kx, kp = jax.random.split(key)
    x = jax.random.normal(kx, (N, in_channels, H_IN, H_IN), jnp.float32)
    params = init_params(kp, in_channels, out_channels)

    out = representation_network(x, params)
    out = jax.block_until_ready(out)

    ref = reference(x, params)
    assert out.shape == (N, out_channels), out.shape
    assert jnp.allclose(out, ref, atol=1e-4, rtol=1e-4), "mismatch vs reference"
    print("KERNEL_OK")
</pallas_src>

<mosaic_0001>
module attributes {stable_mosaic.version = 11 : i64} {
  func.func @fused_kernel(%arg0: i32, %arg1: memref<10x10x8x4xf32, #tpu.memory_space<vmem>>, %arg2: memref<9x4x16xf32, #tpu.memory_space<vmem>>, %arg3: memref<1x16xf32, #tpu.memory_space<vmem>>, %arg4: memref<64x16x32xf32, #tpu.memory_space<vmem>>, %arg5: memref<1x32xf32, #tpu.memory_space<vmem>>, %arg6: memref<32x32xf32, #tpu.memory_space<vmem>>, %arg7: memref<1x32xf32, #tpu.memory_space<vmem>>, %arg8: memref<8x32xf32, #tpu.memory_space<vmem>>) attributes {dimension_semantics = [#tpu.dimension_semantics<parallel>], iteration_bounds = array<i64: 1>, scalar_prefetch = 0 : i64, scratch_operands = 0 : i64, tpu.core_type = #tpu.core_type<tc>, window_params = [{transform_indices = @transform_0, window_bounds = array<i64: 10, 10, 8, 4>}, {pipeline_mode = #tpu.pipeline_mode<synchronous>, transform_indices = @transform_1, window_bounds = array<i64: 9, 4, 16>}, {pipeline_mode = #tpu.pipeline_mode<synchronous>, transform_indices = @transform_2, window_bounds = array<i64: 1, 16>}, {pipeline_mode = #tpu.pipeline_mode<synchronous>, transform_indices = @transform_3, window_bounds = array<i64: 64, 16, 32>}, {pipeline_mode = #tpu.pipeline_mode<synchronous>, transform_indices = @transform_4, window_bounds = array<i64: 1, 32>}, {pipeline_mode = #tpu.pipeline_mode<synchronous>, transform_indices = @transform_5, window_bounds = array<i64: 32, 32>}, {pipeline_mode = #tpu.pipeline_mode<synchronous>, transform_indices = @transform_6, window_bounds = array<i64: 1, 32>}, {transform_indices = @transform_7, window_bounds = array<i64: 8, 32>}]} {
    %cst = arith.constant 0.000000e+00 : f32
    %0 = vector.broadcast %cst : f32 to vector<512x16xf32>
    %c0 = arith.constant 0 : index
    %c0_0 = arith.constant 0 : index
    %c0_1 = arith.constant 0 : index
    %c0_2 = arith.constant 0 : index
    %1 = vector.load %arg1[%c0, %c0_0, %c0_1, %c0_2] : memref<10x10x8x4xf32, #tpu.memory_space<vmem>>, vector<8x8x8x4xf32>
    %2 = vector.shape_cast %1 : vector<8x8x8x4xf32> to vector<512x4xf32>
    %c0_3 = arith.constant 0 : index
    %c0_4 = arith.constant 0 : index
    %c0_5 = arith.constant 0 : index
    %3 = vector.load %arg2[%c0_3, %c0_4, %c0_5] : memref<9x4x16xf32, #tpu.memory_space<vmem>>, vector<1x4x16xf32>
    %4 = vector.shape_cast %3 : vector<1x4x16xf32> to vector<4x16xf32>
    %cst_6 = arith.constant dense<0.000000e+00> : vector<512x16xf32>
    %5 = tpu.matmul %2, %4, %cst_6 {dimension_numbers = #tpu.dot_dimension_numbers<[1], [0], [0], [1], [0, 0, 1, 1], [], []>} : vector<512x4xf32>, vector<4x16xf32>, vector<512x16xf32> -> vector<512x16xf32>
    %6 = arith.addf %0, %5 : vector<512x16xf32>
    %c0_7 = arith.constant 0 : index
    %c1 = arith.constant 1 : index
    %c0_8 = arith.constant 0 : index
    %c0_9 = arith.constant 0 : index
    %7 = vector.load %arg1[%c0_7, %c1, %c0_8, %c0_9] : memref<10x10x8x4xf32, #tpu.memory_space<vmem>>, vector<8x8x8x4xf32>
    %8 = vector.shape_cast %7 : vector<8x8x8x4xf32> to vector<512x4xf32>
    %c1_10 = arith.constant 1 : index
    %c0_11 = arith.constant 0 : index
    %c0_12 = arith.constant 0 : index
    %9 = vector.load %arg2[%c1_10, %c0_11, %c0_12] : memref<9x4x16xf32, #tpu.memory_space<vmem>>, vector<1x4x16xf32>
    %10 = vector.shape_cast %9 : vector<1x4x16xf32> to vector<4x16xf32>
    %cst_13 = arith.constant dense<0.000000e+00> : vector<512x16xf32>
    %11 = tpu.matmul %8, %10, %cst_13 {dimension_numbers = #tpu.dot_dimension_numbers<[1], [0], [0], [1], [0, 0, 1, 1], [], []>} : vector<512x4xf32>, vector<4x16xf32>, vector<512x16xf32> -> vector<512x16xf32>
    %12 = arith.addf %6, %11 : vector<512x16xf32>
    %c0_14 = arith.constant 0 : index
    %c2 = arith.constant 2 : index
    %c0_15 = arith.constant 0 : index
    %c0_16 = arith.constant 0 : index
    %13 = vector.load %arg1[%c0_14, %c2, %c0_15, %c0_16] : memref<10x10x8x4xf32, #tpu.memory_space<vmem>>, vector<8x8x8x4xf32>
    %14 = vector.shape_cast %13 : vector<8x8x8x4xf32> to vector<512x4xf32>
    %c2_17 = arith.constant 2 : index
    %c0_18 = arith.constant 0 : index
    %c0_19 = arith.constant 0 : index
    %15 = vector.load %arg2[%c2_17, %c0_18, %c0_19] : memref<9x4x16xf32, #tpu.memory_space<vmem>>, vector<1x4x16xf32>
    %16 = vector.shape_cast %15 : vector<1x4x16xf32> to vector<4x16xf32>
    %cst_20 = arith.constant dense<0.000000e+00> : vector<512x16xf32>
    %17 = tpu.matmul %14, %16, %cst_20 {dimension_numbers = #tpu.dot_dimension_numbers<[1], [0], [0], [1], [0, 0, 1, 1], [], []>} : vector<512x4xf32>, vector<4x16xf32>, vector<512x16xf32> -> vector<512x16xf32>
    %18 = arith.addf %12, %17 : vector<512x16xf32>
    %c1_21 = arith.constant 1 : index
    %c0_22 = arith.constant 0 : index
    %c0_23 = arith.constant 0 : index
    %c0_24 = arith.constant 0 : index
    %19 = vector.load %arg1[%c1_21, %c0_22, %c0_23, %c0_24] : memref<10x10x8x4xf32, #tpu.memory_space<vmem>>, vector<8x8x8x4xf32>
    %20 = vector.shape_cast %19 : vector<8x8x8x4xf32> to vector<512x4xf32>
    %c3 = arith.constant 3 : index
    %c0_25 = arith.constant 0 : index
    %c0_26 = arith.constant 0 : index
    %21 = vector.load %arg2[%c3, %c0_25, %c0_26] : memref<9x4x16xf32, #tpu.memory_space<vmem>>, vector<1x4x16xf32>
    %22 = vector.shape_cast %21 : vector<1x4x16xf32> to vector<4x16xf32>
    %cst_27 = arith.constant dense<0.000000e+00> : vector<512x16xf32>
    %23 = tpu.matmul %20, %22, %cst_27 {dimension_numbers = #tpu.dot_dimension_numbers<[1], [0], [0], [1], [0, 0, 1, 1], [], []>} : vector<512x4xf32>, vector<4x16xf32>, vector<512x16xf32> -> vector<512x16xf32>
    %24 = arith.addf %18, %23 : vector<512x16xf32>
    %c1_28 = arith.constant 1 : index
    %c1_29 = arith.constant 1 : index
    %c0_30 = arith.constant 0 : index
    %c0_31 = arith.constant 0 : index
    %25 = vector.load %arg1[%c1_28, %c1_29, %c0_30, %c0_31] : memref<10x10x8x4xf32, #tpu.memory_space<vmem>>, vector<8x8x8x4xf32>
    %26 = vector.shape_cast %25 : vector<8x8x8x4xf32> to vector<512x4xf32>
    %c4 = arith.constant 4 : index
    %c0_32 = arith.constant 0 : index
    %c0_33 = arith.constant 0 : index
    %27 = vector.load %arg2[%c4, %c0_32, %c0_33] : memref<9x4x16xf32, #tpu.memory_space<vmem>>, vector<1x4x16xf32>
    %28 = vector.shape_cast %27 : vector<1x4x16xf32> to vector<4x16xf32>
    %cst_34 = arith.constant dense<0.000000e+00> : vector<512x16xf32>
    %29 = tpu.matmul %26, %28, %cst_34 {dimension_numbers = #tpu.dot_dimension_numbers<[1], [0], [0], [1], [0, 0, 1, 1], [], []>} : vector<512x4xf32>, vector<4x16xf32>, vector<512x16xf32> -> vector<512x16xf32>
    %30 = arith.addf %24, %29 : vector<512x16xf32>
    %c1_35 = arith.constant 1 : index
    %c2_36 = arith.constant 2 : index
    %c0_37 = arith.constant 0 : index
    %c0_38 = arith.constant 0 : index
    %31 = vector.load %arg1[%c1_35, %c2_36, %c0_37, %c0_38] : memref<10x10x8x4xf32, #tpu.memory_space<vmem>>, vector<8x8x8x4xf32>
    %32 = vector.shape_cast %31 : vector<8x8x8x4xf32> to vector<512x4xf32>
    %c5 = arith.constant 5 : index
    %c0_39 = arith.constant 0 : index
    %c0_40 = arith.constant 0 : index
    %33 = vector.load %arg2[%c5, %c0_39, %c0_40] : memref<9x4x16xf32, #tpu.memory_space<vmem>>, vector<1x4x16xf32>
    %34 = vector.shape_cast %33 : vector<1x4x16xf32> to vector<4x16xf32>
    %cst_41 = arith.constant dense<0.000000e+00> : vector<512x16xf32>
    %35 = tpu.matmul %32, %34, %cst_41 {dimension_numbers = #tpu.dot_dimension_numbers<[1], [0], [0], [1], [0, 0, 1, 1], [], []>} : vector<512x4xf32>, vector<4x16xf32>, vector<512x16xf32> -> vector<512x16xf32>
    %36 = arith.addf %30, %35 : vector<512x16xf32>
    %c2_42 = arith.constant 2 : index
    %c0_43 = arith.constant 0 : index
    %c0_44 = arith.constant 0 : index
    %c0_45 = arith.constant 0 : index
    %37 = vector.load %arg1[%c2_42, %c0_43, %c0_44, %c0_45] : memref<10x10x8x4xf32, #tpu.memory_space<vmem>>, vector<8x8x8x4xf32>
    %38 = vector.shape_cast %37 : vector<8x8x8x4xf32> to vector<512x4xf32>
    %c6 = arith.constant 6 : index
    %c0_46 = arith.constant 0 : index
    %c0_47 = arith.constant 0 : index
    %39 = vector.load %arg2[%c6, %c0_46, %c0_47] : memref<9x4x16xf32, #tpu.memory_space<vmem>>, vector<1x4x16xf32>
    %40 = vector.shape_cast %39 : vector<1x4x16xf32> to vector<4x16xf32>
    %cst_48 = arith.constant dense<0.000000e+00> : vector<512x16xf32>
    %41 = tpu.matmul %38, %40, %cst_48 {dimension_numbers = #tpu.dot_dimension_numbers<[1], [0], [0], [1], [0, 0, 1, 1], [], []>} : vector<512x4xf32>, vector<4x16xf32>, vector<512x16xf32> -> vector<512x16xf32>
    %42 = arith.addf %36, %41 : vector<512x16xf32>
    %c2_49 = arith.constant 2 : index
    %c1_50 = arith.constant 1 : index
    %c0_51 = arith.constant 0 : index
    %c0_52 = arith.constant 0 : index
    %43 = vector.load %arg1[%c2_49, %c1_50, %c0_51, %c0_52] : memref<10x10x8x4xf32, #tpu.memory_space<vmem>>, vector<8x8x8x4xf32>
    %44 = vector.shape_cast %43 : vector<8x8x8x4xf32> to vector<512x4xf32>
    %c7 = arith.constant 7 : index
    %c0_53 = arith.constant 0 : index
    %c0_54 = arith.constant 0 : index
    %45 = vector.load %arg2[%c7, %c0_53, %c0_54] : memref<9x4x16xf32, #tpu.memory_space<vmem>>, vector<1x4x16xf32>
    %46 = vector.shape_cast %45 : vector<1x4x16xf32> to vector<4x16xf32>
    %cst_55 = arith.constant dense<0.000000e+00> : vector<512x16xf32>
    %47 = tpu.matmul %44, %46, %cst_55 {dimension_numbers = #tpu.dot_dimension_numbers<[1], [0], [0], [1], [0, 0, 1, 1], [], []>} : vector<512x4xf32>, vector<4x16xf32>, vector<512x16xf32> -> vector<512x16xf32>
    %48 = arith.addf %42, %47 : vector<512x16xf32>
    %c2_56 = arith.constant 2 : index
    %c2_57 = arith.constant 2 : index
    %c0_58 = arith.constant 0 : index
    %c0_59 = arith.constant 0 : index
    %49 = vector.load %arg1[%c2_56, %c2_57, %c0_58, %c0_59] : memref<10x10x8x4xf32, #tpu.memory_space<vmem>>, vector<8x8x8x4xf32>
    %50 = vector.shape_cast %49 : vector<8x8x8x4xf32> to vector<512x4xf32>
    %c8 = arith.constant 8 : index
    %c0_60 = arith.constant 0 : index
    %c0_61 = arith.constant 0 : index
    %51 = vector.load %arg2[%c8, %c0_60, %c0_61] : memref<9x4x16xf32, #tpu.memory_space<vmem>>, vector<1x4x16xf32>
    %52 = vector.shape_cast %51 : vector<1x4x16xf32> to vector<4x16xf32>
    %cst_62 = arith.constant dense<0.000000e+00> : vector<512x16xf32>
    %53 = tpu.matmul %50, %52, %cst_62 {dimension_numbers = #tpu.dot_dimension_numbers<[1], [0], [0], [1], [0, 0, 1, 1], [], []>} : vector<512x4xf32>, vector<4x16xf32>, vector<512x16xf32> -> vector<512x16xf32>
    %54 = arith.addf %48, %53 : vector<512x16xf32>
    %c0_63 = arith.constant 0 : index
    %c0_64 = arith.constant 0 : index
    %55 = vector.load %arg3[%c0_63, %c0_64] : memref<1x16xf32, #tpu.memory_space<vmem>>, vector<1x16xf32>
    %56 = vector.broadcast %55 : vector<1x16xf32> to vector<512x16xf32>
    %57 = arith.addf %54, %56 : vector<512x16xf32>
    %cst_65 = arith.constant 0.000000e+00 : f32
    %58 = vector.broadcast %cst_65 : f32 to vector<512x16xf32>
    %59 = arith.maximumf %57, %58 : vector<512x16xf32>
    %60 = vector.shape_cast %59 : vector<512x16xf32> to vector<64x8x16xf32>
    %c0_66 = arith.constant 0 : index
    %c0_67 = arith.constant 0 : index
    %c0_68 = arith.constant 0 : index
    %61 = vector.load %arg4[%c0_66, %c0_67, %c0_68] : memref<64x16x32xf32, #tpu.memory_space<vmem>>, vector<64x16x32xf32>
    "tpu.trace_start"() <{level = 10 : i32, message = "snc,sco->sno"}> : () -> ()
    %cst_69 = arith.constant dense<0.000000e+00> : vector<64x8x32xf32>
    %62 = tpu.matmul %60, %61, %cst_69 {dimension_numbers = #tpu.dot_dimension_numbers<[2], [1], [1], [2], [0, 0, 0, 1, 1, 2], [0], [0]>} : vector<64x8x16xf32>, vector<64x16x32xf32>, vector<64x8x32xf32> -> vector<64x8x32xf32>
    "tpu.trace_stop"() : () -> ()
    %cst_70 = arith.constant dense<0.000000e+00> : vector<8x32xf32>
    %63 = vector.multi_reduction <add>, %62, %cst_70 [0] : vector<64x8x32xf32> to vector<8x32xf32>
    %c0_71 = arith.constant 0 : index
    %c0_72 = arith.constant 0 : index
    %64 = vector.load %arg5[%c0_71, %c0_72] : memref<1x32xf32, #tpu.memory_space<vmem>>, vector<1x32xf32>
    %65 = vector.broadcast %64 : vector<1x32xf32> to vector<8x32xf32>
    %66 = arith.addf %63, %65 : vector<8x32xf32>
    %cst_73 = arith.constant 0.000000e+00 : f32
    %67 = vector.broadcast %cst_73 : f32 to vector<8x32xf32>
    %68 = arith.maximumf %66, %67 : vector<8x32xf32>
    %c0_74 = arith.constant 0 : index
    %c0_75 = arith.constant 0 : index
    %69 = vector.load %arg6[%c0_74, %c0_75] : memref<32x32xf32, #tpu.memory_space<vmem>>, vector<32x32xf32>
    %cst_76 = arith.constant dense<0.000000e+00> : vector<8x32xf32>
    %70 = tpu.matmul %68, %69, %cst_76 {dimension_numbers = #tpu.dot_dimension_numbers<[1], [0], [0], [1], [0, 0, 1, 1], [], []>} : vector<8x32xf32>, vector<32x32xf32>, vector<8x32xf32> -> vector<8x32xf32>
    %c0_77 = arith.constant 0 : index
    %c0_78 = arith.constant 0 : index
    %71 = vector.load %arg7[%c0_77, %c0_78] : memref<1x32xf32, #tpu.memory_space<vmem>>, vector<1x32xf32>
    %72 = vector.broadcast %71 : vector<1x32xf32> to vector<8x32xf32>
    %73 = arith.addf %70, %72 : vector<8x32xf32>
    %c0_79 = arith.constant 0 : index
    %c0_80 = arith.constant 0 : index
    %74 = vector.load %arg8[%c0_79, %c0_80] : memref<8x32xf32, #tpu.memory_space<vmem>>, vector<8x32xf32>
    tpu.vector_store %arg8[%c0_79, %c0_80], %73 {strides = array<i32>} : memref<8x32xf32, #tpu.memory_space<vmem>>, vector<8x32xf32>,
    return
  }
  func.func @transform_0(%arg0: i32) -> (i32, i32, i32, i32) {
    %c0_i32 = arith.constant 0 : i32
    %c0_i32_0 = arith.constant 0 : i32
    %c0_i32_1 = arith.constant 0 : i32
    %c0_i32_2 = arith.constant 0 : i32
    return %c0_i32, %c0_i32_0, %arg0, %c0_i32_1 : i32, i32, i32, i32
  }
  func.func @transform_1(%arg0: i32) -> (i32, i32, i32) {
    %c0_i32 = arith.constant 0 : i32
    %c0_i32_0 = arith.constant 0 : i32
    %c0_i32_1 = arith.constant 0 : i32
    %c0_i32_2 = arith.constant 0 : i32
    return %c0_i32, %c0_i32_0, %c0_i32_1 : i32, i32, i32
  }
  func.func @transform_2(%arg0: i32) -> (i32, i32) {
    %c0_i32 = arith.constant 0 : i32
    %c0_i32_0 = arith.constant 0 : i32
    %c0_i32_1 = arith.constant 0 : i32
    return %c0_i32, %c0_i32_0 : i32, i32
  }
  func.func @transform_3(%arg0: i32) -> (i32, i32, i32) {
    %c0_i32 = arith.constant 0 : i32
    %c0_i32_0 = arith.constant 0 : i32
    %c0_i32_1 = arith.constant 0 : i32
    %c0_i32_2 = arith.constant 0 : i32
    return %c0_i32, %c0_i32_0, %c0_i32_1 : i32, i32, i32
  }
  func.func @transform_4(%arg0: i32) -> (i32, i32) {
    %c0_i32 = arith.constant 0 : i32
    %c0_i32_0 = arith.constant 0 : i32
    %c0_i32_1 = arith.constant 0 : i32
    return %c0_i32, %c0_i32_0 : i32, i32
  }
  func.func @transform_5(%arg0: i32) -> (i32, i32) {
    %c0_i32 = arith.constant 0 : i32
    %c0_i32_0 = arith.constant 0 : i32
    %c0_i32_1 = arith.constant 0 : i32
    return %c0_i32, %c0_i32_0 : i32, i32
  }
  func.func @transform_6(%arg0: i32) -> (i32, i32) {
    %c0_i32 = arith.constant 0 : i32
    %c0_i32_0 = arith.constant 0 : i32
    %c0_i32_1 = arith.constant 0 : i32
    return %c0_i32, %c0_i32_0 : i32, i32
  }
  func.func @transform_7(%arg0: i32) -> (i32, i32) {
    %c0_i32 = arith.constant 0 : i32
    %c0_i32_0 = arith.constant 0 : i32
    return %arg0, %c0_i32 : i32, i32
  }
}

</mosaic_0001>

<bundles_post_ra>
// kernel: representation_network.1
= control target key start
LH: loop header
LB: loop body
LE: loop exit
PB: predicated region body
PF: predicated region fallthrough
CT: control target
= control target key end

     0   :  { %vm351_vm0 = vcmask 1043456   ;;  %vm158_vm1 = vcmask 31744   ;;  %vm15472_vm2 = vmmov 0   ;;  %vm6560_vm3 = vcmask 130048   ;;  %s18705_s1 = inlined_call_operand.vmem [shape: f32[9,4,16], index: 1, kind: input, shape index: {}]   ;;  %s18706_s0 = inlined_call_operand.vmem [shape: f32[10,10,8,4], index: 0, kind: input, shape index: {}]   ;;  %s18707_s3 = inlined_call_operand.vmem [shape: f32[64,16,32], index: 3, kind: input, shape index: {}]   ;;  %s18708_s2 = inlined_call_operand.vmem [shape: f32[1,16], index: 2, kind: input, shape index: {}]   ;;  %s18709_s5 = inlined_call_operand.vmem [shape: f32[32,32], index: 5, kind: input, shape index: {}]   ;;  %s18710_s4 = inlined_call_operand.vmem [shape: f32[1,32], index: 4, kind: input, shape index: {}]   ;;  %s18711_s6 = inlined_call_operand.vmem [shape: f32[1,32], index: 6, kind: input, shape index: {}]   ;;  %s18712_s7 = inlined_call_operand.vmem [shape: f32[8,32], index: 7, kind: output, shape index: {}]  }
   0x1   :  { %v15517_v0 = vld [vmem:[%s18705_s1 + $0xc] sm:$0xf]  ;;  %v15522_v1 = vld [vmem:[%s18706_s0 + $0x50] sm:$0xff]  ;;  %v15527_v2 = vld [vmem:[%s18706_s0 + $0x58] sm:$0xff]  ;;  %vm11233_vm4 = vcmask 261120  }
   0x2   :  { %13708 = vmatprep.subr.msk.mxu0 %vm351_vm0, %v15517_v0  ;;  %13710 = vmatprep.mubr.msk.f32.mxu0 %vm158_vm1, %v15522_v1  ;;  %v11978_v3 = vld [vmem:[%s18705_s1 + $0x10] sm:$0xf]  ;;  %v15539_v4 = vld [vmem:[%s18706_s0 + $0x60] sm:$0xff]  ;;  %v15549_v6 = vld [vmem:[%s18706_s0 + $0x8] sm:$0xff] }
   0x3   :  { %13709 = vmatpush3.msk.msra.mxu0 %vm351_vm0, %v15517_v0  ;;  %v11523_v5 = vld [vmem:[%s18705_s1 + $0x4] sm:$0xf]  ;;  %v15560_v7 = vld [vmem:[%s18706_s0 + $0x68] sm:$0xff]  ;;  %v15565_v8 = vld [vmem:[%s18706_s0 + $0x10] sm:$0xff]  ;;  %13416 = vmatprep.mubr.msk.f32.mxu1 %vm158_vm1, %v15549_v6 }
   0x4   :  { %13711 = vmatmul.mubr.msk.f32.vlgmr.msra.gmra.mrb[0].mxu0 %vm158_vm1, %v15527_v2  ;;  %13806 = vmatprep.subr.msk.mxu0 %vm351_vm0, %v11978_v3  ;;  %v15573_v9 = vld [vmem:[%s18706_s0 + $0x70] sm:$0xff]  ;;  %v15578_v10 = vld [vmem:[%s18706_s0 + $0x18] sm:$0xff]  ;;  %v15597_v12 = vld [vmem:[%s18706_s0 + $0x20] sm:$0xff] }
   0x5   :  { %13807 = vmatpush3.msk.msra.mxu0 %vm351_vm0, %v11978_v3  ;;  %13713 = vmatprep.mubr.msk.f32.mxu0 %vm158_vm1, %v15539_v4  ;;  %v15590_v11 = vld [vmem:[%s18706_s0 + $0x78] sm:$0xff]  ;;  %v15602_v13 = vld [vmem:[%s18706_s0 + $0x80] sm:$0xff]  ;;  %v15607_v14 = vld [vmem:[%s18706_s0 + $0x28] sm:$0xff] }
   0x6   :  { %13414 = vmatprep.subr.msk.mxu1 %vm351_vm0, %v11523_v5  ;;  %v15618_v15 = vld [vmem:[%s18706_s0 + $0x88] sm:$0xff]  ;;  %v15625_v16 = vld [vmem:[%s18706_s0 + $0x30] sm:$0xff]  ;;  %v15630_v17 = vld [vmem:[%s18706_s0 + $0xa0] sm:$0xff] }
   0x7   :  { %13415 = vmatpush3.msk.msra.mxu1 %vm351_vm0, %v11523_v5  ;;  %v15635_v18 = vld [vmem:[%s18706_s0 + $0x38] sm:$0xff]  ;;  %v15646_v19 = vld [vmem:[%s18706_s0 + $0xa8] sm:$0xff]  ;;  %v11466_v20 = vld [vmem:[%s18706_s0 + $0x40] sm:$0xff] }
   0x8   :  { %13714 = vmatmul.mubr.msk.f32.gmra.mrb[2].mxu0 %vm158_vm1, %v15560_v7  ;;  %13417 = vmatmul.mubr.msk.f32.vlgmr.msra.gmra.mrb[0].mxu1 %vm158_vm1, %v15565_v8  ;;  %v15656_v21 = vld [vmem:[%s18705_s1 + $0x14] sm:$0xf]  ;;  %v15673_v23 = vld [vmem:[%s18706_s0 + $0xb8] sm:$0xff]  ;;  %v15680_v24 = vld [vmem:[%s18706_s0 + $0xc0] sm:$0xff] }
   0x9   :  { %13716 = vmatprep.mubr.msk.f32.mxu0 %vm158_vm1, %v15573_v9  ;;  %13419 = vmatprep.mubr.msk.f32.mxu1 %vm158_vm1, %v15578_v10  ;;  %v15661_v22 = vld [vmem:[%s18706_s0 + $0xb0] sm:$0xff]  ;;  %v15691_v25 = vld [vmem:[%s18706_s0 + $0xc8] sm:$0xff]  ;;  %v90_v26 = vld [vmem:[%s18705_s1] sm:$0xf] }
   0xa   :  { %13904 = vmatprep.subr.msk.mxu0 %vm351_vm0, %v15656_v21  ;;  %v15701_v27 = vld [vmem:[%s18706_s0 + $0xd0] sm:$0xff]  ;;  %13512 = vmatprep.subr.msk.mxu1 %vm351_vm0, %v90_v26  ;;  %v15714_v28 = vld [vmem:[%s18706_s0 + $0xd8] sm:$0xff]  ;;  %v15744_v32 = vld [vmem:[%s18706_s0 + $0x100] sm:$0xff] }
   0xb   :  { %13513 = vmatpush3.msk.msra.mxu1 %vm351_vm0, %v90_v26  ;;  %v15721_v29 = vld [vmem:[%s18706_s0 + $0xf0] sm:$0xff]  ;;  %v15732_v30 = vld [vmem:[%s18706_s0 + $0xf8] sm:$0xff]  ;;  %v15755_v33 = vld [vmem:[%s18706_s0 + $0x108] sm:$0xff] }
   0xc   :  { %13717 = vmatmul.mubr.msk.f32.gmra.mrb[4].mxu0 %vm158_vm1, %v15590_v11  ;;  %13420 = vmatmul.mubr.msk.f32.gmra.mrb[2].mxu1 %vm158_vm1, %v15597_v12  ;;  %v15739_v31 = vld [vmem:[%s18706_s0 + $0x90] sm:$0xff]  ;;  %v15773_v35 = vld [vmem:[%s18706_s0 + $0x118] sm:$0xff]  ;;  %v15780_v36 = vld [vmem:[%s18706_s0 + $0x120] sm:$0xff] }
   0xd   :  { %13719 = vmatprep.mubr.msk.f32.mxu0 %vm158_vm1, %v15602_v13  ;;  %13422 = vmatprep.mubr.msk.f32.mxu1 %vm158_vm1, %v15607_v14  ;;  %18726 = vst [vmem:[#allocation2_spill] sm:$0xff] %v15739_v31  ;;  %v15762_v34 = vld [vmem:[%s18706_s0 + $0x110] sm:$0xff]  ;;  %v15791_v37 = vld [vmem:[%s18706_s0 + $0x128] sm:$0xff]  ;;  %v15798_v38 = vld [vmem:[%s18706_s0 + $0x140] sm:$0xff] }
   0xe   :  { %v15809_v39 = vld [vmem:[%s18706_s0 + $0x148] sm:$0xff]  ;;  %v15816_v40 = vld [vmem:[%s18706_s0 + $0xe0] sm:$0xff]  ;;  %v15821_v41 = vld [vmem:[%s18706_s0 + $0x150] sm:$0xff] }
   0xf   :  { %18727 = vst [vmem:[#allocation3_spill] sm:$0xff] %v15816_v40  ;;  %v15832_v42 = vld [vmem:[%s18706_s0 + $0x158] sm:$0xff]  ;;  %v15839_v43 = vld [vmem:[%s18706_s0 + $0x160] sm:$0xff]  ;;  %v15850_v44 = vld [vmem:[%s18706_s0 + $0x168] sm:$0xff] }
  0x10   :  { %13720 = vmatmul.mubr.msk.f32.gmra.mrb[6].mxu0 %vm158_vm1, %v15618_v15  ;;  %13423 = vmatmul.mubr.msk.f32.gmra.mrb[4].mxu1 %vm158_vm1, %v15625_v16  ;;  %18728 = vst [vmem:[#allocation4_spill] sm:$0xff] %v15832_v42  ;;  %18729 = vst [vmem:[#allocation5_spill] sm:$0xff] %v15839_v43  ;;  %v15857_v45 = vld [vmem:[%s18706_s0 + $0x170] sm:$0xff]  ;;  %v15868_v46 = vld [vmem:[%s18706_s0 + $0x178] sm:$0xff] }
  0x11   :  { %13722 = vmatprep.mubr.msk.f32.mxu0 %vm158_vm1, %v15630_v17  ;;  %13425 = vmatprep.mubr.msk.f32.mxu1 %vm158_vm1, %v15635_v18  ;;  %18730 = vst [vmem:[#allocation6_spill] sm:$0xff] %v15850_v44  ;;  %18731 = vst [vmem:[#allocation7_spill] sm:$0xff] %v15868_v46  ;;  %v15875_v47 = vld [vmem:[%s18706_s0 + $0x190] sm:$0xff]  ;;  %v15886_v48 = vld [vmem:[%s18706_s0 + $0x198] sm:$0xff] }
  0x12   :  { %18732 = vst [vmem:[#allocation8_spill] sm:$0xff] %v15875_v47  ;;  %v15893_v49 = vld [vmem:[%s18706_s0 + $0x130] sm:$0xff]  ;;  %v15910_v50 = vld [vmem:[%s18705_s1 + $0x18] sm:$0xf]  ;;  %v15939_v51 = vld [vmem:[%s18706_s0 + $0x180] sm:$0xff] }
  0x13   :  { %18733 = vst [vmem:[#allocation9_spill] sm:$0xff] %v15893_v49  ;;  %v15952_v52 = vld [vmem:[%s18706_s0 + $0x1a0] sm:$0xff]  ;;  %v15957_v53 = vld [vmem:[%s18706_s0 + $0x1a8] sm:$0xff]  ;;  %v15970_v54 = vld [vmem:[%s18706_s0 + $0x1b0] sm:$0xff] }
  0x14   :  { %13723 = vmatmul.mubr.msk.f32.gmra.mrb[8].mxu0 %vm158_vm1, %v15646_v19  ;;  %13426 = vmatmul.mubr.msk.f32.gmra.mrb[6].mxu1 %vm158_vm1, %v11466_v20  ;;  %v15975_v55 = vld [vmem:[%s18706_s0 + $0x1b8] sm:$0xff]  ;;  %v15988_v56 = vld [vmem:[%s18706_s0 + $0x1c0] sm:$0xff]  ;;  %v15993_v57 = vld [vmem:[%s18706_s0 + $0x1c8] sm:$0xff] }
  0x15   :  { %13725 = vmatprep.mubr.msk.f32.mxu0 %vm158_vm1, %v15661_v22  ;;  %13428 = vmatprep.mubr.msk.f32.mxu1 %vm158_vm1, %v15527_v2  ;;  %v16006_v58 = vld [vmem:[%s18706_s0 + $0x1d0] sm:$0xff]  ;;  %v16011_v59 = vld [vmem:[%s18706_s0 + $0x1e8] sm:$0xff]  ;;  %v16029_v61 = vld [vmem:[%s18706_s0 + $0x1f8] sm:$0xff] }
  0x16   :  { %v16024_v60 = vld [vmem:[%s18706_s0 + $0x1f0] sm:$0xff]  ;;  %v16042_v62 = vld [vmem:[%s18706_s0 + $0x200] sm:$0xff]  ;;  %v16047_v63 = vld [vmem:[%s18706_s0 + $0x208] sm:$0xff] }
  0x17   :  { %v16060_v3 = vld [vmem:[%s18706_s0 + $0x210] sm:$0xff]  ;;  %v16065_v5 = vld [vmem:[%s18706_s0 + $0x218] sm:$0xff]  ;;  %v16078_v20 = vld [vmem:[%s18706_s0 + $0x220] sm:$0xff] }
  0x18   :  { %13726 = vmatmul.mubr.msk.f32.gmra.mrb[10].mxu0 %vm158_vm1, %v15673_v23  ;;  %13429 = vmatmul.mubr.msk.f32.gmra.mrb[8].mxu1 %vm158_vm1, %v15539_v4  ;;  %v16096_v26 = vld [vmem:[%s18706_s0 + $0x240] sm:$0xff] }
  0x19   :  { %13728 = vmatprep.mubr.msk.f32.mxu0 %vm158_vm1, %v15680_v24  ;;  %13431 = vmatprep.mubr.msk.f32.mxu1 %vm158_vm1, %v15560_v7 }
  0x1c   :  { %13729 = vmatmul.mubr.msk.f32.gmra.mrb[12].mxu0 %vm158_vm1, %v15691_v25  ;;  %13432 = vmatmul.mubr.msk.f32.gmra.mrb[10].mxu1 %vm158_vm1, %v15573_v9 }
  0x1d   :  { %13731 = vmatprep.mubr.msk.f32.mxu0 %vm158_vm1, %v15701_v27  ;;  %13434 = vmatprep.mubr.msk.f32.mxu1 %vm158_vm1, %v15590_v11 }
  0x20   :  { %13732 = vmatmul.mubr.msk.f32.gmra.mrb[14].mxu0 %vm158_vm1, %v15714_v28  ;;  %13435 = vmatmul.mubr.msk.f32.gmra.mrb[12].mxu1 %vm158_vm1, %v15602_v13 }
  0x21   :  { %13734 = vmatprep.mubr.msk.f32.mxu0 %vm158_vm1, %v15721_v29  ;;  %13437 = vmatprep.mubr.msk.f32.mxu1 %vm158_vm1, %v15618_v15 }
  0x24   :  { %13735 = vmatmul.mubr.msk.f32.gmra.mrb[16].mxu0 %vm158_vm1, %v15732_v30  ;;  %13438 = vmatmul.mubr.msk.f32.gmra.mrb[14].mxu1 %vm158_vm1, %v15739_v31 }
  0x25   :  { %13737 = vmatprep.mubr.msk.f32.mxu0 %vm158_vm1, %v15744_v32  ;;  %13440 = vmatprep.mubr.msk.f32.mxu1 %vm158_vm1, %v15646_v19 }
  0x28   :  { %13738 = vmatmul.mubr.msk.f32.gmra.mrb[18].mxu0 %vm158_vm1, %v15755_v33  ;;  %13441 = vmatmul.mubr.msk.f32.gmra.mrb[16].mxu1 %vm158_vm1, %v15661_v22 }
  0x29   :  { %13740 = vmatprep.mubr.msk.f32.mxu0 %vm158_vm1, %v15762_v34  ;;  %13443 = vmatprep.mubr.msk.f32.mxu1 %vm158_vm1, %v15673_v23 }
  0x2c   :  { %13741 = vmatmul.mubr.msk.f32.gmra.mrb[20].mxu0 %vm158_vm1, %v15773_v35  ;;  %13444 = vmatmul.mubr.msk.f32.gmra.mrb[18].mxu1 %vm158_vm1, %v15680_v24 }
  0x2d   :  { %13743 = vmatprep.mubr.msk.f32.mxu0 %vm158_vm1, %v15780_v36  ;;  %13446 = vmatprep.mubr.msk.f32.mxu1 %vm158_vm1, %v15691_v25 }
  0x30   :  { %13744 = vmatmul.mubr.msk.f32.gmra.mrb[22].mxu0 %vm158_vm1, %v15791_v37  ;;  %13447 = vmatmul.mubr.msk.f32.gmra.mrb[20].mxu1 %vm158_vm1, %v15701_v27 }
  0x31   :  { %13746 = vmatprep.mubr.msk.f32.mxu0 %vm158_vm1, %v15798_v38  ;;  %13449 = vmatprep.mubr.msk.f32.mxu1 %vm158_vm1, %v15714_v28 }
  0x34   :  { %13747 = vmatmul.mubr.msk.f32.gmra.mrb[24].mxu0 %vm158_vm1, %v15809_v39  ;;  %13450 = vmatmul.mubr.msk.f32.gmra.mrb[22].mxu1 %vm158_vm1, %v15816_v40 }
  0x35   :  { %13749 = vmatprep.mubr.msk.f32.mxu0 %vm158_vm1, %v15821_v41  ;;  %13452 = vmatprep.mubr.msk.f32.mxu1 %vm158_vm1, %v15732_v30 }
  0x38   :  { %13750 = vmatmul.mubr.msk.f32.gmra.mrb[26].mxu0 %vm158_vm1, %v15832_v42  ;;  %13453 = vmatmul.mubr.msk.f32.gmra.mrb[24].mxu1 %vm158_vm1, %v15744_v32 }
  0x39   :  { %13752 = vmatprep.mubr.msk.f32.mxu0 %vm158_vm1, %v15839_v43  ;;  %13455 = vmatprep.mubr.msk.f32.mxu1 %vm158_vm1, %v15755_v33 }
  0x3c   :  { %13753 = vmatmul.mubr.msk.f32.gmra.mrb[28].mxu0 %vm158_vm1, %v15850_v44  ;;  %13456 = vmatmul.mubr.msk.f32.gmra.mrb[26].mxu1 %vm158_vm1, %v15762_v34 }
  0x3d   :  { %13755 = vmatprep.mubr.msk.f32.mxu0 %vm158_vm1, %v15857_v45  ;;  %13458 = vmatprep.mubr.msk.f32.mxu1 %vm158_vm1, %v15773_v35 }
  0x40   :  { %13756 = vmatmul.mubr.msk.f32.gmra.mrb[30].mxu0 %vm158_vm1, %v15868_v46  ;;  %13459 = vmatmul.mubr.msk.f32.gmra.mrb[28].mxu1 %vm158_vm1, %v15780_v36 }
  0x41   :  { %13758 = vmatprep.mubr.msk.f32.mxu0 %vm158_vm1, %v15875_v47  ;;  %13461 = vmatprep.mubr.msk.f32.mxu1 %vm158_vm1, %v15791_v37  ;;  %v16119_v47 = vld [vmem:[%s18706_s0 + $0x258] sm:$0xff] }
  0x44   :  { %13759 = vmatmul.mubr.msk.f32.gmra.mrb[32].mxu0 %vm158_vm1, %v15886_v48  ;;  %13462 = vmatmul.mubr.msk.f32.gmra.mrb[30].mxu1 %vm158_vm1, %v15893_v49 }
  0x45   :  { %13808 = vmatprep.mubr.msk.f32.mxu0 %vm158_vm1, %v15527_v2  ;;  %13464 = vmatprep.mubr.msk.f32.mxu1 %vm158_vm1, %v15809_v39 }
  0x48   :  { %13809 = vmatmul.mubr.msk.f32.vlgmr.msra.gmra.mrb[0].mxu0 %vm158_vm1, %v15539_v4  ;;  %13465 = vmatmul.mubr.msk.f32.gmra.mrb[32].mxu1 %vm158_vm1, %v15821_v41 }
  0x49   :  { %13905 = vmatpush3.msk.msra.mxu0 %vm351_vm0, %v15656_v21  ;;  %13811 = vmatprep.mubr.msk.f32.mxu0 %vm158_vm1, %v15560_v7  ;;  %v16083_v21 = vld [vmem:[%s18706_s0 + $0x238] sm:$0xff] }
  0x4a   :  { %13467 = vmatprep.mubr.msk.f32.mxu1 %vm158_vm1, %v15832_v42  ;;  %14002 = vmatprep.subr.msk.mxu0 %vm351_vm0, %v15910_v50 }
  0x4c   :  { %13812 = vmatmul.mubr.msk.f32.gmra.mrb[2].mxu0 %vm158_vm1, %v15573_v9  ;;  %13468 = vmatmul.mubr.msk.f32.gmra.mrb[34].mxu1 %vm158_vm1, %v15839_v43 }
  0x4d   :  { %13814 = vmatprep.mubr.msk.f32.mxu0 %vm158_vm1, %v15590_v11  ;;  %13470 = vmatprep.mubr.msk.f32.mxu1 %vm158_vm1, %v15850_v44 }
  0x50   :  { %13815 = vmatmul.mubr.msk.f32.gmra.mrb[4].mxu0 %vm158_vm1, %v15602_v13  ;;  %13471 = vmatmul.mubr.msk.f32.gmra.mrb[36].mxu1 %vm158_vm1, %v15857_v45 }
  0x51   :  { %13817 = vmatprep.mubr.msk.f32.mxu0 %vm158_vm1, %v15618_v15  ;;  %13473 = vmatprep.mubr.msk.f32.mxu1 %vm158_vm1, %v15868_v46 }
  0x54   :  { %13818 = vmatmul.mubr.msk.f32.gmra.mrb[6].mxu0 %vm158_vm1, %v15739_v31  ;;  %13474 = vmatmul.mubr.msk.f32.gmra.mrb[38].mxu1 %vm158_vm1, %v15939_v51  ;;  %v16132_v31 = vld [vmem:[%s18706_s0 + $0x260] sm:$0xff] }
  0x55   :  { %13820 = vmatprep.mubr.msk.f32.mxu0 %vm158_vm1, %v15646_v19  ;;  %13476 = vmatprep.mubr.msk.f32.mxu1 %vm158_vm1, %v15886_v48 }
  0x58   :  { %13821 = vmatmul.mubr.msk.f32.gmra.mrb[8].mxu0 %vm158_vm1, %v15661_v22  ;;  %13477 = vmatmul.mubr.msk.f32.gmra.mrb[40].mxu1 %vm158_vm1, %v15952_v52 }
  0x59   :  { %13823 = vmatprep.mubr.msk.f32.mxu0 %vm158_vm1, %v15673_v23  ;;  %13479 = vmatprep.mubr.msk.f32.mxu1 %vm158_vm1, %v15957_v53 }
  0x5c   :  { %13824 = vmatmul.mubr.msk.f32.gmra.mrb[10].mxu0 %vm158_vm1, %v15680_v24  ;;  %13480 = vmatmul.mubr.msk.f32.gmra.mrb[42].mxu1 %vm158_vm1, %v15970_v54 }
  0x5d   :  { %13826 = vmatprep.mubr.msk.f32.mxu0 %vm158_vm1, %v15691_v25  ;;  %13482 = vmatprep.mubr.msk.f32.mxu1 %vm158_vm1, %v15975_v55 }
  0x60   :  { %13827 = vmatmul.mubr.msk.f32.gmra.mrb[12].mxu0 %vm158_vm1, %v15701_v27  ;;  %13483 = vmatmul.mubr.msk.f32.gmra.mrb[44].mxu1 %vm158_vm1, %v15988_v56 }
  0x61   :  { %13829 = vmatprep.mubr.msk.f32.mxu0 %vm158_vm1, %v15714_v28  ;;  %13485 = vmatprep.mubr.msk.f32.mxu1 %vm158_vm1, %v15993_v57 }
  0x64   :  { %13830 = vmatmul.mubr.msk.f32.gmra.mrb[14].mxu0 %vm158_vm1, %v15816_v40  ;;  %13486 = vmatmul.mubr.msk.f32.gmra.mrb[46].mxu1 %vm158_vm1, %v16006_v58  ;;  %v16101_v40 = vld [vmem:[%s18706_s0 + $0x248] sm:$0xff] }
  0x65   :  { %13832 = vmatprep.mubr.msk.f32.mxu0 %vm158_vm1, %v15732_v30  ;;  %13488 = vmatprep.mubr.msk.f32.mxu1 %vm158_vm1, %v16011_v59 }
  0x68   :  { %13833 = vmatmul.mubr.msk.f32.gmra.mrb[16].mxu0 %vm158_vm1, %v15744_v32  ;;  %13489 = vmatmul.mubr.msk.f32.gmra.mrb[48].mxu1 %vm158_vm1, %v16024_v60 }
  0x69   :  { %13835 = vmatprep.mubr.msk.f32.mxu0 %vm158_vm1, %v15755_v33  ;;  %13491 = vmatprep.mubr.msk.f32.mxu1 %vm158_vm1, %v16029_v61 }
  0x6c   :  { %13836 = vmatmul.mubr.msk.f32.gmra.mrb[18].mxu0 %vm158_vm1, %v15762_v34  ;;  %13492 = vmatmul.mubr.msk.f32.gmra.mrb[50].mxu1 %vm158_vm1, %v16042_v62 }
  0x6d   :  { %13838 = vmatprep.mubr.msk.f32.mxu0 %vm158_vm1, %v15773_v35  ;;  %13494 = vmatprep.mubr.msk.f32.mxu1 %vm158_vm1, %v16047_v63 }
  0x70   :  { %13839 = vmatmul.mubr.msk.f32.gmra.mrb[20].mxu0 %vm158_vm1, %v15780_v36  ;;  %13495 = vmatmul.mubr.msk.f32.gmra.mrb[52].mxu1 %vm158_vm1, %v16060_v3 }
  0x71   :  { %13841 = vmatprep.mubr.msk.f32.mxu0 %vm158_vm1, %v15791_v37  ;;  %13497 = vmatprep.mubr.msk.f32.mxu1 %vm158_vm1, %v16065_v5 }
  0x74   :  { %13842 = vmatmul.mubr.msk.f32.gmra.mrb[22].mxu0 %vm158_vm1, %v15893_v49  ;;  %13498 = vmatmul.mubr.msk.f32.gmra.mrb[54].mxu1 %vm158_vm1, %v16078_v20  ;;  %v16114_v49 = vld [vmem:[%s18706_s0 + $0x250] sm:$0xff] }
  0x75   :  { %13844 = vmatprep.mubr.msk.f32.mxu0 %vm158_vm1, %v15809_v39  ;;  %13500 = vmatprep.mubr.msk.f32.mxu1 %vm158_vm1, %v16083_v21 }
  0x78   :  { %13845 = vmatmul.mubr.msk.f32.gmra.mrb[24].mxu0 %vm158_vm1, %v15821_v41  ;;  %13501 = vmatmul.mubr.msk.f32.gmra.mrb[56].mxu1 %vm158_vm1, %v16096_v26 }
  0x79   :  { %13847 = vmatprep.mubr.msk.f32.mxu0 %vm158_vm1, %v15832_v42  ;;  %13503 = vmatprep.mubr.msk.f32.mxu1 %vm158_vm1, %v16101_v40  ;;  %v16137_v42 = vld [vmem:[%s18706_s0 + $0x268] sm:$0xff] }
  0x7c   :  { %13848 = vmatmul.mubr.msk.f32.gmra.mrb[26].mxu0 %vm158_vm1, %v15839_v43  ;;  %13504 = vmatmul.mubr.msk.f32.gmra.mrb[58].mxu1 %vm158_vm1, %v16114_v49  ;;  %v26_v43 = vld [vmem:[%s18706_s0] sm:$0xff] }
  0x7d   :  { %13850 = vmatprep.mubr.msk.f32.mxu0 %vm158_vm1, %v15850_v44  ;;  %13506 = vmatprep.mubr.msk.f32.mxu1 %vm158_vm1, %v16119_v47  ;;  %v16150_v44 = vld [vmem:[%s18706_s0 + $0x270] sm:$0xff] }
  0x80   :  { %13851 = vmatmul.mubr.msk.f32.gmra.mrb[28].mxu0 %vm158_vm1, %v15857_v45  ;;  %13507 = vmatmul.mubr.msk.f32.gmra.mrb[60].mxu1 %vm158_vm1, %v16132_v31 }
  0x81   :  { %13853 = vmatprep.mubr.msk.f32.mxu0 %vm158_vm1, %v15868_v46  ;;  %13509 = vmatprep.mubr.msk.f32.mxu1 %vm158_vm1, %v16137_v42  ;;  %v11718_v46 = vld [vmem:[%s18705_s1 + $0x8] sm:$0xf] }
  0x82   :  { %13610 = vmatprep.subr.msk.mxu1 %vm351_vm0, %v11718_v46 }
  0x84   :  { %13854 = vmatmul.mubr.msk.f32.gmra.mrb[30].mxu0 %vm158_vm1, %v15939_v51  ;;  %13510 = vmatmul.mubr.msk.f32.gmra.mrb[62].mxu1 %vm158_vm1, %v16150_v44 }
  0x85   :  { %13856 = vmatprep.mubr.msk.f32.mxu0 %vm158_vm1, %v15886_v48  ;;  %13514 = vmatprep.mubr.msk.f32.mxu1 %vm158_vm1, %v26_v43  ;;  %v11665_v43 = vld [vmem:[%s18706_s0 + $0x78] sm:$0xff] }
  0x88   :  { %13857 = vmatmul.mubr.msk.f32.gmra.mrb[32].mxu0 %vm158_vm1, %v15952_v52  ;;  %13515 = vmatmul.mubr.msk.f32.vlgmr.msra.gmra.mrb[0].mxu1 %vm158_vm1, %v15549_v6  ;;  %v16278_v6 = vld [vmem:[%s18706_s0 + $0x298] sm:$0xff] }
  0x89   :  { %13859 = vmatprep.mubr.msk.f32.mxu0 %vm158_vm1, %v15957_v53  ;;  %13517 = vmatprep.mubr.msk.f32.mxu1 %vm158_vm1, %v15565_v8  ;;  %v16289_v8 = vld [vmem:[%s18706_s0 + $0x2a0] sm:$0xff] }
  0x8a   :  { %13611 = vmatpush3.msk.msra.mxu1 %vm351_vm0, %v11718_v46  ;;  %v11667_v46 = vld [vmem:[%s18706_s0 + $0x88] sm:$0xff] }
  0x8b   :  { %14953 = vmatprep.subr.msk.mxu1 %vm351_vm0, %v15517_v0 }
  0x8c   :  { %13860 = vmatmul.mubr.msk.f32.gmra.mrb[34].mxu0 %vm158_vm1, %v15970_v54  ;;  %13518 = vmatmul.mubr.msk.f32.gmra.mrb[2].mxu1 %vm158_vm1, %v15578_v10  ;;  %v16296_v10 = vld [vmem:[%s18706_s0 + $0x2a8] sm:$0xff] }
  0x8d   :  { %13862 = vmatprep.mubr.msk.f32.mxu0 %vm158_vm1, %v15975_v55  ;;  %13520 = vmatprep.mubr.msk.f32.mxu1 %vm158_vm1, %v15597_v12  ;;  %v16307_v12 = vld [vmem:[%s18706_s0 + $0x2b0] sm:$0xff] }
  0x90   :  { %13863 = vmatmul.mubr.msk.f32.gmra.mrb[36].mxu0 %vm158_vm1, %v15988_v56  ;;  %13521 = vmatmul.mubr.msk.f32.gmra.mrb[4].mxu1 %vm158_vm1, %v15607_v14  ;;  %v16314_v14 = vld [vmem:[%s18706_s0 + $0x2b8] sm:$0xff] }
  0x91   :  { %13865 = vmatprep.mubr.msk.f32.mxu0 %vm158_vm1, %v15993_v57  ;;  %13523 = vmatprep.mubr.msk.f32.mxu1 %vm158_vm1, %v15625_v16  ;;  %v16325_v16 = vld [vmem:[%s18706_s0 + $0x2c0] sm:$0xff] }
  0x94   :  { %13866 = vmatmul.mubr.msk.f32.gmra.mrb[38].mxu0 %vm158_vm1, %v16006_v58  ;;  %13524 = vmatmul.mubr.msk.f32.gmra.mrb[6].mxu1 %vm158_vm1, %v15635_v18  ;;  %v18737_v18 = vld [vmem:[#allocation2_spill] sm:$0xff] }
  0x95   :  { %13868 = vmatprep.mubr.msk.f32.mxu0 %vm158_vm1, %v16011_v59  ;;  %13526 = vmatprep.mubr.msk.f32.mxu1 %vm158_vm1, %v15522_v1  ;;  %v16260_v1 = vld [vmem:[%s18706_s0 + $0x288] sm:$0xff] }
  0x98   :  { %13869 = vmatmul.mubr.msk.f32.gmra.mrb[40].mxu0 %vm158_vm1, %v16024_v60  ;;  %13527 = vmatmul.mubr.msk.f32.gmra.mrb[8].mxu1 %vm158_vm1, %v15527_v2  ;;  %v16271_v2 = vld [vmem:[%s18706_s0 + $0x290] sm:$0xff] }
  0x99   :  { %13871 = vmatprep.mubr.msk.f32.mxu0 %vm158_vm1, %v16029_v61  ;;  %13529 = vmatprep.mubr.msk.f32.mxu1 %vm158_vm1, %v15539_v4 }
  0x9c   :  { %13872 = vmatmul.mubr.msk.f32.gmra.mrb[42].mxu0 %vm158_vm1, %v16042_v62  ;;  %13530 = vmatmul.mubr.msk.f32.gmra.mrb[10].mxu1 %vm158_vm1, %v15560_v7 }
  0x9d   :  { %13874 = vmatprep.mubr.msk.f32.mxu0 %vm158_vm1, %v16047_v63  ;;  %13532 = vmatprep.mubr.msk.f32.mxu1 %vm158_vm1, %v15573_v9 }
  0xa0   :  { %13875 = vmatmul.mubr.msk.f32.gmra.mrb[44].mxu0 %vm158_vm1, %v16060_v3  ;;  %13533 = vmatmul.mubr.msk.f32.gmra.mrb[12].mxu1 %vm158_vm1, %v15590_v11 }
  0xa1   :  { %13877 = vmatprep.mubr.msk.f32.mxu0 %vm158_vm1, %v16065_v5  ;;  %13535 = vmatprep.mubr.msk.f32.mxu1 %vm158_vm1, %v15602_v13 }
  0xa4   :  { %13878 = vmatmul.mubr.msk.f32.gmra.mrb[46].mxu0 %vm158_vm1, %v16078_v20  ;;  %13536 = vmatmul.mubr.msk.f32.gmra.mrb[14].mxu1 %vm158_vm1, %v15618_v15 }
  0xa5   :  { %13880 = vmatprep.mubr.msk.f32.mxu0 %vm158_vm1, %v16083_v21  ;;  %13538 = vmatprep.mubr.msk.f32.mxu1 %vm158_vm1, %v15630_v17  ;;  %v16344_v17 = vld [vmem:[%s18705_s1 + $0x1c] sm:$0xf] }
  0xa8   :  { %13881 = vmatmul.mubr.msk.f32.gmra.mrb[48].mxu0 %vm158_vm1, %v16096_v26  ;;  %13539 = vmatmul.mubr.msk.f32.gmra.mrb[16].mxu1 %vm158_vm1, %v15646_v19  ;;  %v18740_v19 = vld [vmem:[#allocation3_spill] sm:$0xff] }
  0xa9   :  { %13883 = vmatprep.mubr.msk.f32.mxu0 %vm158_vm1, %v16101_v40  ;;  %13541 = vmatprep.mubr.msk.f32.mxu1 %vm158_vm1, %v15661_v22 }
  0xac   :  { %13884 = vmatmul.mubr.msk.f32.gmra.mrb[50].mxu0 %vm158_vm1, %v16114_v49  ;;  %13542 = vmatmul.mubr.msk.f32.gmra.mrb[18].mxu1 %vm158_vm1, %v15673_v23 }
  0xad   :  { %13886 = vmatprep.mubr.msk.f32.mxu0 %vm158_vm1, %v16119_v47  ;;  %13544 = vmatprep.mubr.msk.f32.mxu1 %vm158_vm1, %v15680_v24 }
  0xb0   :  { %13887 = vmatmul.mubr.msk.f32.gmra.mrb[52].mxu0 %vm158_vm1, %v16132_v31  ;;  %13545 = vmatmul.mubr.msk.f32.gmra.mrb[20].mxu1 %vm158_vm1, %v15691_v25 }
  0xb1   :  { %13889 = vmatprep.mubr.msk.f32.mxu0 %vm158_vm1, %v16137_v42  ;;  %13547 = vmatprep.mubr.msk.f32.mxu1 %vm158_vm1, %v15701_v27 }
  0xb4   :  { %13890 = vmatmul.mubr.msk.f32.gmra.mrb[54].mxu0 %vm158_vm1, %v16150_v44  ;;  %13548 = vmatmul.mubr.msk.f32.gmra.mrb[22].mxu1 %vm158_vm1, %v15714_v28 }
  0xb5   :  { %13892 = vmatprep.mubr.msk.f32.mxu0 %vm158_vm1, %v16260_v1  ;;  %13550 = vmatprep.mubr.msk.f32.mxu1 %vm158_vm1, %v15721_v29  ;;  %v11654_v29 = vld [vmem:[%s18706_s0 + $0x10] sm:$0xff] }
  0xb8   :  { %13893 = vmatmul.mubr.msk.f32.gmra.mrb[56].mxu0 %vm158_vm1, %v16271_v2  ;;  %13551 = vmatmul.mubr.msk.f32.gmra.mrb[24].mxu1 %vm158_vm1, %v15732_v30  ;;  %v11655_v30 = vld [vmem:[%s18706_s0 + $0x18] sm:$0xff] }
  0xb9   :  { %13895 = vmatprep.mubr.msk.f32.mxu0 %vm158_vm1, %v16278_v6  ;;  %13553 = vmatprep.mubr.msk.f32.mxu1 %vm158_vm1, %v15744_v32 }
  0xbc   :  { %13896 = vmatmul.mubr.msk.f32.gmra.mrb[58].mxu0 %vm158_vm1, %v16289_v8  ;;  %13554 = vmatmul.mubr.msk.f32.gmra.mrb[26].mxu1 %vm158_vm1, %v15755_v33 }
  0xbd   :  { %13898 = vmatprep.mubr.msk.f32.mxu0 %vm158_vm1, %v16296_v10  ;;  %13556 = vmatprep.mubr.msk.f32.mxu1 %vm158_vm1, %v15762_v34 }
  0xc0   :  { %13899 = vmatmul.mubr.msk.f32.gmra.mrb[60].mxu0 %vm158_vm1, %v16307_v12  ;;  %13557 = vmatmul.mubr.msk.f32.gmra.mrb[28].mxu1 %vm158_vm1, %v15773_v35 }
  0xc1   :  { %13901 = vmatprep.mubr.msk.f32.mxu0 %vm158_vm1, %v16314_v14  ;;  %13559 = vmatprep.mubr.msk.f32.mxu1 %vm158_vm1, %v15780_v36 }
  0xc4   :  { %13902 = vmatmul.mubr.msk.f32.gmra.mrb[62].mxu0 %vm158_vm1, %v16325_v16  ;;  %13560 = vmatmul.mubr.msk.f32.gmra.mrb[30].mxu1 %vm158_vm1, %v15791_v37 }
  0xc5   :  { %13906 = vmatprep.mubr.msk.f32.mxu0 %vm158_vm1, %v15539_v4  ;;  %13562 = vmatprep.mubr.msk.f32.mxu1 %vm158_vm1, %v15798_v38  ;;  %v18734_v4 = vld [vmem:[#allocation4_spill] sm:$0xff]  ;;  %v11662_v38 = vld [vmem:[%s18706_s0 + $0x60] sm:$0xff] }
  0xc8   :  { %13907 = vmatmul.mubr.msk.f32.vlgmr.msra.gmra.mrb[0].mxu0 %vm158_vm1, %v15560_v7  ;;  %13563 = vmatmul.mubr.msk.f32.gmra.mrb[32].mxu1 %vm158_vm1, %v15809_v39  ;;  %v18735_v7 = vld [vmem:[#allocation5_spill] sm:$0xff]  ;;  %v11663_v39 = vld [vmem:[%s18706_s0 + $0x68] sm:$0xff] }
  0xc9   :  { %14003 = vmatpush3.msk.msra.mxu0 %vm351_vm0, %v15910_v50  ;;  %13909 = vmatprep.mubr.msk.f32.mxu0 %vm158_vm1, %v15573_v9  ;;  %v18736_v9 = vld [vmem:[#allocation6_spill] sm:$0xff]  ;;  %v16599_v50 = vld [vmem:[%s18706_s0 + $0x228] sm:$0xff] }
  0xca   :  { %13565 = vmatprep.mubr.msk.f32.mxu1 %vm158_vm1, %v15821_v41  ;;  %14100 = vmatprep.subr.msk.mxu0 %vm351_vm0, %v16344_v17 }
  0xcc   :  { %13910 = vmatmul.mubr.msk.f32.gmra.mrb[2].mxu0 %vm158_vm1, %v15590_v11  ;;  %13566 = vmatmul.mubr.msk.f32.gmra.mrb[34].mxu1 %vm158_vm1, %v18734_v4  ;;  %v16371_v11 = vld [vmem:[%s18706_s0 + $0x98] sm:$0xff] }
  0xcd   :  { %13912 = vmatprep.mubr.msk.f32.mxu0 %vm158_vm1, %v15602_v13  ;;  %13568 = vmatprep.mubr.msk.f32.mxu1 %vm158_vm1, %v18735_v7  ;;  %v18738_v13 = vld [vmem:[#allocation7_spill] sm:$0xff] }
  0xd0   :  { %13913 = vmatmul.mubr.msk.f32.gmra.mrb[4].mxu0 %vm158_vm1, %v15618_v15  ;;  %13569 = vmatmul.mubr.msk.f32.gmra.mrb[36].mxu1 %vm158_vm1, %v18736_v9  ;;  %v18739_v15 = vld [vmem:[#allocation8_spill] sm:$0xff] }
  0xd1   :  { %13915 = vmatprep.mubr.msk.f32.mxu0 %vm158_vm1, %v18737_v18  ;;  %13571 = vmatprep.mubr.msk.f32.mxu1 %vm158_vm1, %v15857_v45  ;;  %v16849_v18 = vld [vmem:[%s18706_s0 + $0x1a8] sm:$0xff] }
  0xd4   :  { %13916 = vmatmul.mubr.msk.f32.gmra.mrb[6].mxu0 %vm158_vm1, %v16371_v11  ;;  %13572 = vmatmul.mubr.msk.f32.gmra.mrb[38].mxu1 %vm158_vm1, %v18738_v13 }
  0xd5   :  { %13918 = vmatprep.mubr.msk.f32.mxu0 %vm158_vm1, %v15661_v22  ;;  %13574 = vmatprep.mubr.msk.f32.mxu1 %vm158_vm1, %v18739_v15  ;;  %v16408_v22 = vld [vmem:[%s18706_s0 + $0xe8] sm:$0xff]  ;;  %v16872_v15 = vld [vmem:[%s18706_s0 + $0x1c0] sm:$0xff] }
  0xd8   :  { %13919 = vmatmul.mubr.msk.f32.gmra.mrb[8].mxu0 %vm158_vm1, %v15673_v23  ;;  %13575 = vmatmul.mubr.msk.f32.gmra.mrb[40].mxu1 %vm158_vm1, %v15886_v48  ;;  %v16415_v23 = vld [vmem:[%s18706_s0 + $0x1e0] sm:$0xff]  ;;  %v11668_v48 = vld [vmem:[%s18706_s0 + $0x90] sm:$0xff] }
  0xd9   :  { %13921 = vmatprep.mubr.msk.f32.mxu0 %vm158_vm1, %v15680_v24  ;;  %13577 = vmatprep.mubr.msk.f32.mxu1 %vm158_vm1, %v15952_v52  ;;  %v18741_v24 = vld [vmem:[#allocation9_spill] sm:$0xff] }
  0xdc   :  { %13922 = vmatmul.mubr.msk.f32.gmra.mrb[10].mxu0 %vm158_vm1, %v15691_v25  ;;  %13578 = vmatmul.mubr.msk.f32.gmra.mrb[42].mxu1 %vm158_vm1, %v15957_v53  ;;  %v16450_v25 = vld [vmem:[%s18706_s0 + $0x138] sm:$0xff] }
  0xdd   :  { %13924 = vmatprep.mubr.msk.f32.mxu0 %vm158_vm1, %v15701_v27  ;;  %13580 = vmatprep.mubr.msk.f32.mxu1 %vm158_vm1, %v15970_v54  ;;  %v16457_v27 = vld [vmem:[%s18706_s0 + $0x230] sm:$0xff] }
  0xe0   :  { %13925 = vmatmul.mubr.msk.f32.gmra.mrb[12].mxu0 %vm158_vm1, %v15714_v28  ;;  %13581 = vmatmul.mubr.msk.f32.gmra.mrb[44].mxu1 %vm158_vm1, %v15975_v55  ;;  %v16492_v28 = vld [vmem:[%s18706_s0 + $0x188] sm:$0xff] }
  0xe1   :  { %13927 = vmatprep.mubr.msk.f32.mxu0 %vm158_vm1, %v18740_v19  ;;  %13583 = vmatprep.mubr.msk.f32.mxu1 %vm158_vm1, %v15988_v56  ;;  %v16885_v19 = vld [vmem:[%s18706_s0 + $0x1c8] sm:$0xff] }
  0xe4   :  { %13928 = vmatmul.mubr.msk.f32.gmra.mrb[14].mxu0 %vm158_vm1, %v16408_v22  ;;  %13584 = vmatmul.mubr.msk.f32.gmra.mrb[46].mxu1 %vm158_vm1, %v15993_v57 }
  0xe5   :  { %13930 = vmatprep.mubr.msk.f32.mxu0 %vm158_vm1, %v15744_v32  ;;  %13586 = vmatprep.mubr.msk.f32.mxu1 %vm158_vm1, %v16415_v23  ;;  %v11656_v32 = vld [vmem:[%s18706_s0 + $0x20] sm:$0xff] }
  0xe8   :  { %13931 = vmatmul.mubr.msk.f32.gmra.mrb[16].mxu0 %vm158_vm1, %v15755_v33  ;;  %13587 = vmatmul.mubr.msk.f32.gmra.mrb[48].mxu1 %vm158_vm1, %v16011_v59  ;;  %v11657_v33 = vld [vmem:[%s18706_s0 + $0x28] sm:$0xff]  ;;  %v16731_v59 = vld [vmem:[%s18706_s0 + $0x130] sm:$0xff] }
  0xe9   :  { %13933 = vmatprep.mubr.msk.f32.mxu0 %vm158_vm1, %v15762_v34  ;;  %13589 = vmatprep.mubr.msk.f32.mxu1 %vm158_vm1, %v16024_v60  ;;  %v11658_v34 = vld [vmem:[%s18706_s0 + $0x30] sm:$0xff] }
  0xec   :  { %13934 = vmatmul.mubr.msk.f32.gmra.mrb[18].mxu0 %vm158_vm1, %v15773_v35  ;;  %13590 = vmatmul.mubr.msk.f32.gmra.mrb[50].mxu1 %vm158_vm1, %v16029_v61  ;;  %v11659_v35 = vld [vmem:[%s18706_s0 + $0x38] sm:$0xff] }
  0xed   :  { %13936 = vmatprep.mubr.msk.f32.mxu0 %vm158_vm1, %v15780_v36  ;;  %13592 = vmatprep.mubr.msk.f32.mxu1 %vm158_vm1, %v16042_v62  ;;  %v11660_v36 = vld [vmem:[%s18706_s0 + $0x40] sm:$0xff] }
  0xf0   :  { %13937 = vmatmul.mubr.msk.f32.gmra.mrb[20].mxu0 %vm158_vm1, %v15791_v37  ;;  %13593 = vmatmul.mubr.msk.f32.gmra.mrb[52].mxu1 %vm158_vm1, %v16047_v63  ;;  %v11661_v37 = vld [vmem:[%s18706_s0 + $0x48] sm:$0xff] }
  0xf1   :  { %13939 = vmatprep.mubr.msk.f32.mxu0 %vm158_vm1, %v18741_v24  ;;  %13595 = vmatprep.mubr.msk.f32.mxu1 %vm158_vm1, %v16060_v3  ;;  %v12190_v24 = vld [vmem:[%s18706_s0 + $0x140] sm:$0xff] }
  0xf4   :  { %13940 = vmatmul.mubr.msk.f32.gmra.mrb[22].mxu0 %vm158_vm1, %v16450_v25  ;;  %13596 = vmatmul.mubr.msk.f32.gmra.mrb[54].mxu1 %vm158_vm1, %v16065_v5 }
  0xf5   :  { %13942 = vmatprep.mubr.msk.f32.mxu0 %vm158_vm1, %v15821_v41  ;;  %13598 = vmatprep.mubr.msk.f32.mxu1 %vm158_vm1, %v16457_v27  ;;  %v11664_v41 = vld [vmem:[%s18706_s0 + $0x70] sm:$0xff] }
  0xf8   :  { %13943 = vmatmul.mubr.msk.f32.gmra.mrb[24].mxu0 %vm158_vm1, %v18734_v4  ;;  %13599 = vmatmul.mubr.msk.f32.gmra.mrb[56].mxu1 %vm158_vm1, %v16083_v21  ;;  %v16789_v21 = vld [vmem:[%s18706_s0 + $0x168] sm:$0xff]  ;;  %v12182_v4 = vld [vmem:[%s18706_s0 + $0xf0] sm:$0xff] }
  0xf9   :  { %13945 = vmatprep.mubr.msk.f32.mxu0 %vm158_vm1, %v18735_v7  ;;  %13601 = vmatprep.mubr.msk.f32.mxu1 %vm158_vm1, %v16096_v26  ;;  %v16832_v7 = vld [vmem:[%s18706_s0 + $0x1a0] sm:$0xff] }
  0xfc   :  { %13946 = vmatmul.mubr.msk.f32.gmra.mrb[26].mxu0 %vm158_vm1, %v18736_v9  ;;  %13602 = vmatmul.mubr.msk.f32.gmra.mrb[58].mxu1 %vm158_vm1, %v16101_v40  ;;  %v16842_v9 = vld [vmem:[%s18706_s0 + $0xf8] sm:$0xff] }
  0xfd   :  { %13948 = vmatprep.mubr.msk.f32.mxu0 %vm158_vm1, %v15857_v45  ;;  %13604 = vmatprep.mubr.msk.f32.mxu1 %vm158_vm1, %v16114_v49  ;;  %v11666_v45 = vld [vmem:[%s18706_s0 + $0x80] sm:$0xff] }
 0x100   :  { %13949 = vmatmul.mubr.msk.f32.gmra.mrb[28].mxu0 %vm158_vm1, %v18738_v13  ;;  %13605 = vmatmul.mubr.msk.f32.gmra.mrb[60].mxu1 %vm158_vm1, %v16119_v47  ;;  %v16867_v13 = vld [vmem:[%s18706_s0 + $0x1b8] sm:$0xff] }
 0x101   :  { %13951 = vmatprep.mubr.msk.f32.mxu0 %vm158_vm1, %v15939_v51  ;;  %13607 = vmatprep.mubr.msk.f32.mxu1 %vm158_vm1, %v16132_v31  ;;  %v16605_v51 = vld [vmem:[%s18706_s0 + $0xb0] sm:$0xff] }
 0x104   :  { %13952 = vmatmul.mubr.msk.f32.gmra.mrb[30].mxu0 %vm158_vm1, %v16492_v28  ;;  %13608 = vmatmul.mubr.msk.f32.gmra.mrb[62].mxu1 %vm158_vm1, %v16137_v42 }
 0x105   :  { %13954 = vmatprep.mubr.msk.f32.mxu0 %vm158_vm1, %v15952_v52  ;;  %13612 = vmatprep.mubr.msk.f32.mxu1 %vm158_vm1, %v11654_v29  ;;  %v16618_v52 = vld [vmem:[%s18706_s0 + $0xb8] sm:$0xff] }
 0x106   :  { %v16923_v29 = vld [vmem:[%s18706_s0 + $0x1f8] sm:$0xff] }
 0x108   :  { %13955 = vmatmul.mubr.msk.f32.gmra.mrb[32].mxu0 %vm158_vm1, %v15957_v53  ;;  %13613 = vmatmul.mubr.msk.f32.vlgmr.msra.gmra.mrb[0].mxu1 %vm158_vm1, %v11655_v30  ;;  %v16623_v53 = vld [vmem:[%s18706_s0 + $0xc0] sm:$0xff] }
 0x109   :  { %13957 = vmatprep.mubr.msk.f32.mxu0 %vm158_vm1, %v15970_v54  ;;  %13615 = vmatprep.mubr.msk.f32.mxu1 %vm158_vm1, %v11656_v32  ;;  %v16636_v54 = vld [vmem:[%s18706_s0 + $0xc8] sm:$0xff]  ;;  %v16928_v30 = vld [vmem:[%s18706_s0 + $0x200] sm:$0xff] }
 0x10a   :  { %14954 = vmatpush3.msk.msra.mxu1 %vm351_vm0, %v15517_v0  ;;  %v16546_v0 = vld [vmem:[%s18706_s0 + $0x1d8] sm:$0xff]  ;;  %v16941_v32 = vld [vmem:[%s18706_s0 + $0x208] sm:$0xff] }
 0x10c   :  { %13958 = vmatmul.mubr.msk.f32.gmra.mrb[34].mxu0 %vm158_vm1, %v15975_v55  ;;  %13616 = vmatmul.mubr.msk.f32.gmra.mrb[2].mxu1 %vm158_vm1, %v11657_v33  ;;  %v16641_v55 = vld [vmem:[%s18706_s0 + $0xd0] sm:$0xff] }
 0x10d   :  { %13960 = vmatprep.mubr.msk.f32.mxu0 %vm158_vm1, %v15988_v56  ;;  %13618 = vmatprep.mubr.msk.f32.mxu1 %vm158_vm1, %v11658_v34  ;;  %v16708_v56 = vld [vmem:[%s18706_s0 + $0x118] sm:$0xff]  ;;  %v16946_v33 = vld [vmem:[%s18706_s0 + $0x210] sm:$0xff] }
 0x10e   :  { %v16959_v34 = vld [vmem:[%s18706_s0 + $0x218] sm:$0xff] }
 0x110   :  { %13961 = vmatmul.mubr.msk.f32.gmra.mrb[36].mxu0 %vm158_vm1, %v15993_v57  ;;  %13619 = vmatmul.mubr.msk.f32.gmra.mrb[4].mxu1 %vm158_vm1, %v11659_v35  ;;  %v16713_v57 = vld [vmem:[%s18706_s0 + $0x120] sm:$0xff] }
 0x111   :  { %13963 = vmatprep.mubr.msk.f32.mxu0 %vm158_vm1, %v16006_v58  ;;  %13621 = vmatprep.mubr.msk.f32.mxu1 %vm158_vm1, %v11660_v36  ;;  %v16726_v58 = vld [vmem:[%s18706_s0 + $0x128] sm:$0xff]  ;;  %v16964_v35 = vld [vmem:[%s18706_s0 + $0x220] sm:$0xff]  ;;  %v12198_v36 = vld [vmem:[%s18706_s0 + $0x190] sm:$0xff] }
 0x114   :  { %13964 = vmatmul.mubr.msk.f32.gmra.mrb[38].mxu0 %vm158_vm1, %v16546_v0  ;;  %13622 = vmatmul.mubr.msk.f32.gmra.mrb[6].mxu1 %vm158_vm1, %v11661_v37  ;;  %v16990_v37 = vld [vmem:[%s18706_s0 + $0x198] sm:$0xff] }
 0x115   :  { %13966 = vmatprep.mubr.msk.f32.mxu0 %vm158_vm1, %v16024_v60  ;;  %13624 = vmatprep.mubr.msk.f32.mxu1 %vm158_vm1, %v11662_v38  ;;  %v12107_v60 = vld [vmem:[%s18706_s0 + $0x2c8] sm:$0xff] }
 0x116   :  { %v16997_v38 = vld [vmem:[%s18706_s0 + $0x248] sm:$0xff] }
 0x118   :  { %13967 = vmatmul.mubr.msk.f32.gmra.mrb[40].mxu0 %vm158_vm1, %v16029_v61  ;;  %13625 = vmatmul.mubr.msk.f32.gmra.mrb[8].mxu1 %vm158_vm1, %v11663_v39  ;;  %v12174_v61 = vld [vmem:[%s18706_s0 + $0xa0] sm:$0xff]  ;;  %v17002_v39 = vld [vmem:[%s18706_s0 + $0x250] sm:$0xff] }
 0x119   :  { %13969 = vmatprep.mubr.msk.f32.mxu0 %vm158_vm1, %v16042_v62  ;;  %13627 = vmatprep.mubr.msk.f32.mxu1 %vm158_vm1, %v11664_v41  ;;  %v16750_v62 = vld [vmem:[%s18706_s0 + $0x150] sm:$0xff]  ;;  %v17015_v41 = vld [vmem:[%s18706_s0 + $0x258] sm:$0xff] }
 0x11c   :  { %13970 = vmatmul.mubr.msk.f32.gmra.mrb[42].mxu0 %vm158_vm1, %v16047_v63  ;;  %13628 = vmatmul.mubr.msk.f32.gmra.mrb[10].mxu1 %vm158_vm1, %v11665_v43  ;;  %v16759_v63 = vld [vmem:[%s18706_s0 + $0xa8] sm:$0xff]  ;;  %v17020_v43 = vld [vmem:[%s18706_s0 + $0x260] sm:$0xff] }
 0x11d   :  { %13972 = vmatprep.mubr.msk.f32.mxu0 %vm158_vm1, %v16060_v3  ;;  %13630 = vmatprep.mubr.msk.f32.mxu1 %vm158_vm1, %v11666_v45  ;;  %v16766_v3 = vld [vmem:[%s18706_s0 + $0x158] sm:$0xff]  ;;  %v17033_v45 = vld [vmem:[%s18706_s0 + $0x268] sm:$0xff] }
 0x120   :  { %13973 = vmatmul.mubr.msk.f32.gmra.mrb[44].mxu0 %vm158_vm1, %v16065_v5  ;;  %13631 = vmatmul.mubr.msk.f32.gmra.mrb[12].mxu1 %vm158_vm1, %v11667_v46  ;;  %v16771_v5 = vld [vmem:[%s18706_s0 + $0x160] sm:$0xff]  ;;  %v17038_v46 = vld [vmem:[%s18706_s0 + $0x270] sm:$0xff] }
 0x121   :  { %13975 = vmatprep.mubr.msk.f32.mxu0 %vm158_vm1, %v16078_v20  ;;  %13633 = vmatprep.mubr.msk.f32.mxu1 %vm158_vm1, %v11668_v48  ;;  %v16780_v20 = vld [vmem:[%s18705_s1 + $0x20] sm:$0xf]  ;;  %v17057_v48 = vld [vmem:[%s18706_s0 + $0x1e8] sm:$0xff] }
 0x124   :  { %13976 = vmatmul.mubr.msk.f32.gmra.mrb[46].mxu0 %vm158_vm1, %v16599_v50  ;;  %13634 = vmatmul.mubr.msk.f32.gmra.mrb[14].mxu1 %vm158_vm1, %v16371_v11  ;;  %v16854_v11 = vld [vmem:[%s18706_s0 + $0x1b0] sm:$0xff] }
 0x125   :  { %13978 = vmatprep.mubr.msk.f32.mxu0 %vm158_vm1, %v16096_v26  ;;  %13636 = vmatprep.mubr.msk.f32.mxu1 %vm158_vm1, %v16605_v51  ;;  %v16796_v26 = vld [vmem:[%s18706_s0 + $0x170] sm:$0xff] }
 0x128   :  { %13979 = vmatmul.mubr.msk.f32.gmra.mrb[48].mxu0 %vm158_vm1, %v16101_v40  ;;  %13637 = vmatmul.mubr.msk.f32.gmra.mrb[16].mxu1 %vm158_vm1, %v16618_v52  ;;  %v16654_v40 = vld [vmem:[%s18706_s0 + $0xd8] sm:$0xff] }
 0x129   :  { %13981 = vmatprep.mubr.msk.f32.mxu0 %vm158_vm1, %v16114_v49  ;;  %13639 = vmatprep.mubr.msk.f32.mxu1 %vm158_vm1, %v16623_v53  ;;  %v16659_v49 = vld [vmem:[%s18706_s0 + $0xe0] sm:$0xff] }
 0x12c   :  { %13982 = vmatmul.mubr.msk.f32.gmra.mrb[50].mxu0 %vm158_vm1, %v16119_v47  ;;  %13640 = vmatmul.mubr.msk.f32.gmra.mrb[18].mxu1 %vm158_vm1, %v16636_v54  ;;  %v16677_v47 = vld [vmem:[%s18706_s0 + $0x100] sm:$0xff] }
 0x12d   :  { %13984 = vmatprep.mubr.msk.f32.mxu0 %vm158_vm1, %v16132_v31  ;;  %13642 = vmatprep.mubr.msk.f32.mxu1 %vm158_vm1, %v16641_v55  ;;  %v16670_v31 = vld [vmem:[%s18706_s0 + $0x278] sm:$0xff] }
 0x130   :  { %13985 = vmatmul.mubr.msk.f32.gmra.mrb[52].mxu0 %vm158_vm1, %v16137_v42  ;;  %13643 = vmatmul.mubr.msk.f32.gmra.mrb[20].mxu1 %vm158_vm1, %v16654_v40  ;;  %v16690_v42 = vld [vmem:[%s18706_s0 + $0x108] sm:$0xff] }
 0x131   :  { %13987 = vmatprep.mubr.msk.f32.mxu0 %vm158_vm1, %v16150_v44  ;;  %13645 = vmatprep.mubr.msk.f32.mxu1 %vm158_vm1, %v16659_v49  ;;  %18742 = vst [vmem:[#allocation4_spill] sm:$0xff] %v16690_v42  ;;  %v16695_v44 = vld [vmem:[%s18706_s0 + $0x110] sm:$0xff] }
 0x134   :  { %13988 = vmatmul.mubr.msk.f32.gmra.mrb[54].mxu0 %vm158_vm1, %v16670_v31  ;;  %13646 = vmatmul.mubr.msk.f32.gmra.mrb[22].mxu1 %vm158_vm1, %v16408_v22  ;;  %v16890_v22 = vld [vmem:[%s18706_s0 + $0x1d0] sm:$0xff] }
 0x135   :  { %13990 = vmatprep.mubr.msk.f32.mxu0 %vm158_vm1, %v16271_v2  ;;  %13648 = vmatprep.mubr.msk.f32.mxu1 %vm158_vm1, %v16677_v47 }
 0x138   :  { %13991 = vmatmul.mubr.msk.f32.gmra.mrb[56].mxu0 %vm158_vm1, %v16278_v6  ;;  %13649 = vmatmul.mubr.msk.f32.gmra.mrb[24].mxu1 %vm158_vm1, %v16690_v42 }
 0x139   :  { %13993 = vmatprep.mubr.msk.f32.mxu0 %vm158_vm1, %v16289_v8  ;;  %13651 = vmatprep.mubr.msk.f32.mxu1 %vm158_vm1, %v16695_v44 }
 0x13c   :  { %13994 = vmatmul.mubr.msk.f32.gmra.mrb[58].mxu0 %vm158_vm1, %v16296_v10  ;;  %13652 = vmatmul.mubr.msk.f32.gmra.mrb[26].mxu1 %vm158_vm1, %v16708_v56 }
 0x13d   :  { %13996 = vmatprep.mubr.msk.f32.mxu0 %vm158_vm1, %v16307_v12  ;;  %13654 = vmatprep.mubr.msk.f32.mxu1 %vm158_vm1, %v16713_v57 }
 0x140   :  { %13997 = vmatmul.mubr.msk.f32.gmra.mrb[60].mxu0 %vm158_vm1, %v16314_v14  ;;  %13655 = vmatmul.mubr.msk.f32.gmra.mrb[28].mxu1 %vm158_vm1, %v16726_v58 }
 0x141   :  { %13999 = vmatprep.mubr.msk.f32.mxu0 %vm158_vm1, %v16325_v16  ;;  %13657 = vmatprep.mubr.msk.f32.mxu1 %vm158_vm1, %v16731_v59  ;;  %v16811_v16 = vld [vmem:[%s18706_s0 + $0x178] sm:$0xff] }
 0x144   :  { %14000 = vmatmul.mubr.msk.f32.gmra.mrb[62].mxu0 %vm158_vm1, %v12107_v60  ;;  %13658 = vmatmul.mubr.msk.f32.gmra.mrb[30].mxu1 %vm158_vm1, %v16450_v25  ;;  %v16906_v25 = vld [vmem:[%s18706_s0 + $0x1f0] sm:$0xff] }
 0x145   :  { %14004 = vmatprep.mubr.msk.f32.mxu0 %vm158_vm1, %v12174_v61  ;;  %13660 = vmatprep.mubr.msk.f32.mxu1 %vm158_vm1, %v16750_v62  ;;  %v17216_v60 = vld [vmem:[%s18706_s0 + $0x2f0] sm:$0xff] }
 0x146   :  { %v17221_v61 = vld [vmem:[%s18706_s0 + $0x2b0] sm:$0xff] }
 0x148   :  { %14005 = vmatmul.mubr.msk.f32.vlgmr.msra.gmra.mrb[0].mxu0 %vm158_vm1, %v16759_v63  ;;  %13661 = vmatmul.mubr.msk.f32.gmra.mrb[32].mxu1 %vm158_vm1, %v16766_v3 }
 0x149   :  { %14101 = vmatpush3.msk.msra.mxu0 %vm351_vm0, %v16344_v17  ;;  %14007 = vmatprep.mubr.msk.f32.mxu0 %vm158_vm1, %v16605_v51  ;;  %v16816_v17 = vld [vmem:[%s18706_s0 + $0x180] sm:$0xff] }
 0x14a   :  { %13663 = vmatprep.mubr.msk.f32.mxu1 %vm158_vm1, %v16771_v5  ;;  %14198 = vmatprep.subr.msk.mxu0 %vm351_vm0, %v16780_v20 }
 0x14c   :  { %14008 = vmatmul.mubr.msk.f32.gmra.mrb[2].mxu0 %vm158_vm1, %v16618_v52  ;;  %13664 = vmatmul.mubr.msk.f32.gmra.mrb[34].mxu1 %vm158_vm1, %v16789_v21 }
 0x14d   :  { %14010 = vmatprep.mubr.msk.f32.mxu0 %vm158_vm1, %v16623_v53  ;;  %13666 = vmatprep.mubr.msk.f32.mxu1 %vm158_vm1, %v16796_v26 }
 0x150   :  { %14011 = vmatmul.mubr.msk.f32.gmra.mrb[4].mxu0 %vm158_vm1, %v16636_v54  ;;  %13667 = vmatmul.mubr.msk.f32.gmra.mrb[36].mxu1 %vm158_vm1, %v16811_v16 }
 0x151   :  { %14013 = vmatprep.mubr.msk.f32.mxu0 %vm158_vm1, %v16641_v55  ;;  %13669 = vmatprep.mubr.msk.f32.mxu1 %vm158_vm1, %v16816_v17 }
 0x154   :  { %14014 = vmatmul.mubr.msk.f32.gmra.mrb[6].mxu0 %vm158_vm1, %v16654_v40  ;;  %13670 = vmatmul.mubr.msk.f32.gmra.mrb[38].mxu1 %vm158_vm1, %v16492_v28  ;;  %v16916_v28 = vld [vmem:[%s18706_s0 + $0x148] sm:$0xff] }
 0x155   :  { %14016 = vmatprep.mubr.msk.f32.mxu0 %vm158_vm1, %v12182_v4  ;;  %13672 = vmatprep.mubr.msk.f32.mxu1 %vm158_vm1, %v16832_v7  ;;  %v17232_v4 = vld [vmem:[%s18706_s0 + $0x2f8] sm:$0xff] }
 0x158   :  { %14017 = vmatmul.mubr.msk.f32.gmra.mrb[8].mxu0 %vm158_vm1, %v16842_v9  ;;  %13673 = vmatmul.mubr.msk.f32.gmra.mrb[40].mxu1 %vm158_vm1, %v16849_v18 }
 0x159   :  { %14019 = vmatprep.mubr.msk.f32.mxu0 %vm158_vm1, %v16677_v47  ;;  %13675 = vmatprep.mubr.msk.f32.mxu1 %vm158_vm1, %v16854_v11 }
 0x15c   :  { %14020 = vmatmul.mubr.msk.f32.gmra.mrb[10].mxu0 %vm158_vm1, %v16690_v42  ;;  %13676 = vmatmul.mubr.msk.f32.gmra.mrb[42].mxu1 %vm158_vm1, %v16867_v13 }
 0x15d   :  { %14022 = vmatprep.mubr.msk.f32.mxu0 %vm158_vm1, %v16695_v44  ;;  %13678 = vmatprep.mubr.msk.f32.mxu1 %vm158_vm1, %v16872_v15 }
 0x160   :  { %14023 = vmatmul.mubr.msk.f32.gmra.mrb[12].mxu0 %vm158_vm1, %v16708_v56  ;;  %13679 = vmatmul.mubr.msk.f32.gmra.mrb[44].mxu1 %vm158_vm1, %v16885_v19 }
 0x161   :  { %14025 = vmatprep.mubr.msk.f32.mxu0 %vm158_vm1, %v16713_v57  ;;  %13681 = vmatprep.mubr.msk.f32.mxu1 %vm158_vm1, %v16890_v22 }
 0x164   :  { %14026 = vmatmul.mubr.msk.f32.gmra.mrb[14].mxu0 %vm158_vm1, %v16726_v58  ;;  %13682 = vmatmul.mubr.msk.f32.gmra.mrb[46].mxu1 %vm158_vm1, %v16546_v0  ;;  %v16980_v0 = vld [vmem:[%s18706_s0 + $0x240] sm:$0xff] }
 0x165   :  { %14028 = vmatprep.mubr.msk.f32.mxu0 %vm158_vm1, %v12190_v24  ;;  %13684 = vmatprep.mubr.msk.f32.mxu1 %vm158_vm1, %v16906_v25  ;;  %v17239_v24 = vld [vmem:[%s18706_s0 + $0x2b8] sm:$0xff] }
 0x168   :  { %14029 = vmatmul.mubr.msk.f32.gmra.mrb[16].mxu0 %vm158_vm1, %v16916_v28  ;;  %13685 = vmatmul.mubr.msk.f32.gmra.mrb[48].mxu1 %vm158_vm1, %v16923_v29 }
 0x169   :  { %14031 = vmatprep.mubr.msk.f32.mxu0 %vm158_vm1, %v16750_v62  ;;  %13687 = vmatprep.mubr.msk.f32.mxu1 %vm158_vm1, %v16928_v30 }
 0x16c   :  { %14032 = vmatmul.mubr.msk.f32.gmra.mrb[18].mxu0 %vm158_vm1, %v16766_v3  ;;  %13688 = vmatmul.mubr.msk.f32.gmra.mrb[50].mxu1 %vm158_vm1, %v16941_v32 }
 0x16d   :  { %14034 = vmatprep.mubr.msk.f32.mxu0 %vm158_vm1, %v16771_v5  ;;  %13690 = vmatprep.mubr.msk.f32.mxu1 %vm158_vm1, %v16946_v33 }
 0x170   :  { %14035 = vmatmul.mubr.msk.f32.gmra.mrb[20].mxu0 %vm158_vm1, %v16789_v21  ;;  %13691 = vmatmul.mubr.msk.f32.gmra.mrb[52].mxu1 %vm158_vm1, %v16959_v34 }
 0x171   :  { %14037 = vmatprep.mubr.msk.f32.mxu0 %vm158_vm1, %v16796_v26  ;;  %13693 = vmatprep.mubr.msk.f32.mxu1 %vm158_vm1, %v16964_v35 }
 0x174   :  { %14038 = vmatmul.mubr.msk.f32.gmra.mrb[22].mxu0 %vm158_vm1, %v16811_v16  ;;  %13694 = vmatmul.mubr.msk.f32.gmra.mrb[54].mxu1 %vm158_vm1, %v16599_v50  ;;  %v17094_v50 = vld [vmem:[%s18706_s0 + $0x238] sm:$0xff] }
 0x175   :  { %14040 = vmatprep.mubr.msk.f32.mxu0 %vm158_vm1, %v12198_v36  ;;  %13696 = vmatprep.mubr.msk.f32.mxu1 %vm158_vm1, %v16980_v0  ;;  %v17244_v36 = vld [vmem:[%s18706_s0 + $0x300] sm:$0xff] }
 0x178   :  { %14041 = vmatmul.mubr.msk.f32.gmra.mrb[24].mxu0 %vm158_vm1, %v16990_v37  ;;  %13697 = vmatmul.mubr.msk.f32.gmra.mrb[56].mxu1 %vm158_vm1, %v16997_v38 }
 0x179   :  { %14043 = vmatprep.mubr.msk.f32.mxu0 %vm158_vm1, %v16832_v7  ;;  %13699 = vmatprep.mubr.msk.f32.mxu1 %vm158_vm1, %v17002_v39 }
 0x17c   :  { %14044 = vmatmul.mubr.msk.f32.gmra.mrb[26].mxu0 %vm158_vm1, %v16849_v18  ;;  %13700 = vmatmul.mubr.msk.f32.gmra.mrb[58].mxu1 %vm158_vm1, %v17015_v41 }
 0x17d   :  { %14046 = vmatprep.mubr.msk.f32.mxu0 %vm158_vm1, %v16854_v11  ;;  %13702 = vmatprep.mubr.msk.f32.mxu1 %vm158_vm1, %v17020_v43 }
 0x180   :  { %14047 = vmatmul.mubr.msk.f32.gmra.mrb[28].mxu0 %vm158_vm1, %v16867_v13  ;;  %13703 = vmatmul.mubr.msk.f32.gmra.mrb[60].mxu1 %vm158_vm1, %v17033_v45 }
 0x181   :  { %14049 = vmatprep.mubr.msk.f32.mxu0 %vm158_vm1, %v16872_v15  ;;  %13705 = vmatprep.mubr.msk.f32.mxu1 %vm158_vm1, %v17038_v46 }
 0x184   :  { %14050 = vmatmul.mubr.msk.f32.gmra.mrb[30].mxu0 %vm158_vm1, %v16885_v19  ;;  %13706 = vmatmul.mubr.msk.f32.gmra.mrb[62].mxu1 %vm158_vm1, %v16670_v31  ;;  %v17211_v31 = vld [vmem:[%s18706_s0 + $0x2a8] sm:$0xff] }
 0x185   :  { %14052 = vmatprep.mubr.msk.f32.mxu0 %vm158_vm1, %v16415_v23  ;;  %13761 = vmatprep.mubr.msk.f32.mxu1 %vm158_vm1, %v16832_v7 }
 0x188   :  { %14053 = vmatmul.mubr.msk.f32.gmra.mrb[32].mxu0 %vm158_vm1, %v17057_v48  ;;  %13762 = vmatmul.mubr.msk.f32.vlgmr.msra.gmra.mrb[34].mxu1 %vm158_vm1, %v16849_v18 }
 0x189   :  { %14055 = vmatprep.mubr.msk.f32.mxu0 %vm158_vm1, %v16906_v25  ;;  %13764 = vmatprep.mubr.msk.f32.mxu1 %vm158_vm1, %v16854_v11 }
 0x18c   :  { %14056 = vmatmul.mubr.msk.f32.gmra.mrb[34].mxu0 %vm158_vm1, %v16923_v29  ;;  %13765 = vmatmul.mubr.msk.f32.gmra.mrb[36].mxu1 %vm158_vm1, %v16867_v13 }
 0x18d   :  { %14058 = vmatprep.mubr.msk.f32.mxu0 %vm158_vm1, %v16928_v30  ;;  %13767 = vmatprep.mubr.msk.f32.mxu1 %vm158_vm1, %v16872_v15 }
 0x190   :  { %14059 = vmatmul.mubr.msk.f32.gmra.mrb[36].mxu0 %vm158_vm1, %v16941_v32  ;;  %13768 = vmatmul.mubr.msk.f32.gmra.mrb[38].mxu1 %vm158_vm1, %v16885_v19 }
 0x191   :  { %14061 = vmatprep.mubr.msk.f32.mxu0 %vm158_vm1, %v16946_v33  ;;  %13770 = vmatprep.mubr.msk.f32.mxu1 %vm158_vm1, %v16415_v23  ;;  %v12222_v23 = vld [vmem:[%s18706_s0 + $0x280] sm:$0xff] }
 0x194   :  { %14062 = vmatmul.mubr.msk.f32.gmra.mrb[38].mxu0 %vm158_vm1, %v16959_v34  ;;  %13771 = vmatmul.mubr.msk.f32.gmra.mrb[40].mxu1 %vm158_vm1, %v17057_v48 }
 0x195   :  { %14064 = vmatprep.mubr.msk.f32.mxu0 %vm158_vm1, %v16457_v27  ;;  %13773 = vmatprep.mubr.msk.f32.mxu1 %vm158_vm1, %v16906_v25 }
 0x198   :  { %14065 = vmatmul.mubr.msk.f32.gmra.mrb[40].mxu0 %vm158_vm1, %v17094_v50  ;;  %13774 = vmatmul.mubr.msk.f32.gmra.mrb[42].mxu1 %vm158_vm1, %v16923_v29 }
 0x199   :  { %14067 = vmatprep.mubr.msk.f32.mxu0 %vm158_vm1, %v16980_v0  ;;  %13776 = vmatprep.mubr.msk.f32.mxu1 %vm158_vm1, %v16928_v30 }
 0x19c   :  { %14068 = vmatmul.mubr.msk.f32.gmra.mrb[42].mxu0 %vm158_vm1, %v16997_v38  ;;  %13777 = vmatmul.mubr.msk.f32.gmra.mrb[44].mxu1 %vm158_vm1, %v16941_v32 }
 0x19d   :  { %14070 = vmatprep.mubr.msk.f32.mxu0 %vm158_vm1, %v17002_v39  ;;  %13779 = vmatprep.mubr.msk.f32.mxu1 %vm158_vm1, %v16946_v33 }
 0x1a0   :  { %14071 = vmatmul.mubr.msk.f32.gmra.mrb[44].mxu0 %vm158_vm1, %v17015_v41  ;;  %13780 = vmatmul.mubr.msk.f32.gmra.mrb[46].mxu1 %vm158_vm1, %v16959_v34 }
 0x1a1   :  { %14073 = vmatprep.mubr.msk.f32.mxu0 %vm158_vm1, %v17020_v43  ;;  %13782 = vmatprep.mubr.msk.f32.mxu1 %vm158_vm1, %v16457_v27  ;;  %v17204_v27 = vld [vmem:[%s18706_s0 + $0x2e8] sm:$0xff] }
 0x1a4   :  { %14074 = vmatmul.mubr.msk.f32.gmra.mrb[46].mxu0 %vm158_vm1, %v17033_v45  ;;  %13783 = vmatmul.mubr.msk.f32.gmra.mrb[48].mxu1 %vm158_vm1, %v17094_v50 }
 0x1a5   :  { %14076 = vmatprep.mubr.msk.f32.mxu0 %vm158_vm1, %v12222_v23  ;;  %13785 = vmatprep.mubr.msk.f32.mxu1 %vm158_vm1, %v16980_v0 }
 0x1a8   :  { %14077 = vmatmul.mubr.msk.f32.gmra.mrb[48].mxu0 %vm158_vm1, %v16260_v1  ;;  %13786 = vmatmul.mubr.msk.f32.gmra.mrb[50].mxu1 %vm158_vm1, %v16997_v38  ;;  %v17158_v1 = vld [vmem:[%s18706_s0 + $0x288] sm:$0xff] }
 0x1a9   :  { %14079 = vmatprep.mubr.msk.f32.mxu0 %vm158_vm1, %v16271_v2  ;;  %13788 = vmatprep.mubr.msk.f32.mxu1 %vm158_vm1, %v17002_v39  ;;  %v12230_v2 = vld [vmem:[%s18706_s0 + $0x2d0] sm:$0xff] }
 0x1ac   :  { %14080 = vmatmul.mubr.msk.f32.gmra.mrb[50].mxu0 %vm158_vm1, %v16278_v6  ;;  %13789 = vmatmul.mubr.msk.f32.gmra.mrb[52].mxu1 %vm158_vm1, %v17015_v41  ;;  %v17166_v6 = vld [vmem:[%s18706_s0 + $0x290] sm:$0xff] }
 0x1ad   :  { %14082 = vmatprep.mubr.msk.f32.mxu0 %vm158_vm1, %v16289_v8  ;;  %13791 = vmatprep.mubr.msk.f32.mxu1 %vm158_vm1, %v17020_v43  ;;  %v17176_v8 = vld [vmem:[%s18706_s0 + $0x2d8] sm:$0xff] }
 0x1b0   :  { %14083 = vmatmul.mubr.msk.f32.gmra.mrb[52].mxu0 %vm158_vm1, %v16296_v10  ;;  %13792 = vmatmul.mubr.msk.f32.gmra.mrb[54].mxu1 %vm158_vm1, %v17033_v45  ;;  %v17183_v10 = vld [vmem:[%s18706_s0 + $0x298] sm:$0xff] }
 0x1b1   :  { %14085 = vmatprep.mubr.msk.f32.mxu0 %vm158_vm1, %v16307_v12  ;;  %13794 = vmatprep.mubr.msk.f32.mxu1 %vm158_vm1, %v12222_v23  ;;  %v17188_v12 = vld [vmem:[%s18706_s0 + $0x2e0] sm:$0xff]  ;;  %v17255_v23 = vld [vmem:[%s18706_s0 + $0x308] sm:$0xff] }
 0x1b4   :  { %14086 = vmatmul.mubr.msk.f32.gmra.mrb[54].mxu0 %vm158_vm1, %v16314_v14  ;;  %13795 = vmatmul.mubr.msk.f32.gmra.mrb[56].mxu1 %vm158_vm1, %v17158_v1  ;;  %v17193_v14 = vld [vmem:[%s18706_s0 + $0x2a0] sm:$0xff] }
 0x1b5   :  { %14088 = vmatprep.mubr.msk.f32.mxu0 %vm158_vm1, %v12230_v2  ;;  %13797 = vmatprep.mubr.msk.f32.mxu1 %vm158_vm1, %v17166_v6 }
 0x1b8   :  { %14089 = vmatmul.mubr.msk.f32.gmra.mrb[56].mxu0 %vm158_vm1, %v17176_v8  ;;  %13798 = vmatmul.mubr.msk.f32.gmra.mrb[58].mxu1 %vm158_vm1, %v17183_v10 }
 0x1b9   :  { %14091 = vmatprep.mubr.msk.f32.mxu0 %vm158_vm1, %v17188_v12  ;;  %13800 = vmatprep.mubr.msk.f32.mxu1 %vm158_vm1, %v17193_v14 }
 0x1bc   :  { %14092 = vmatmul.mubr.msk.f32.gmra.mrb[58].mxu0 %vm158_vm1, %v17204_v27  ;;  %13801 = vmatmul.mubr.msk.f32.gmra.mrb[60].mxu1 %vm158_vm1, %v17211_v31 }
 0x1bd   :  { %14094 = vmatprep.mubr.msk.f32.mxu0 %vm158_vm1, %v17216_v60  ;;  %13803 = vmatprep.mubr.msk.f32.mxu1 %vm158_vm1, %v17221_v61 }
 0x1c0   :  { %14095 = vmatmul.mubr.msk.f32.gmra.mrb[60].mxu0 %vm158_vm1, %v17232_v4  ;;  %13804 = vmatmul.mubr.msk.f32.gmra.mrb[62].mxu1 %vm158_vm1, %v17239_v24 }
 0x1c1   :  { %14097 = vmatprep.mubr.msk.f32.mxu0 %vm158_vm1, %v17244_v36 }
 0x1c4   :  { %14098 = vmatmul.mubr.msk.f32.gmra.mrb[62].mxu0 %vm158_vm1, %v17255_v23 }
 0x1c5   :  { %14102 = vmatprep.mubr.msk.f32.mxu0 %vm158_vm1, %v16759_v63 }
 0x1c8   :  { %14103 = vmatmul.mubr.msk.f32.vlgmr.msra.gmra.mrb[0].mxu0 %vm158_vm1, %v16605_v51 }
 0x1c9   :  { %14199 = vmatpush3.msk.msra.mxu0 %vm351_vm0, %v16780_v20  ;;  %14105 = vmatprep.mubr.msk.f32.mxu0 %vm158_vm1, %v16618_v52 }
 0x1cc   :  { %14106 = vmatmul.mubr.msk.f32.gmra.mrb[2].mxu0 %vm158_vm1, %v16623_v53 }
 0x1cd   :  { %14108 = vmatprep.mubr.msk.f32.mxu0 %vm158_vm1, %v16636_v54 }
 0x1d0   :  { %14109 = vmatmul.mubr.msk.f32.gmra.mrb[4].mxu0 %vm158_vm1, %v16641_v55 }
 0x1d1   :  { %14111 = vmatprep.mubr.msk.f32.mxu0 %vm158_vm1, %v16654_v40 }
 0x1d4   :  { %14112 = vmatmul.mubr.msk.f32.gmra.mrb[6].mxu0 %vm158_vm1, %v16659_v49 }
 0x1d5   :  { %14114 = vmatprep.mubr.msk.f32.mxu0 %vm158_vm1, %v16842_v9 }
 0x1d8   :  { %14115 = vmatmul.mubr.msk.f32.gmra.mrb[8].mxu0 %vm158_vm1, %v16677_v47 }
 0x1d9   :  { %14117 = vmatprep.mubr.msk.f32.mxu0 %vm158_vm1, %v16690_v42 }
 0x1db   :  { %v17283_v63 = vpop.f32.mrb[0].mxu1 }
 0x1dc   :  { %18743 = vst [vmem:[#allocation5_spill] sm:$0xff] %v17283_v63  ;;  %14118 = vmatmul.mubr.msk.f32.gmra.mrb[10].mxu0 %vm158_vm1, %v16695_v44  ;;  %v17287_v20 = vpop.f32.mrb[1].mxu1 }
 0x1dd   :  { %18744 = vst [vmem:[#allocation6_spill] sm:$0xff] %v17287_v20  ;;  %14120 = vmatprep.mubr.msk.f32.mxu0 %vm158_vm1, %v16708_v56 }
 0x1df   :  { %v17291_v2 = vpop.f32.mrb[2].mxu1 }
 0x1e0   :  { %18745 = vst [vmem:[#allocation2_spill] sm:$0xff] %v17291_v2  ;;  %14121 = vmatmul.mubr.msk.f32.gmra.mrb[12].mxu0 %vm158_vm1, %v16713_v57  ;;  %v17295_v9 = vpop.f32.mrb[3].mxu1 }
 0x1e1   :  { %18746 = vst [vmem:[#allocation7_spill] sm:$0xff] %v17295_v9  ;;  %14123 = vmatprep.mubr.msk.f32.mxu0 %vm158_vm1, %v16726_v58 }
 0x1e3   :  { %v17299_v42 = vpop.f32.mrb[4].mxu1 }
 0x1e4   :  { %18747 = vst [vmem:[#allocation8_spill] sm:$0xff] %v17299_v42  ;;  %14124 = vmatmul.mubr.msk.f32.gmra.mrb[14].mxu0 %vm158_vm1, %v16731_v59  ;;  %v17303_v63 = vpop.f32.mrb[5].mxu1 }
 0x1e5   :  { %14126 = vmatprep.mubr.msk.f32.mxu0 %vm158_vm1, %v16916_v28 }
 0x1e7   :  { %v17307_v20 = vpop.f32.mrb[6].mxu1 }
 0x1e8   :  { %18748 = vst [vmem:[#allocation3_spill] sm:$0xff] %v17307_v20  ;;  %14127 = vmatmul.mubr.msk.f32.gmra.mrb[16].mxu0 %vm158_vm1, %v16750_v62  ;;  %v17311_v2 = vpop.f32.mrb[7].mxu1 }
 0x1e9   :  { %18749 = vst [vmem:[#allocation9_spill] sm:$0xff] %v17311_v2  ;;  %14129 = vmatprep.mubr.msk.f32.mxu0 %vm158_vm1, %v16766_v3 }
 0x1eb   :  { %v17315_v9 = vpop.f32.mrb[8].mxu1 }
 0x1ec   :  { %18750 = vst [vmem:[#allocation10_spill] sm:$0xff] %v17315_v9  ;;  %14130 = vmatmul.mubr.msk.f32.gmra.mrb[18].mxu0 %vm158_vm1, %v16771_v5  ;;  %v17319_v42 = vpop.f32.mrb[9].mxu1 }
 0x1ed   :  { %18751 = vst [vmem:[#allocation11_spill] sm:$0xff] %v17319_v42  ;;  %14132 = vmatprep.mubr.msk.f32.mxu0 %vm158_vm1, %v16789_v21 }
 0x1ef   :  { %v17323_v28 = vpop.f32.mrb[10].mxu1 }
 0x1f0   :  { %18752 = vst [vmem:[#allocation12_spill] sm:$0xff] %v17323_v28  ;;  %14133 = vmatmul.mubr.msk.f32.gmra.mrb[20].mxu0 %vm158_vm1, %v16796_v26  ;;  %v17327_v20 = vpop.f32.mrb[11].mxu1 }
 0x1f1   :  { %18753 = vst [vmem:[#allocation13_spill] sm:$0xff] %v17327_v20  ;;  %14135 = vmatprep.mubr.msk.f32.mxu0 %vm158_vm1, %v16811_v16 }
 0x1f3   :  { %v17331_v2 = vpop.f32.mrb[12].mxu1 }
 0x1f4   :  { %18754 = vst [vmem:[#allocation14_spill] sm:$0xff] %v17331_v2  ;;  %14136 = vmatmul.mubr.msk.f32.gmra.mrb[22].mxu0 %vm158_vm1, %v16816_v17  ;;  %v17335_v9 = vpop.f32.mrb[13].mxu1 }
 0x1f5   :  { %14138 = vmatprep.mubr.msk.f32.mxu0 %vm158_vm1, %v16990_v37 }
 0x1f7   :  { %v17339_v42 = vpop.f32.mrb[14].mxu1 }
 0x1f8   :  { %18755 = vst [vmem:[#allocation15_spill] sm:$0xff] %v17339_v42  ;;  %14139 = vmatmul.mubr.msk.f32.gmra.mrb[24].mxu0 %vm158_vm1, %v16832_v7  ;;  %v17343_v28 = vpop.f32.mrb[15].mxu1 }
 0x1f9   :  { %18756 = vst [vmem:[#allocation16_spill] sm:$0xff] %v17343_v28  ;;  %14141 = vmatprep.mubr.msk.f32.mxu0 %vm158_vm1, %v16849_v18 }
 0x1fb   :  { %v17347_v20 = vpop.f32.mrb[16].mxu1 }
 0x1fc   :  { %18757 = vst [vmem:[#allocation17_spill] sm:$0xff] %v17347_v20  ;;  %14142 = vmatmul.mubr.msk.f32.gmra.mrb[26].mxu0 %vm158_vm1, %v16854_v11  ;;  %v17351_v2 = vpop.f32.mrb[17].mxu1 }
 0x1fd   :  { %18758 = vst [vmem:[#allocation18_spill] sm:$0xff] %v17351_v2  ;;  %14144 = vmatprep.mubr.msk.f32.mxu0 %vm158_vm1, %v16867_v13 }
 0x1ff   :  { %v17355_v37 = vpop.f32.mrb[18].mxu1 }
 0x200   :  { %18759 = vst [vmem:[#allocation19_spill] sm:$0xff] %v17355_v37  ;;  %14145 = vmatmul.mubr.msk.f32.gmra.mrb[28].mxu0 %vm158_vm1, %v16872_v15  ;;  %v17359_v42 = vpop.f32.mrb[19].mxu1 }
 0x201   :  { %18760 = vst [vmem:[#allocation20_spill] sm:$0xff] %v17359_v42  ;;  %14147 = vmatprep.mubr.msk.f32.mxu0 %vm158_vm1, %v16885_v19 }
 0x203   :  { %v17363_v28 = vpop.f32.mrb[20].mxu1 }
 0x204   :  { %18761 = vst [vmem:[#allocation21_spill] sm:$0xff] %v17363_v28  ;;  %14148 = vmatmul.mubr.msk.f32.gmra.mrb[30].mxu0 %vm158_vm1, %v16890_v22  ;;  %v17367_v20 = vpop.f32.mrb[21].mxu1 }
 0x205   :  { %14150 = vmatprep.mubr.msk.f32.mxu0 %vm158_vm1, %v17057_v48 }
 0x207   :  { %v17371_v2 = vpop.f32.mrb[22].mxu1 }
 0x208   :  { %18762 = vst [vmem:[#allocation22_spill] sm:$0xff] %v17371_v2  ;;  %14151 = vmatmul.mubr.msk.f32.gmra.mrb[32].mxu0 %vm158_vm1, %v16906_v25  ;;  %v17375_v37 = vpop.f32.mrb[23].mxu1 }
 0x209   :  { %18763 = vst [vmem:[#allocation23_spill] sm:$0xff] %v17375_v37  ;;  %14153 = vmatprep.mubr.msk.f32.mxu0 %vm158_vm1, %v16923_v29 }
 0x20b   :  { %v17379_v42 = vpop.f32.mrb[24].mxu1 }
 0x20c   :  { %18764 = vst [vmem:[#allocation24_spill] sm:$0xff] %v17379_v42  ;;  %14154 = vmatmul.mubr.msk.f32.gmra.mrb[34].mxu0 %vm158_vm1, %v16928_v30  ;;  %v17383_v28 = vpop.f32.mrb[25].mxu1 }
 0x20d   :  { %18765 = vst [vmem:[#allocation25_spill] sm:$0xff] %v17383_v28  ;;  %14156 = vmatprep.mubr.msk.f32.mxu0 %vm158_vm1, %v16941_v32 }
 0x20f   :  { %v17387_v48 = vpop.f32.mrb[26].mxu1 }
 0x210   :  { %18766 = vst [vmem:[#allocation26_spill] sm:$0xff] %v17387_v48  ;;  %14157 = vmatmul.mubr.msk.f32.gmra.mrb[36].mxu0 %vm158_vm1, %v16946_v33  ;;  %v17391_v2 = vpop.f32.mrb[27].mxu1 }
 0x211   :  { %18767 = vst [vmem:[#allocation27_spill] sm:$0xff] %v17391_v2  ;;  %14159 = vmatprep.mubr.msk.f32.mxu0 %vm158_vm1, %v16959_v34 }
 0x213   :  { %v17395_v37 = vpop.f32.mrb[28].mxu1 }
 0x214   :  { %18768 = vst [vmem:[#allocation28_spill] sm:$0xff] %v17395_v37  ;;  %14160 = vmatmul.mubr.msk.f32.gmra.mrb[38].mxu0 %vm158_vm1, %v16964_v35  ;;  %v17399_v42 = vpop.f32.mrb[29].mxu1 }
 0x215   :  { %14162 = vmatprep.mubr.msk.f32.mxu0 %vm158_vm1, %v17094_v50  ;;  %v17442_v50 = vld [vmem:[%s18706_s0 + $0x2c0] sm:$0xff] }
 0x217   :  { %v17403_v28 = vpop.f32.mrb[30].mxu1 }
 0x218   :  { %14163 = vmatmul.mubr.msk.f32.gmra.mrb[40].mxu0 %vm158_vm1, %v16980_v0  ;;  %v17407_v48 = vpop.f32.mrb[31].mxu1 }
 0x219   :  { %18769 = vst [vmem:[#allocation29_spill] sm:$0xff] %v17407_v48  ;;  %14165 = vmatprep.mubr.msk.f32.mxu0 %vm158_vm1, %v16997_v38 }
 0x21b   :  { %v17411_v2 = vpop.f32.mrb[32].mxu1 }
 0x21c   :  { %18770 = vst [vmem:[#allocation30_spill] sm:$0xff] %v17411_v2  ;;  %14166 = vmatmul.mubr.msk.f32.gmra.mrb[42].mxu0 %vm158_vm1, %v17002_v39  ;;  %v17415_v37 = vpop.f32.mrb[33].mxu1  ;;  %v6433_v2 = vld [vmem:[%s18707_s3 + $0x8] sm:$0xff] }
 0x21d   :  { %18771 = vst [vmem:[#allocation31_spill] sm:$0xff] %v17415_v37  ;;  %14168 = vmatprep.mubr.msk.f32.mxu0 %vm158_vm1, %v17015_v41  ;;  %v6432_v37 = vld [vmem:[%s18707_s3] sm:$0xff] }
 0x21e   :  { %v14756_v48 = vpack.c.bf16 %v6433_v2, %v6432_v37 }
 0x220   :  { %14169 = vmatmul.mubr.msk.f32.gmra.mrb[44].mxu0 %vm158_vm1, %v17020_v43 }
 0x221   :  { %14171 = vmatprep.mubr.msk.f32.mxu0 %vm158_vm1, %v17033_v45 }
 0x224   :  { %14172 = vmatmul.mubr.msk.f32.gmra.mrb[46].mxu0 %vm158_vm1, %v17038_v46 }
 0x225   :  { %14174 = vmatprep.mubr.msk.f32.mxu0 %vm158_vm1, %v17158_v1  ;;  %v17463_v1 = vld [vmem:[%s18706_s0 + $0x310] sm:$0xff] }
 0x228   :  { %14175 = vmatmul.mubr.msk.f32.gmra.mrb[48].mxu0 %vm158_vm1, %v17166_v6 }
 0x229   :  { %14177 = vmatprep.mubr.msk.f32.mxu0 %vm158_vm1, %v17183_v10 }
 0x22c   :  { %14178 = vmatmul.mubr.msk.f32.gmra.mrb[50].mxu0 %vm158_vm1, %v17193_v14 }
 0x22d   :  { %14180 = vmatprep.mubr.msk.f32.mxu0 %vm158_vm1, %v17211_v31 }
 0x230   :  { %14181 = vmatmul.mubr.msk.f32.gmra.mrb[52].mxu0 %vm158_vm1, %v17221_v61 }
 0x231   :  { %14183 = vmatprep.mubr.msk.f32.mxu0 %vm158_vm1, %v17239_v24 }
 0x234   :  { %14184 = vmatmul.mubr.msk.f32.gmra.mrb[54].mxu0 %vm158_vm1, %v17442_v50 }
 0x235   :  { %14186 = vmatprep.mubr.msk.f32.mxu0 %vm158_vm1, %v17176_v8  ;;  %v15471_v8 = vmov 0.0|0.0  }
 0x236   :  { %14755 = vmatprep.subr.bf16.mxu1 %v15471_v8 }
 0x237   :  { %14757 = vmatpush3.bf16.msra.mxu1 %v14756_v48 }
 0x238   :  { %14187 = vmatmul.mubr.msk.f32.gmra.mrb[56].mxu0 %vm158_vm1, %v17188_v12  ;;  %14758 = vmatprep.subr.bf16.mxu1 %v15471_v8 }
 0x239   :  { %14189 = vmatprep.mubr.msk.f32.mxu0 %vm158_vm1, %v17204_v27 }
 0x23c   :  { %14190 = vmatmul.mubr.msk.f32.gmra.mrb[58].mxu0 %vm158_vm1, %v17216_v60 }
 0x23d   :  { %14192 = vmatprep.mubr.msk.f32.mxu0 %vm158_vm1, %v17232_v4 }
 0x240   :  { %14193 = vmatmul.mubr.msk.f32.gmra.mrb[60].mxu0 %vm158_vm1, %v17244_v36 }
 0x241   :  { %14195 = vmatprep.mubr.msk.f32.mxu0 %vm158_vm1, %v17255_v23 }
 0x244   :  { %14196 = vmatmul.mubr.msk.f32.gmra.mrb[62].mxu0 %vm158_vm1, %v17463_v1 }
 0x245   :  { %14200 = vmatprep.mubr.msk.f32.mxu0 %vm158_vm1, %v16605_v51  ;;  %v12441_v51 = vld [vmem:[%s18706_s0 + $0xe8] sm:$0xff] }
 0x248   :  { %14201 = vmatmul.mubr.msk.f32.vlgmr.msra.gmra.mrb[0].mxu0 %vm158_vm1, %v16618_v52  ;;  %v18772_v52 = vld [vmem:[#allocation4_spill] sm:$0xff] }
 0x249   :  { %14203 = vmatprep.mubr.msk.f32.mxu0 %vm158_vm1, %v16623_v53 }
 0x24c   :  { %14204 = vmatmul.mubr.msk.f32.gmra.mrb[2].mxu0 %vm158_vm1, %v16636_v54 }
 0x24d   :  { %14206 = vmatprep.mubr.msk.f32.mxu0 %vm158_vm1, %v16641_v55 }
 0x250   :  { %14207 = vmatmul.mubr.msk.f32.gmra.mrb[4].mxu0 %vm158_vm1, %v16654_v40 }
 0x251   :  { %14209 = vmatprep.mubr.msk.f32.mxu0 %vm158_vm1, %v16659_v49  ;;  %v12449_v49 = vld [vmem:[%s18706_s0 + $0x138] sm:$0xff] }
 0x254   :  { %14210 = vmatmul.mubr.msk.f32.gmra.mrb[6].mxu0 %vm158_vm1, %v12441_v51 }
 0x255   :  { %14212 = vmatprep.mubr.msk.f32.mxu0 %vm158_vm1, %v16677_v47 }
 0x258   :  { %14213 = vmatmul.mubr.msk.f32.gmra.mrb[8].mxu0 %vm158_vm1, %v18772_v52 }
 0x259   :  { %14215 = vmatprep.mubr.msk.f32.mxu0 %vm158_vm1, %v16695_v44 }
 0x25b   :  { %v17499_v53 = vpop.f32.mrb[34].mxu1 }
 0x25c   :  { %14216 = vmatmul.mubr.msk.f32.gmra.mrb[10].mxu0 %vm158_vm1, %v16708_v56  ;;  %v17503_v54 = vpop.f32.mrb[35].mxu1 }
 0x25d   :  { %14218 = vmatprep.mubr.msk.f32.mxu0 %vm158_vm1, %v16713_v57 }
 0x25f   :  { %v17507_v55 = vpop.f32.mrb[36].mxu1 }
 0x260   :  { %14219 = vmatmul.mubr.msk.f32.gmra.mrb[12].mxu0 %vm158_vm1, %v16726_v58  ;;  %v17511_v40 = vpop.f32.mrb[37].mxu1 }
 0x261   :  { %14221 = vmatprep.mubr.msk.f32.mxu0 %vm158_vm1, %v16731_v59 }
 0x263   :  { %v17518_v47 = vpop.f32.mrb[38].mxu1 }
 0x264   :  { %14222 = vmatmul.mubr.msk.f32.gmra.mrb[14].mxu0 %vm158_vm1, %v12449_v49  ;;  %v17521_v44 = vpop.f32.mrb[39].mxu1  ;;  %v6437_v49 = vld [vmem:[%s18707_s3 + $0x28] sm:$0xff] }
 0x265   :  { %14224 = vmatprep.mubr.msk.f32.mxu0 %vm158_vm1, %v16750_v62 }
 0x267   :  { %v17525_v56 = vpop.f32.mrb[40].mxu1 }
 0x268   :  { %14225 = vmatmul.mubr.msk.f32.gmra.mrb[16].mxu0 %vm158_vm1, %v16766_v3  ;;  %v17529_v57 = vpop.f32.mrb[41].mxu1 }
 0x269   :  { %14227 = vmatprep.mubr.msk.f32.mxu0 %vm158_vm1, %v16771_v5  ;;  %v12457_v5 = vld [vmem:[%s18706_s0 + $0x188] sm:$0xff] }
 0x26b   :  { %v17533_v58 = vpop.f32.mrb[42].mxu1 }
 0x26c   :  { %14228 = vmatmul.mubr.msk.f32.gmra.mrb[18].mxu0 %vm158_vm1, %v16789_v21  ;;  %v17537_v59 = vpop.f32.mrb[43].mxu1 }
 0x26d   :  { %14230 = vmatprep.mubr.msk.f32.mxu0 %vm158_vm1, %v16796_v26 }
 0x26f   :  { %v17541_v62 = vpop.f32.mrb[44].mxu1 }
 0x270   :  { %14231 = vmatmul.mubr.msk.f32.gmra.mrb[20].mxu0 %vm158_vm1, %v16811_v16  ;;  %v17545_v3 = vpop.f32.mrb[45].mxu1 }
 0x271   :  { %14233 = vmatprep.mubr.msk.f32.mxu0 %vm158_vm1, %v16816_v17 }
 0x273   :  { %v17552_v21 = vpop.f32.mrb[46].mxu1 }
 0x274   :  { %14234 = vmatmul.mubr.msk.f32.gmra.mrb[22].mxu0 %vm158_vm1, %v12457_v5  ;;  %v17555_v2 = vpop.f32.mrb[47].mxu1 }
 0x275   :  { %14236 = vmatprep.mubr.msk.f32.mxu0 %vm158_vm1, %v16832_v7 }
 0x277   :  { %v17559_v26 = vpop.f32.mrb[48].mxu1 }
 0x278   :  { %14237 = vmatmul.mubr.msk.f32.gmra.mrb[24].mxu0 %vm158_vm1, %v16849_v18  ;;  %v17563_v16 = vpop.f32.mrb[49].mxu1 }
 0x279   :  { %14239 = vmatprep.mubr.msk.f32.mxu0 %vm158_vm1, %v16854_v11  ;;  %v12465_v11 = vld [vmem:[%s18706_s0 + $0x1d8] sm:$0xff] }
 0x27b   :  { %v17567_v17 = vpop.f32.mrb[50].mxu1 }
 0x27c   :  { %14240 = vmatmul.mubr.msk.f32.gmra.mrb[26].mxu0 %vm158_vm1, %v16867_v13  ;;  %v17571_v37 = vpop.f32.mrb[51].mxu1 }
 0x27d   :  { %14242 = vmatprep.mubr.msk.f32.mxu0 %vm158_vm1, %v16872_v15 }
 0x27f   :  { %v17575_v7 = vpop.f32.mrb[52].mxu1 }
 0x280   :  { %14243 = vmatmul.mubr.msk.f32.gmra.mrb[28].mxu0 %vm158_vm1, %v16885_v19  ;;  %v17579_v18 = vpop.f32.mrb[53].mxu1 }
 0x281   :  { %14245 = vmatprep.mubr.msk.f32.mxu0 %vm158_vm1, %v16890_v22 }
 0x283   :  { %v17586_v13 = vpop.f32.mrb[54].mxu1 }
 0x284   :  { %14246 = vmatmul.mubr.msk.f32.gmra.mrb[30].mxu0 %vm158_vm1, %v12465_v11  ;;  %v17589_v48 = vpop.f32.mrb[55].mxu1  ;;  %v18777_v11 = vld [vmem:[#allocation8_spill] sm:$0xff] }
 0x285   :  { %14248 = vmatprep.mubr.msk.f32.mxu0 %vm158_vm1, %v16906_v25 }
 0x287   :  { %v17593_v15 = vpop.f32.mrb[56].mxu1 }
 0x288   :  { %14249 = vmatmul.mubr.msk.f32.gmra.mrb[32].mxu0 %vm158_vm1, %v16923_v29  ;;  %v17597_v19 = vpop.f32.mrb[57].mxu1 }
 0x289   :  { %14251 = vmatprep.mubr.msk.f32.mxu0 %vm158_vm1, %v16928_v30  ;;  %v12473_v30 = vld [vmem:[%s18706_s0 + $0x228] sm:$0xff] }
 0x28b   :  { %v17601_v22 = vpop.f32.mrb[58].mxu1 }
 0x28c   :  { %14252 = vmatmul.mubr.msk.f32.gmra.mrb[34].mxu0 %vm158_vm1, %v16941_v32  ;;  %v17605_v51 = vpop.f32.mrb[59].mxu1 }
 0x28d   :  { %14254 = vmatprep.mubr.msk.f32.mxu0 %vm158_vm1, %v16946_v33  ;;  %v12481_v33 = vld [vmem:[%s18706_s0 + $0x278] sm:$0xff] }
 0x28f   :  { %v17609_v25 = vpop.f32.mrb[60].mxu1 }
 0x290   :  { %14255 = vmatmul.mubr.msk.f32.gmra.mrb[36].mxu0 %vm158_vm1, %v16959_v34  ;;  %v17613_v29 = vpop.f32.mrb[61].mxu1  ;;  %v15473_v34 = vmov 0.0  }
 0x291   :  { %14257 = vmatprep.mubr.msk.f32.mxu0 %vm158_vm1, %v16964_v35  ;;  %14300 = vmatprep.mubr.msk.f32.mxu1 %vm15472_vm2, %v15473_v34  ;;  %v12489_v35 = vld [vmem:[%s18706_s0 + $0x2c8] sm:$0xff] }
 0x293   :  { %v17620_v32 = vpop.f32.mrb[62].mxu1 }
 0x294   :  { %14258 = vmatmul.mubr.msk.f32.gmra.mrb[38].mxu0 %vm158_vm1, %v12473_v30  ;;  %v17623_v52 = vpop.f32.mrb[63].mxu1 }
 0x295   :  { %14260 = vmatprep.mubr.msk.f32.mxu0 %vm158_vm1, %v16980_v0  ;;  %v12497_v0 = vld [vmem:[%s18706_s0 + $0x318] sm:$0xff] }
 0x298   :  { %14261 = vmatmul.mubr.msk.f32.gmra.mrb[40].mxu0 %vm158_vm1, %v16997_v38 }
 0x299   :  { %14263 = vmatprep.mubr.msk.f32.mxu0 %vm158_vm1, %v17002_v39  ;;  %v18773_v39 = vld [vmem:[#allocation5_spill] sm:$0xff] }
 0x29c   :  { %14264 = vmatmul.mubr.msk.f32.gmra.mrb[42].mxu0 %vm158_vm1, %v17015_v41 }
 0x29d   :  { %14266 = vmatprep.mubr.msk.f32.mxu0 %vm158_vm1, %v17020_v43  ;;  %v17685_v43 = vld [vmem:[%s18708_s2] ss:$0 sm:$0xff] }
 0x2a0   :  { %14267 = vmatmul.mubr.msk.f32.gmra.mrb[44].mxu0 %vm158_vm1, %v17033_v45 }
 0x2a1   :  { %14269 = vmatprep.mubr.msk.f32.mxu0 %vm158_vm1, %v17038_v46  ;;  %v18774_v46 = vld [vmem:[#allocation6_spill] sm:$0xff] }
 0x2a4   :  { %14270 = vmatmul.mubr.msk.f32.gmra.mrb[46].mxu0 %vm158_vm1, %v12481_v33 }
 0x2a5   :  { %14272 = vmatprep.mubr.msk.f32.mxu0 %vm158_vm1, %v17166_v6 }
 0x2a8   :  { %14273 = vmatmul.mubr.msk.f32.gmra.mrb[48].mxu0 %vm158_vm1, %v17183_v10  ;;  %v6434_v10 = vld [vmem:[%s18707_s3 + $0x10] sm:$0xff] }
 0x2a9   :  { %14275 = vmatprep.mubr.msk.f32.mxu0 %vm158_vm1, %v17193_v14 }
 0x2ac   :  { %14276 = vmatmul.mubr.msk.f32.gmra.mrb[50].mxu0 %vm158_vm1, %v17211_v31  ;;  %v18775_v31 = vld [vmem:[#allocation2_spill] sm:$0xff] }
 0x2ad   :  { %14278 = vmatprep.mubr.msk.f32.mxu0 %vm158_vm1, %v17221_v61 }
 0x2b0   :  { %14279 = vmatmul.mubr.msk.f32.gmra.mrb[52].mxu0 %vm158_vm1, %v17239_v24 }
 0x2b1   :  { %14281 = vmatprep.mubr.msk.f32.mxu0 %vm158_vm1, %v17442_v50 }
 0x2b4   :  { %14282 = vmatmul.mubr.msk.f32.gmra.mrb[54].mxu0 %vm158_vm1, %v12489_v35 }
 0x2b5   :  { %14284 = vmatprep.mubr.msk.f32.mxu0 %vm158_vm1, %v17188_v12  ;;  %v6435_v12 = vld [vmem:[%s18707_s3 + $0x18] sm:$0xff] }
 0x2b8   :  { %14285 = vmatmul.mubr.msk.f32.gmra.mrb[56].mxu0 %vm158_vm1, %v17204_v27 }
 0x2b9   :  { %14287 = vmatprep.mubr.msk.f32.mxu0 %vm158_vm1, %v17216_v60 }
 0x2bc   :  { %14288 = vmatmul.mubr.msk.f32.gmra.mrb[58].mxu0 %vm158_vm1, %v17232_v4  ;;  %v14759_v4 = vpack.c.bf16 %v6435_v12, %v6434_v10 }
 0x2bd   :  { %14290 = vmatprep.mubr.msk.f32.mxu0 %vm158_vm1, %v17244_v36 }
 0x2c0   :  { %14291 = vmatmul.mubr.msk.f32.gmra.mrb[60].mxu0 %vm158_vm1, %v17255_v23  ;;  %v18776_v23 = vld [vmem:[#allocation7_spill] sm:$0xff] }
 0x2c1   :  { %14293 = vmatprep.mubr.msk.f32.mxu0 %vm158_vm1, %v17463_v1  ;;  %v6436_v1 = vld [vmem:[%s18707_s3 + $0x20] sm:$0xff] }
 0x2c2   :  { %v14762_v35 = vpack.c.bf16 %v6437_v49, %v6436_v1 }
 0x2c4   :  { %14294 = vmatmul.mubr.msk.f32.gmra.mrb[62].mxu0 %vm158_vm1, %v12497_v0 }
 0x31b   :  { %v14202_v38 = vpop.f32.mrb[0].mxu0 }
 0x31c   :  { %v14955_v41 = vadd.f32 %v14202_v38, %v18773_v39  ;;  %v5914_v45 = vpop.f32.mrb[1].mxu0 }
 0x31d   :  { %v14956_v6 = vadd.f32 %v5914_v45, %v18774_v46  ;;  %v6439_v45 = vld [vmem:[%s18707_s3 + $0x38] sm:$0xff] }
 0x31e   :  { %v6305_v24 = vadd.f32 %v14955_v41, %v17685_v43  ;;  %v6438_v41 = vld [vmem:[%s18707_s3 + $0x30] sm:$0xff] }
 0x31f   :  { %v6304_v14 = vadd.f32 %v14956_v6, %v17685_v43  ;;  %v14205_v27 = vpop.f32.mrb[2].mxu0  ;;  %v18778_v6 = vld [vmem:[#allocation3_spill] sm:$0xff] }
 0x320   :  { %v14957_v60 = vadd.f32 %v14205_v27, %v18775_v31  ;;  %v5924_v61 = vpop.f32.mrb[3].mxu0  ;;  %v6369_v0 = vmax.f32 %v6305_v24, 0.0  ;;  %v18779_v31 = vld [vmem:[#allocation9_spill] sm:$0xff]  ;;  %v6441_v24 = vld [vmem:[%s18707_s3 + $0x48] sm:$0xff] }
 0x321   :  { %v6368_v36 = vmax.f32 %v6304_v14, 0.0  ;;  %v14958_v50 = vadd.f32 %v5924_v61, %v18776_v23  ;;  %v18780_v23 = vld [vmem:[#allocation10_spill] sm:$0xff] }
 0x322   :  { %v6307_v14 = vadd.f32 %v14957_v60, %v17685_v43 }
 0x323   :  { %v14208_v5 = vpop.f32.mrb[4].mxu0  ;;  %14301 = vmatmul.mubr.msk.f32.vlgmr.msra.gmra.mrb[64].mxu1 %vm6560_vm3, %v6368_v36  ;;  %v6306_v38 = vadd.f32 %v14958_v50, %v17685_v43 }
 0x324   :  { %v14959_v30 = vadd.f32 %v14208_v5, %v18777_v11  ;;  %v5934_v33 = vpop.f32.mrb[5].mxu0  ;;  %14760 = vmatpush3.bf16.msra.mxu1 %v14759_v4  ;;  %14307 = vmatprep.mubr.msk.f32.mxu1 %vm15472_vm2, %v15473_v34  ;;  %v6440_v4 = vld [vmem:[%s18707_s3 + $0x40] sm:$0xff]  ;;  %v6371_v49 = vmax.f32 %v6307_v14, 0.0  ;;  %v18781_v11 = vld [vmem:[#allocation11_spill] sm:$0xff] }
 0x325   :  { %v14960_v39 = vadd.f32 %v5934_v33, %v17303_v63  ;;  %14761 = vmatprep.subr.bf16.mxu1 %v15471_v8  ;;  %v14765_v63 = vpack.c.bf16 %v6439_v45, %v6438_v41  ;;  %v6370_v27 = vmax.f32 %v6306_v38, 0.0  ;;  %v14768_v1 = vpack.c.bf16 %v6441_v24, %v6440_v4  ;;  %v18782_v41 = vld [vmem:[#allocation12_spill] sm:$0xff]  ;;  %v18784_v24 = vld [vmem:[#allocation14_spill] sm:$0xff] }
 0x327   :  { %v14211_v46 = vpop.f32.mrb[6].mxu0  ;;  %14308 = vmatmul.mubr.msk.f32.vlgmr.msra.gmra.mrb[66].mxu1 %vm6560_vm3, %v6369_v0  ;;  %v6308_v5 = vadd.f32 %v14960_v39, %v17685_v43  ;;  %v6443_v0 = vld [vmem:[%s18707_s3 + $0x58] sm:$0xff] }
 0x328   :  { %v14961_v10 = vadd.f32 %v14211_v46, %v18778_v6  ;;  %v5944_v12 = vpop.f32.mrb[7].mxu0  ;;  %14763 = vmatpush3.bf16.msra.mxu1 %v14762_v35  ;;  %14314 = vmatprep.mubr.msk.f32.mxu1 %vm15472_vm2, %v15473_v34  ;;  %v6442_v35 = vld [vmem:[%s18707_s3 + $0x50] sm:$0xff]  ;;  %v6309_v6 = vadd.f32 %v14959_v30, %v17685_v43 }
 0x329   :  { %v14962_v61 = vadd.f32 %v5944_v12, %v18779_v31  ;;  %14764 = vmatprep.subr.bf16.mxu1 %v15471_v8  ;;  %v14771_v39 = vpack.c.bf16 %v6443_v0, %v6442_v35  ;;  %v6372_v12 = vmax.f32 %v6308_v5, 0.0  ;;  %v6445_v31 = vld [vmem:[%s18707_s3 + $0x68] sm:$0xff]  ;;  %v6446_v5 = vld [vmem:[%s18707_s3 + $0x70] sm:$0xff] }
 0x32a   :  { %v18785_v0 = vld [vmem:[#allocation15_spill] sm:$0xff] }
 0x32b   :  { %v14214_v36 = vpop.f32.mrb[8].mxu0  ;;  %14315 = vmatmul.mubr.msk.f32.vlgmr.msra.gmra.mrb[68].mxu1 %vm6560_vm3, %v6370_v27  ;;  %v6444_v27 = vld [vmem:[%s18707_s3 + $0x60] sm:$0xff] }
 0x32c   :  { %v17732_v50 = vadd.f32 %v14214_v36, %v18780_v23  ;;  %v5954_v60 = vpop.f32.mrb[9].mxu0  ;;  %14766 = vmatpush3.bf16.msra.mxu1 %v14765_v63  ;;  %14321 = vmatprep.mubr.msk.f32.mxu1 %vm15472_vm2, %v15473_v34  ;;  %v18783_v63 = vld [vmem:[#allocation13_spill] sm:$0xff]  ;;  %v14774_v23 = vpack.c.bf16 %v6445_v31, %v6444_v27 }
 0x32d   :  { %v14964_v33 = vadd.f32 %v5954_v60, %v18781_v11  ;;  %14767 = vmatprep.subr.bf16.mxu1 %v15471_v8  ;;  %v6373_v60 = vmax.f32 %v6309_v6, 0.0  ;;  %v6447_v11 = vld [vmem:[%s18707_s3 + $0x78] sm:$0xff] }
 0x32e   :  { %v18787_v31 = vld [vmem:[#allocation17_spill] sm:$0xff] }
 0x32f   :  { %v14217_v38 = vpop.f32.mrb[10].mxu0  ;;  %14322 = vmatmul.mubr.msk.f32.vlgmr.msra.gmra.mrb[70].mxu1 %vm6560_vm3, %v6371_v49 }
 0x330   :  { %v17747_v45 = vadd.f32 %v14217_v38, %v18782_v41  ;;  %v5964_v46 = vpop.f32.mrb[11].mxu0  ;;  %14769 = vmatpush3.bf16.msra.mxu1 %v14768_v1  ;;  %14328 = vmatprep.mubr.msk.f32.mxu1 %vm15472_vm2, %v15473_v34  ;;  %v6310_v1 = vadd.f32 %v14962_v61, %v17685_v43  ;;  %v6311_v41 = vadd.f32 %v14961_v10, %v17685_v43 }
 0x331   :  { %v17753_v14 = vadd.f32 %v5964_v46, %v18783_v63  ;;  %14770 = vmatprep.subr.bf16.mxu1 %v15471_v8  ;;  %v6449_v63 = vld [vmem:[%s18707_s3 + $0x88] sm:$0xff] }
 0x332   :  { %v6374_v46 = vmax.f32 %v6310_v1, 0.0 }
 0x333   :  { %v14220_v4 = vpop.f32.mrb[12].mxu0  ;;  %14329 = vmatmul.mubr.msk.f32.vlgmr.msra.gmra.mrb[72].mxu1 %vm6560_vm3, %v6372_v12  ;;  %v6448_v12 = vld [vmem:[%s18707_s3 + $0x80] sm:$0xff] }
 0x334   :  { %v17764_v36 = vadd.f32 %v14220_v4, %v18784_v24  ;;  %v5974_v30 = vpop.f32.mrb[13].mxu0  ;;  %14772 = vmatpush3.bf16.msra.mxu1 %v14771_v39  ;;  %14335 = vmatprep.mubr.msk.f32.mxu1 %vm15472_vm2, %v15473_v34  ;;  %v18786_v39 = vld [vmem:[#allocation16_spill] sm:$0xff]  ;;  %v14780_v24 = vpack.c.bf16 %v6449_v63, %v6448_v12  ;;  %v6452_v63 = vld [vmem:[%s18707_s3 + $0xa0] sm:$0xff] }
 0x335   :  { %v17770_v49 = vadd.f32 %v5974_v30, %v17335_v9  ;;  %14773 = vmatprep.subr.bf16.mxu1 %v15471_v8  ;;  %v14777_v9 = vpack.c.bf16 %v6447_v11, %v6446_v5  ;;  %v6375_v30 = vmax.f32 %v6311_v41, 0.0  ;;  %v6450_v5 = vld [vmem:[%s18707_s3 + $0x90] sm:$0xff]  ;;  %v6451_v11 = vld [vmem:[%s18707_s3 + $0x98] sm:$0xff]  ;;  %v6313_v41 = vadd.f32 %v17732_v50, %v17685_v43 }
 0x337   :  { %v14223_v35 = vpop.f32.mrb[14].mxu0  ;;  %14336 = vmatmul.mubr.msk.f32.vlgmr.msra.gmra.mrb[74].mxu1 %vm6560_vm3, %v6373_v60  ;;  %v18788_v60 = vld [vmem:[#allocation18_spill] sm:$0xff] }
 0x338   :  { %v17781_v38 = vadd.f32 %v14223_v35, %v18785_v0  ;;  %v5984_v61 = vpop.f32.mrb[15].mxu0  ;;  %14775 = vmatpush3.bf16.msra.mxu1 %v14774_v23  ;;  %14342 = vmatprep.mubr.msk.f32.mxu1 %vm15472_vm2, %v15473_v34  ;;  %v6312_v23 = vadd.f32 %v14964_v33, %v17685_v43  ;;  %v18789_v0 = vld [vmem:[#allocation19_spill] sm:$0xff] }
 0x339   :  { %v17787_v6 = vadd.f32 %v5984_v61, %v18786_v39  ;;  %14776 = vmatprep.subr.bf16.mxu1 %v15471_v8  ;;  %v18790_v39 = vld [vmem:[#allocation20_spill] sm:$0xff] }
 0x33b   :  { %v14226_v27 = vpop.f32.mrb[16].mxu0  ;;  %14343 = vmatmul.mubr.msk.f32.vlgmr.msra.gmra.mrb[76].mxu1 %vm6560_vm3, %v6374_v46  ;;  %v6376_v46 = vmax.f32 %v6312_v23, 0.0  ;;  %v6377_v23 = vmax.f32 %v6313_v41, 0.0  ;;  %v6315_v41 = vadd.f32 %v17747_v45, %v17685_v43 }
 0x33c   :  { %v17798_v4 = vadd.f32 %v14226_v27, %v18787_v31  ;;  %v5994_v10 = vpop.f32.mrb[17].mxu0  ;;  %14778 = vmatpush3.bf16.msra.mxu1 %v14777_v9  ;;  %14349 = vmatprep.mubr.msk.f32.mxu1 %vm15472_vm2, %v15473_v34  ;;  %v14783_v9 = vpack.c.bf16 %v6451_v11, %v6450_v5  ;;  %v6453_v27 = vld [vmem:[%s18707_s3 + $0xa8] sm:$0xff]  ;;  %v6454_v11 = vld [vmem:[%s18707_s3 + $0xb0] sm:$0xff] }
 0x33d   :  { %v17804_v1 = vadd.f32 %v5994_v10, %v18788_v60  ;;  %14779 = vmatprep.subr.bf16.mxu1 %v15471_v8  ;;  %v18791_v10 = vld [vmem:[#allocation21_spill] sm:$0xff]  ;;  %v6314_v60 = vadd.f32 %v17753_v14, %v17685_v43 }
 0x33f   :  { %v14229_v35 = vpop.f32.mrb[18].mxu0  ;;  %14350 = vmatmul.mubr.msk.f32.vlgmr.msra.gmra.mrb[78].mxu1 %vm6560_vm3, %v6375_v30  ;;  %v14786_v30 = vpack.c.bf16 %v6453_v27, %v6452_v63  ;;  %v6456_v27 = vld [vmem:[%s18707_s3 + $0xc0] sm:$0xff] }
 0x340   :  { %v17815_v61 = vadd.f32 %v14229_v35, %v18789_v0  ;;  %v6004_v33 = vpop.f32.mrb[19].mxu0  ;;  %14781 = vmatpush3.bf16.msra.mxu1 %v14780_v24  ;;  %14356 = vmatprep.mubr.msk.f32.mxu1 %vm15472_vm2, %v15473_v34  ;;  %v6455_v35 = vld [vmem:[%s18707_s3 + $0xb8] sm:$0xff] }
 0x341   :  { %v17822_v12 = vadd.f32 %v6004_v33, %v18790_v39  ;;  %14782 = vmatprep.subr.bf16.mxu1 %v15471_v8  ;;  %v18792_v33 = vld [vmem:[#allocation22_spill] sm:$0xff]  ;;  %v18793_v39 = vld [vmem:[#allocation23_spill] sm:$0xff] }
 0x343   :  { %v14232_v31 = vpop.f32.mrb[20].mxu0  ;;  %14357 = vmatmul.mubr.msk.f32.vlgmr.msra.gmra.mrb[80].mxu1 %vm6560_vm3, %v6376_v46  ;;  %v6378_v46 = vmax.f32 %v6314_v60, 0.0  ;;  %v6379_v60 = vmax.f32 %v6315_v41, 0.0  ;;  %v18796_v41 = vld [vmem:[#allocation26_spill] sm:$0xff] }
 0x344   :  { %v17833_v24 = vadd.f32 %v14232_v31, %v18791_v10  ;;  %v6014_v50 = vpop.f32.mrb[21].mxu0  ;;  %14784 = vmatpush3.bf16.msra.mxu1 %v14783_v9  ;;  %14363 = vmatprep.mubr.msk.f32.mxu1 %vm15472_vm2, %v15473_v34  ;;  %v6457_v31 = vld [vmem:[%s18707_s3 + $0xc8] sm:$0xff] }
 0x345   :  { %v17840_v5 = vadd.f32 %v6014_v50, %v17367_v20  ;;  %14785 = vmatprep.subr.bf16.mxu1 %v15471_v8  ;;  %v14789_v20 = vpack.c.bf16 %v6455_v35, %v6454_v11  ;;  %v18794_v50 = vld [vmem:[#allocation24_spill] sm:$0xff]  ;;  %v6316_v11 = vadd.f32 %v17770_v49, %v17685_v43  ;;  %v18795_v35 = vld [vmem:[#allocation25_spill] sm:$0xff] }
 0x347   :  { %v14235_v0 = vpop.f32.mrb[22].mxu0  ;;  %14364 = vmatmul.mubr.msk.f32.vlgmr.msra.gmra.mrb[82].mxu1 %vm6560_vm3, %v6377_v23  ;;  %v14792_v23 = vpack.c.bf16 %v6457_v31, %v6456_v27  ;;  %v6317_v27 = vadd.f32 %v17764_v36, %v17685_v43  ;;  %v6380_v31 = vmax.f32 %v6316_v11, 0.0 }
 0x348   :  { %v17851_v9 = vadd.f32 %v14235_v0, %v18792_v33  ;;  %v6024_v14 = vpop.f32.mrb[23].mxu0  ;;  %14787 = vmatpush3.bf16.msra.mxu1 %v14786_v30  ;;  %14370 = vmatprep.mubr.msk.f32.mxu1 %vm15472_vm2, %v15473_v34  ;;  %v6458_v33 = vld [vmem:[%s18707_s3 + $0xd0] sm:$0xff] }
 0x349   :  { %v17858_v63 = vadd.f32 %v6024_v14, %v18793_v39  ;;  %14788 = vmatprep.subr.bf16.mxu1 %v15471_v8  ;;  %v6459_v14 = vld [vmem:[%s18707_s3 + $0xd8] sm:$0xff] }
 0x34a   :  { %v14795_v39 = vpack.c.bf16 %v6459_v14, %v6458_v33  ;;  %v6381_v14 = vmax.f32 %v6317_v27, 0.0 }
 0x34b   :  { %v14238_v10 = vpop.f32.mrb[24].mxu0  ;;  %14371 = vmatmul.mubr.msk.f32.vlgmr.msra.gmra.mrb[84].mxu1 %vm6560_vm3, %v6378_v46 }
 0x34c   :  { %v17869_v30 = vadd.f32 %v14238_v10, %v18794_v50  ;;  %v6034_v45 = vpop.f32.mrb[25].mxu0  ;;  %14790 = vmatpush3.bf16.msra.mxu1 %v14789_v20  ;;  %14377 = vmatprep.mubr.msk.f32.mxu1 %vm15472_vm2, %v15473_v34  ;;  %v18797_v10 = vld [vmem:[#allocation27_spill] sm:$0xff] }
 0x34d   :  { %v17876_v0 = vadd.f32 %v6034_v45, %v18795_v35  ;;  %14791 = vmatprep.subr.bf16.mxu1 %v15471_v8  ;;  %v6460_v45 = vld [vmem:[%s18707_s3 + $0xe0] sm:$0xff]  ;;  %v18798_v35 = vld [vmem:[#allocation28_spill] sm:$0xff] }
 0x34f   :  { %v14241_v20 = vpop.f32.mrb[26].mxu0  ;;  %14378 = vmatmul.mubr.msk.f32.vlgmr.msra.gmra.mrb[86].mxu1 %vm6560_vm3, %v6379_v60 }
 0x350   :  { %v17887_v46 = vadd.f32 %v14241_v20, %v18796_v41  ;;  %v6044_v49 = vpop.f32.mrb[27].mxu0  ;;  %14793 = vmatpush3.bf16.msra.mxu1 %v14792_v23  ;;  %14384 = vmatprep.mubr.msk.f32.mxu1 %vm15472_vm2, %v15473_v34  ;;  %v6461_v23 = vld [vmem:[%s18707_s3 + $0xe8] sm:$0xff]  ;;  %v6318_v20 = vadd.f32 %v17787_v6, %v17685_v43 }
 0x351   :  { %v17894_v50 = vadd.f32 %v6044_v49, %v18797_v10  ;;  %14794 = vmatprep.subr.bf16.mxu1 %v15471_v8  ;;  %v14798_v11 = vpack.c.bf16 %v6461_v23, %v6460_v45  ;;  %v6462_v49 = vld [vmem:[%s18707_s3 + $0xf0] sm:$0xff]  ;;  %v6319_v10 = vadd.f32 %v17781_v38, %v17685_v43  ;;  %v18799_v23 = vld [vmem:[#allocation29_spill] sm:$0xff] }
 0x352   :  { %v6382_v45 = vmax.f32 %v6318_v20, 0.0 }
 0x353   :  { %v14244_v60 = vpop.f32.mrb[28].mxu0  ;;  %14385 = vmatmul.mubr.msk.f32.vlgmr.msra.gmra.mrb[88].mxu1 %vm6560_vm3, %v6380_v31 }
 0x354   :  { %v17905_v33 = vadd.f32 %v14244_v60, %v18798_v35  ;;  %v6054_v36 = vpop.f32.mrb[29].mxu0  ;;  %14796 = vmatpush3.bf16.msra.mxu1 %v14795_v39  ;;  %14391 = vmatprep.mubr.msk.f32.mxu1 %vm15472_vm2, %v15473_v34  ;;  %v6463_v39 = vld [vmem:[%s18707_s3 + $0xf8] sm:$0xff]  ;;  %v6465_v35 = vld [vmem:[%s18707_s3 + $0x108] sm:$0xff] }
 0x355   :  { %v17912_v41 = vadd.f32 %v6054_v36, %v17399_v42  ;;  %14797 = vmatprep.subr.bf16.mxu1 %v15471_v8  ;;  %v14801_v42 = vpack.c.bf16 %v6463_v39, %v6462_v49  ;;  %v6383_v49 = vmax.f32 %v6319_v10, 0.0  ;;  %v6320_v39 = vadd.f32 %v17804_v1, %v17685_v43 }
 0x357   :  { %v14247_v31 = vpop.f32.mrb[30].mxu0  ;;  %14392 = vmatmul.mubr.msk.f32.vlgmr.msra.gmra.mrb[90].mxu1 %vm6560_vm3, %v6381_v14 }
 0x358   :  { %v17923_v27 = vadd.f32 %v14247_v31, %v17403_v28  ;;  %v6064_v6 = vpop.f32.mrb[31].mxu0  ;;  %14799 = vmatpush3.bf16.msra.mxu1 %v14798_v11  ;;  %14398 = vmatprep.mubr.msk.f32.mxu1 %vm15472_vm2, %v15473_v34  ;;  %v6464_v28 = vld [vmem:[%s18707_s3 + $0x100] sm:$0xff]  ;;  %v18801_v31 = vld [vmem:[#allocation31_spill] sm:$0xff] }
 0x359   :  { %v17930_v60 = vadd.f32 %v6064_v6, %v18799_v23  ;;  %14800 = vmatprep.subr.bf16.mxu1 %v15471_v8  ;;  %v18800_v11 = vld [vmem:[#allocation30_spill] sm:$0xff]  ;;  %v14804_v20 = vpack.c.bf16 %v6465_v35, %v6464_v28  ;;  %v6321_v35 = vadd.f32 %v17798_v4, %v17685_v43 }
 0x35b   :  { %v14250_v36 = vpop.f32.mrb[32].mxu0  ;;  %14399 = vmatmul.mubr.msk.f32.vlgmr.msra.gmra.mrb[92].mxu1 %vm6560_vm3, %v6382_v45  ;;  %v6466_v45 = vld [vmem:[%s18707_s3 + $0x110] sm:$0xff] }
 0x35c   :  { %v17941_v14 = vadd.f32 %v14250_v36, %v18800_v11  ;;  %v6074_v38 = vpop.f32.mrb[33].mxu0  ;;  %14802 = vmatpush3.bf16.msra.mxu1 %v14801_v42  ;;  %14405 = vmatprep.mubr.msk.f32.mxu1 %vm15472_vm2, %v15473_v34  ;;  %v6467_v42 = vld [vmem:[%s18707_s3 + $0x118] sm:$0xff]  ;;  %v6384_v36 = vmax.f32 %v6320_v39, 0.0  ;;  %v6385_v39 = vmax.f32 %v6321_v35, 0.0 }
 0x35d   :  { %v17948_v6 = vadd.f32 %v6074_v38, %v18801_v31  ;;  %14803 = vmatprep.subr.bf16.mxu1 %v15471_v8  ;;  %v14807_v28 = vpack.c.bf16 %v6467_v42, %v6466_v45  ;;  %v6469_v38 = vld [vmem:[%s18707_s3 + $0x128] sm:$0xff]  ;;  %v6322_v31 = vadd.f32 %v17822_v12, %v17685_v43  ;;  %v6471_v42 = vld [vmem:[%s18707_s3 + $0x138] sm:$0xff] }
 0x35f   :  { %v14253_v23 = vpop.f32.mrb[34].mxu0  ;;  %14406 = vmatmul.mubr.msk.f32.vlgmr.msra.gmra.mrb[94].mxu1 %vm6560_vm3, %v6383_v49  ;;  %v6386_v35 = vmax.f32 %v6322_v31, 0.0  ;;  %v6475_v31 = vld [vmem:[%s18707_s3 + $0x158] sm:$0xff] }
 0x360   :  { %v17959_v10 = vadd.f32 %v14253_v23, %v17499_v53  ;;  %v6084_v1 = vpop.f32.mrb[35].mxu0  ;;  %14805 = vmatpush3.bf16.msra.mxu1 %v14804_v20  ;;  %14412 = vmatprep.mubr.msk.f32.mxu1 %vm15472_vm2, %v15473_v34  ;;  %v6468_v53 = vld [vmem:[%s18707_s3 + $0x120] sm:$0xff] }
 0x361   :  { %v17966_v11 = vadd.f32 %v6084_v1, %v17503_v54  ;;  %14806 = vmatprep.subr.bf16.mxu1 %v15471_v8  ;;  %v14810_v54 = vpack.c.bf16 %v6469_v38, %v6468_v53  ;;  %v6473_v53 = vld [vmem:[%s18707_s3 + $0x148] sm:$0xff] }
 0x363   :  { %v14256_v20 = vpop.f32.mrb[36].mxu0  ;;  %14413 = vmatmul.mubr.msk.f32.vlgmr.msra.gmra.mrb[96].mxu1 %vm6560_vm3, %v6384_v36 }
 0x364   :  { %v17977_v49 = vadd.f32 %v14256_v20, %v17507_v55  ;;  %v6094_v4 = vpop.f32.mrb[37].mxu0  ;;  %14808 = vmatpush3.bf16.msra.mxu1 %v14807_v28  ;;  %14419 = vmatprep.mubr.msk.f32.mxu1 %vm15472_vm2, %v15473_v34  ;;  %v6470_v55 = vld [vmem:[%s18707_s3 + $0x130] sm:$0xff]  ;;  %v6323_v28 = vadd.f32 %v17815_v61, %v17685_v43 }
 0x365   :  { %v17984_v45 = vadd.f32 %v6094_v4, %v17511_v40  ;;  %14809 = vmatprep.subr.bf16.mxu1 %v15471_v8  ;;  %v14813_v40 = vpack.c.bf16 %v6471_v42, %v6470_v55 }
 0x366   :  { %v6387_v4 = vmax.f32 %v6323_v28, 0.0  ;;  %v6477_v28 = vld [vmem:[%s18707_s3 + $0x168] sm:$0xff] }
 0x367   :  { %v14259_v23 = vpop.f32.mrb[38].mxu0  ;;  %14420 = vmatmul.mubr.msk.f32.vlgmr.msra.gmra.mrb[98].mxu1 %vm6560_vm3, %v6385_v39 }
 0x368   :  { %v17995_v1 = vadd.f32 %v14259_v23, %v17518_v47  ;;  %v6104_v12 = vpop.f32.mrb[39].mxu0  ;;  %14811 = vmatpush3.bf16.msra.mxu1 %v14810_v54  ;;  %14426 = vmatprep.mubr.msk.f32.mxu1 %vm15472_vm2, %v15473_v34  ;;  %v6472_v47 = vld [vmem:[%s18707_s3 + $0x140] sm:$0xff]  ;;  %v6324_v54 = vadd.f32 %v17840_v5, %v17685_v43  ;;  %v6325_v23 = vadd.f32 %v17833_v24, %v17685_v43 }
 0x369   :  { %v18002_v36 = vadd.f32 %v6104_v12, %v17521_v44  ;;  %14812 = vmatprep.subr.bf16.mxu1 %v15471_v8  ;;  %v14816_v44 = vpack.c.bf16 %v6473_v53, %v6472_v47 }
 0x36a   :  { %v6388_v12 = vmax.f32 %v6324_v54, 0.0  ;;  %v6389_v53 = vmax.f32 %v6325_v23, 0.0 }
 0x36b   :  { %v14262_v38 = vpop.f32.mrb[40].mxu0  ;;  %14427 = vmatmul.mubr.msk.f32.vlgmr.msra.gmra.mrb[100].mxu1 %vm6560_vm3, %v6386_v35 }
 0x36c   :  { %v18013_v20 = vadd.f32 %v14262_v38, %v17525_v56  ;;  %v6114_v61 = vpop.f32.mrb[41].mxu0  ;;  %14814 = vmatpush3.bf16.msra.mxu1 %v14813_v40  ;;  %14433 = vmatprep.mubr.msk.f32.mxu1 %vm15472_vm2, %v15473_v34  ;;  %v6474_v56 = vld [vmem:[%s18707_s3 + $0x150] sm:$0xff]  ;;  %v6326_v38 = vadd.f32 %v17858_v63, %v17685_v43 }
 0x36d   :  { %v18020_v39 = vadd.f32 %v6114_v61, %v17529_v57  ;;  %14815 = vmatprep.subr.bf16.mxu1 %v15471_v8  ;;  %v14819_v57 = vpack.c.bf16 %v6475_v31, %v6474_v56  ;;  %v6327_v56 = vadd.f32 %v17851_v9, %v17685_v43 }
 0x36e   :  { %v6390_v31 = vmax.f32 %v6326_v38, 0.0 }
 0x36f   :  { %v14265_v55 = vpop.f32.mrb[42].mxu0  ;;  %14434 = vmatmul.mubr.msk.f32.vlgmr.msra.gmra.mrb[102].mxu1 %vm6560_vm3, %v6387_v4 }
 0x370   :  { %v18031_v42 = vadd.f32 %v14265_v55, %v17533_v58  ;;  %v6124_v5 = vpop.f32.mrb[43].mxu0  ;;  %14817 = vmatpush3.bf16.msra.mxu1 %v14816_v44  ;;  %14440 = vmatprep.mubr.msk.f32.mxu1 %vm15472_vm2, %v15473_v34  ;;  %v6476_v58 = vld [vmem:[%s18707_s3 + $0x160] sm:$0xff]  ;;  %v6479_v44 = vld [vmem:[%s18707_s3 + $0x178] sm:$0xff] }
 0x371   :  { %v18038_v40 = vadd.f32 %v6124_v5, %v17537_v59  ;;  %14818 = vmatprep.subr.bf16.mxu1 %v15471_v8  ;;  %v14822_v59 = vpack.c.bf16 %v6477_v28, %v6476_v58  ;;  %v6481_v5 = vld [vmem:[%s18707_s3 + $0x188] sm:$0xff]  ;;  %v6328_v58 = vadd.f32 %v17876_v0, %v17685_v43 }
 0x373   :  { %v14268_v35 = vpop.f32.mrb[44].mxu0  ;;  %14441 = vmatmul.mubr.msk.f32.vlgmr.msra.gmra.mrb[104].mxu1 %vm6560_vm3, %v6388_v12  ;;  %v6391_v12 = vmax.f32 %v6327_v56, 0.0  ;;  %v6392_v38 = vmax.f32 %v6328_v58, 0.0  ;;  %v6330_v56 = vadd.f32 %v17894_v50, %v17685_v43  ;;  %v6489_v58 = vld [vmem:[%s18707_s3 + $0x1c8] sm:$0xff] }
 0x374   :  { %v18049_v47 = vadd.f32 %v14268_v35, %v17541_v62  ;;  %v6134_v24 = vpop.f32.mrb[45].mxu0  ;;  %14820 = vmatpush3.bf16.msra.mxu1 %v14819_v57  ;;  %14447 = vmatprep.mubr.msk.f32.mxu1 %vm15472_vm2, %v15473_v34  ;;  %v6478_v62 = vld [vmem:[%s18707_s3 + $0x170] sm:$0xff]  ;;  %v6483_v35 = vld [vmem:[%s18707_s3 + $0x198] sm:$0xff] }
 0x375   :  { %v18056_v61 = vadd.f32 %v6134_v24, %v17545_v3  ;;  %14821 = vmatprep.subr.bf16.mxu1 %v15471_v8  ;;  %v14825_v3 = vpack.c.bf16 %v6479_v44, %v6478_v62  ;;  %v6485_v44 = vld [vmem:[%s18707_s3 + $0x1a8] sm:$0xff] }
 0x377   :  { %v14271_v4 = vpop.f32.mrb[46].mxu0  ;;  %14448 = vmatmul.mubr.msk.f32.vlgmr.msra.gmra.mrb[106].mxu1 %vm6560_vm3, %v6389_v53  ;;  %v6329_v53 = vadd.f32 %v17869_v30, %v17685_v43 }
 0x378   :  { %v18067_v54 = vadd.f32 %v14271_v4, %v17552_v21  ;;  %v6144_v63 = vpop.f32.mrb[47].mxu0  ;;  %14823 = vmatpush3.bf16.msra.mxu1 %v14822_v59  ;;  %14454 = vmatprep.mubr.msk.f32.mxu1 %vm15472_vm2, %v15473_v34  ;;  %v6480_v21 = vld [vmem:[%s18707_s3 + $0x180] sm:$0xff] }
 0x379   :  { %v18074_v55 = vadd.f32 %v6144_v63, %v17555_v2  ;;  %14824 = vmatprep.subr.bf16.mxu1 %v15471_v8  ;;  %v14828_v2 = vpack.c.bf16 %v6481_v5, %v6480_v21  ;;  %v6487_v21 = vld [vmem:[%s18707_s3 + $0x1b8] sm:$0xff] }
 0x37b   :  { %v14274_v57 = vpop.f32.mrb[48].mxu0  ;;  %14455 = vmatmul.mubr.msk.f32.vlgmr.msra.gmra.mrb[108].mxu1 %vm6560_vm3, %v6390_v31 }
 0x37c   :  { %v18085_v23 = vadd.f32 %v14274_v57, %v17559_v26  ;;  %v6154_v9 = vpop.f32.mrb[49].mxu0  ;;  %14826 = vmatpush3.bf16.msra.mxu1 %v14825_v3  ;;  %14461 = vmatprep.mubr.msk.f32.mxu1 %vm15472_vm2, %v15473_v34  ;;  %v6482_v26 = vld [vmem:[%s18707_s3 + $0x190] sm:$0xff]  ;;  %v6393_v3 = vmax.f32 %v6329_v53, 0.0  ;;  %v6491_v53 = vld [vmem:[%s18707_s3 + $0x1d8] sm:$0xff] }
 0x37d   :  { %v18092_v28 = vadd.f32 %v6154_v9, %v17563_v16  ;;  %14827 = vmatprep.subr.bf16.mxu1 %v15471_v8  ;;  %v14831_v16 = vpack.c.bf16 %v6483_v35, %v6482_v26  ;;  %v6331_v9 = vadd.f32 %v17887_v46, %v17685_v43 }
 0x37f   :  { %v14277_v24 = vpop.f32.mrb[50].mxu0  ;;  %14462 = vmatmul.mubr.msk.f32.vlgmr.msra.gmra.mrb[110].mxu1 %vm6560_vm3, %v6391_v12 }
 0x380   :  { %v18103_v59 = vadd.f32 %v14277_v24, %v17567_v17  ;;  %v6164_v0 = vpop.f32.mrb[51].mxu0  ;;  %14829 = vmatpush3.bf16.msra.mxu1 %v14828_v2  ;;  %14468 = vmatprep.mubr.msk.f32.mxu1 %vm15472_vm2, %v15473_v34  ;;  %v6484_v17 = vld [vmem:[%s18707_s3 + $0x1a0] sm:$0xff]  ;;  %v6394_v2 = vmax.f32 %v6330_v56, 0.0  ;;  %v6395_v24 = vmax.f32 %v6331_v9, 0.0 }
 0x381   :  { %v18110_v62 = vadd.f32 %v6164_v0, %v17571_v37  ;;  %14830 = vmatprep.subr.bf16.mxu1 %v15471_v8  ;;  %v14834_v37 = vpack.c.bf16 %v6485_v44, %v6484_v17  ;;  %v6332_v0 = vadd.f32 %v17912_v41, %v17685_v43  ;;  %v6333_v44 = vadd.f32 %v17905_v33, %v17685_v43 }
 0x383   :  { %v14280_v4 = vpop.f32.mrb[52].mxu0  ;;  %14469 = vmatmul.mubr.msk.f32.vlgmr.msra.gmra.mrb[112].mxu1 %vm6560_vm3, %v6392_v38 }
 0x384   :  { %v18121_v63 = vadd.f32 %v14280_v4, %v17575_v7  ;;  %v6174_v30 = vpop.f32.mrb[53].mxu0  ;;  %14832 = vmatpush3.bf16.msra.mxu1 %v14831_v16  ;;  %14475 = vmatprep.mubr.msk.f32.mxu1 %vm15472_vm2, %v15473_v34  ;;  %v6486_v7 = vld [vmem:[%s18707_s3 + $0x1b0] sm:$0xff]  ;;  %v6396_v4 = vmax.f32 %v6332_v0, 0.0 }
 0x385   :  { %v18128_v31 = vadd.f32 %v6174_v30, %v17579_v18  ;;  %14833 = vmatprep.subr.bf16.mxu1 %v15471_v8  ;;  %v14837_v18 = vpack.c.bf16 %v6487_v21, %v6486_v7  ;;  %v6397_v7 = vmax.f32 %v6333_v44, 0.0  ;;  %v6334_v21 = vadd.f32 %v17930_v60, %v17685_v43  ;;  %v6502_v44 = vld [vmem:[%s18707_s3 + $0x230] sm:$0xff] }
 0x387   :  { %v14283_v5 = vpop.f32.mrb[54].mxu0  ;;  %14476 = vmatmul.mubr.msk.f32.vlgmr.msra.gmra.mrb[114].mxu1 %vm6560_vm3, %v6393_v3 }
 0x388   :  { %v18139_v57 = vadd.f32 %v14283_v5, %v17586_v13  ;;  %v6184_v50 = vpop.f32.mrb[55].mxu0  ;;  %14835 = vmatpush3.bf16.msra.mxu1 %v14834_v37  ;;  %14482 = vmatprep.mubr.msk.f32.mxu1 %vm15472_vm2, %v15473_v34  ;;  %v6488_v13 = vld [vmem:[%s18707_s3 + $0x1c0] sm:$0xff]  ;;  %v6493_v37 = vld [vmem:[%s18707_s3 + $0x1e8] sm:$0xff] }
 0x389   :  { %v18146_v12 = vadd.f32 %v6184_v50, %v17589_v48  ;;  %14836 = vmatprep.subr.bf16.mxu1 %v15471_v8  ;;  %v14840_v48 = vpack.c.bf16 %v6489_v58, %v6488_v13  ;;  %v6495_v50 = vld [vmem:[%s18707_s3 + $0x1f8] sm:$0xff]  ;;  %v6398_v13 = vmax.f32 %v6334_v21, 0.0  ;;  %v6506_v21 = vld [vmem:[%s18707_s3 + $0x250] sm:$0xff] }
 0x38b   :  { %v14286_v26 = vpop.f32.mrb[56].mxu0  ;;  %14483 = vmatmul.mubr.msk.f32.vlgmr.msra.gmra.mrb[116].mxu1 %vm6560_vm3, %v6394_v2  ;;  %v6335_v2 = vadd.f32 %v17923_v27, %v17685_v43 }
 0x38c   :  { %v18157_v35 = vadd.f32 %v14286_v26, %v17593_v15  ;;  %v6194_v46 = vpop.f32.mrb[57].mxu0  ;;  %14838 = vmatpush3.bf16.msra.mxu1 %v14837_v18  ;;  %14489 = vmatprep.mubr.msk.f32.mxu1 %vm15472_vm2, %v15473_v34  ;;  %v6490_v15 = vld [vmem:[%s18707_s3 + $0x1d0] sm:$0xff]  ;;  %v6497_v26 = vld [vmem:[%s18707_s3 + $0x208] sm:$0xff] }
 0x38d   :  { %v18164_v16 = vadd.f32 %v6194_v46, %v17597_v19  ;;  %14839 = vmatprep.subr.bf16.mxu1 %v15471_v8  ;;  %v14843_v19 = vpack.c.bf16 %v6491_v53, %v6490_v15  ;;  %v6399_v46 = vmax.f32 %v6335_v2, 0.0  ;;  %v6500_v53 = vld [vmem:[%s18707_s3 + $0x220] sm:$0xff] }
 0x38f   :  { %v14289_v38 = vpop.f32.mrb[58].mxu0  ;;  %14490 = vmatmul.mubr.msk.f32.vlgmr.msra.gmra.mrb[118].mxu1 %vm6560_vm3, %v6395_v24  ;;  %v6499_v24 = vld [vmem:[%s18707_s3 + $0x218] sm:$0xff] }
 0x390   :  { %v18175_v17 = vadd.f32 %v14289_v38, %v17601_v22  ;;  %v6204_v41 = vpop.f32.mrb[59].mxu0  ;;  %14841 = vmatpush3.bf16.msra.mxu1 %v14840_v48  ;;  %14496 = vmatprep.mubr.msk.f32.mxu1 %vm15472_vm2, %v15473_v34  ;;  %v6492_v22 = vld [vmem:[%s18707_s3 + $0x1e0] sm:$0xff]  ;;  %v6498_v48 = vld [vmem:[%s18707_s3 + $0x210] sm:$0xff]  ;;  %v6501_v38 = vld [vmem:[%s18707_s3 + $0x228] sm:$0xff] }
 0x391   :  { %v18182_v30 = vadd.f32 %v6204_v41, %v17605_v51  ;;  %14842 = vmatprep.subr.bf16.mxu1 %v15471_v8  ;;  %v14846_v51 = vpack.c.bf16 %v6493_v37, %v6492_v22  ;;  %v14855_v0 = vpack.c.bf16 %v6499_v24, %v6498_v48  ;;  %v14858_v41 = vpack.c.bf16 %v6501_v38, %v6500_v53  ;;  %v6513_v48 = vld [vmem:[%s18707_s3 + $0x288] sm:$0xff] }
 0x393   :  { %v14292_v3 = vpop.f32.mrb[60].mxu0  ;;  %14497 = vmatmul.mubr.msk.f32.vlgmr.msra.gmra.mrb[120].mxu1 %vm6560_vm3, %v6396_v4  ;;  %v6503_v4 = vld [vmem:[%s18707_s3 + $0x238] sm:$0xff] }
 0x394   :  { %v18193_v56 = vadd.f32 %v14292_v3, %v17609_v25  ;;  %v6214_v33 = vpop.f32.mrb[61].mxu0  ;;  %14844 = vmatpush3.bf16.msra.mxu1 %v14843_v19  ;;  %14503 = vmatprep.mubr.msk.f32.mxu1 %vm15472_vm2, %v15473_v34  ;;  %v6494_v25 = vld [vmem:[%s18707_s3 + $0x1f0] sm:$0xff]  ;;  %v14861_v22 = vpack.c.bf16 %v6503_v4, %v6502_v44  ;;  %v6504_v3 = vld [vmem:[%s18707_s3 + $0x240] sm:$0xff] }
 0x395   :  { %v18200_v5 = vadd.f32 %v6214_v33, %v17613_v29  ;;  %14845 = vmatprep.subr.bf16.mxu1 %v15471_v8  ;;  %v14849_v29 = vpack.c.bf16 %v6495_v50, %v6494_v25  ;;  %v6505_v33 = vld [vmem:[%s18707_s3 + $0x248] sm:$0xff]  ;;  %v6507_v25 = vld [vmem:[%s18707_s3 + $0x258] sm:$0xff]  ;;  %v6518_v4 = vld [vmem:[%s18707_s3 + $0x2b0] sm:$0xff] }
 0x396   :  { %v14867_v50 = vpack.c.bf16 %v6507_v25, %v6506_v21  ;;  %v6523_v21 = vld [vmem:[%s18707_s3 + $0x2d8] sm:$0xff] }
 0x397   :  { %v14295_v18 = vpop.f32.mrb[62].mxu0  ;;  %14504 = vmatmul.mubr.msk.f32.vlgmr.msra.gmra.mrb[122].mxu1 %vm6560_vm3, %v6397_v7 }
 0x398   :  { %v18211_v9 = vadd.f32 %v14295_v18, %v17620_v32  ;;  %v6224_v60 = vpop.f32.mrb[63].mxu0  ;;  %14847 = vmatpush3.bf16.msra.mxu1 %v14846_v51  ;;  %14510 = vmatprep.mubr.msk.f32.mxu1 %vm15472_vm2, %v15473_v34  ;;  %v6496_v32 = vld [vmem:[%s18707_s3 + $0x200] sm:$0xff]  ;;  %v14864_v51 = vpack.c.bf16 %v6505_v33, %v6504_v3  ;;  %v6521_v33 = vld [vmem:[%s18707_s3 + $0x2c8] sm:$0xff] }
 0x399   :  { %v18218_v58 = vadd.f32 %v6224_v60, %v17623_v52  ;;  %14848 = vmatprep.subr.bf16.mxu1 %v15471_v8  ;;  %v14852_v27 = vpack.c.bf16 %v6497_v26, %v6496_v32  ;;  %v6336_v52 = vadd.f32 %v17948_v6, %v17685_v43  ;;  %v6337_v6 = vadd.f32 %v17941_v14, %v17685_v43  ;;  %v6508_v60 = vld [vmem:[%s18707_s3 + $0x260] sm:$0xff]  ;;  %v6510_v32 = vld [vmem:[%s18707_s3 + $0x270] sm:$0xff]  ;;  %v6511_v26 = vld [vmem:[%s18707_s3 + $0x278] sm:$0xff] }
 0x39a   :  { %v6338_v14 = vadd.f32 %v17966_v11, %v17685_v43  ;;  %v6339_v11 = vadd.f32 %v17959_v10, %v17685_v43  ;;  %v6340_v10 = vadd.f32 %v17984_v45, %v17685_v43  ;;  %v6341_v45 = vadd.f32 %v17977_v49, %v17685_v43  ;;  %v6520_v3 = vld [vmem:[%s18707_s3 + $0x2c0] sm:$0xff] }
 0x39b   :  { %14511 = vmatmul.mubr.msk.f32.vlgmr.msra.gmra.mrb[124].mxu1 %vm6560_vm3, %v6398_v13  ;;  %v6400_v15 = vmax.f32 %v6336_v52, 0.0  ;;  %v6401_v19 = vmax.f32 %v6337_v6, 0.0  ;;  %v6342_v49 = vadd.f32 %v18002_v36, %v17685_v43  ;;  %v6343_v36 = vadd.f32 %v17995_v1, %v17685_v43  ;;  %v6512_v52 = vld [vmem:[%s18707_s3 + $0x280] sm:$0xff]  ;;  %v6514_v6 = vld [vmem:[%s18707_s3 + $0x290] sm:$0xff] }
 0x39c   :  { %14850 = vmatpush3.bf16.msra.mxu1 %v14849_v29  ;;  %14517 = vmatprep.mubr.msk.f32.mxu1 %vm15472_vm2, %v15473_v34  ;;  %v6402_v37 = vmax.f32 %v6338_v14, 0.0  ;;  %v6403_v7 = vmax.f32 %v6339_v11, 0.0  ;;  %v6404_v18 = vmax.f32 %v6340_v10, 0.0  ;;  %v6509_v29 = vld [vmem:[%s18707_s3 + $0x268] sm:$0xff]  ;;  %v6405_v13 = vmax.f32 %v6341_v45, 0.0  ;;  %v6522_v10 = vld [vmem:[%s18707_s3 + $0x2d0] sm:$0xff] }
 0x39d   :  { %14851 = vmatprep.subr.bf16.mxu1 %v15471_v8  ;;  %v14870_v2 = vpack.c.bf16 %v6509_v29, %v6508_v60  ;;  %v14876_v24 = vpack.c.bf16 %v6513_v48, %v6512_v52  ;;  %v6344_v1 = vadd.f32 %v18020_v39, %v17685_v43  ;;  %v6345_v39 = vadd.f32 %v18013_v20, %v17685_v43  ;;  %v6524_v45 = vld [vmem:[%s18707_s3 + $0x2e0] sm:$0xff]  ;;  %v6530_v52 = vld [vmem:[%s18707_s3 + $0x310] sm:$0xff]  ;;  %v6531_v48 = vld [vmem:[%s18707_s3 + $0x318] sm:$0xff] }
 0x39e   :  { %v6346_v20 = vadd.f32 %v18038_v40, %v17685_v43  ;;  %v6347_v40 = vadd.f32 %v18031_v42, %v17685_v43  ;;  %v18377_v43 = vld [vmem:[%s18708_s2] ss:$0 sm:$0xff]  ;;  %v14891_v25 = vpack.c.bf16 %v6523_v21, %v6522_v10  ;;  %v6543_v10 = vld [vmem:[%s18707_s3 + $0x378] sm:$0xff] }
 0x39f   :  { %14518 = vmatmul.mubr.msk.f32.vlgmr.msra.gmra.mrb[126].mxu1 %vm6560_vm3, %v6399_v46  ;;  %v6406_v46 = vmax.f32 %v6342_v49, 0.0  ;;  %v6408_v38 = vmax.f32 %v6344_v1, 0.0  ;;  %v6409_v44 = vmax.f32 %v6345_v39, 0.0  ;;  %v6348_v42 = vadd.f32 %v18377_v43, %v18056_v61  ;;  %v6532_v1 = vld [vmem:[%s18707_s3 + $0x320] sm:$0xff]  ;;  %v6534_v39 = vld [vmem:[%s18707_s3 + $0x330] sm:$0xff] }
 0x3a0   :  { %14853 = vmatpush3.bf16.msra.mxu1 %v14852_v27  ;;  %14524 = vmatprep.mubr.msk.f32.mxu1 %vm15472_vm2, %v15473_v34  ;;  %v14873_v27 = vpack.c.bf16 %v6511_v26, %v6510_v32  ;;  %v6349_v61 = vadd.f32 %v18377_v43, %v18049_v47  ;;  %v6350_v47 = vadd.f32 %v18377_v43, %v18074_v55  ;;  %v6528_v26 = vld [vmem:[%s18707_s3 + $0x300] sm:$0xff] }
 0x3a1   :  { %14854 = vmatprep.subr.bf16.mxu1 %v15471_v8  ;;  %v6351_v55 = vadd.f32 %v18377_v43, %v18067_v54  ;;  %v6352_v54 = vadd.f32 %v18377_v43, %v18092_v28  ;;  %v6353_v28 = vadd.f32 %v18377_v43, %v18085_v23  ;;  %v6354_v23 = vadd.f32 %v18377_v43, %v18110_v62 }
 0x3a2   :  { %v6413_v29 = vmax.f32 %v6349_v61, 0.0  ;;  %v6414_v32 = vmax.f32 %v6350_v47, 0.0  ;;  %v6355_v62 = vadd.f32 %v18377_v43, %v18103_v59  ;;  %v6356_v59 = vadd.f32 %v18377_v43, %v18128_v31 }
 0x3a3   :  { %14525 = vmatmul.mubr.msk.f32.vlgmr.msra.gmra.mrb[128].mxu1 %vm6560_vm3, %v6400_v15  ;;  %v6515_v15 = vld [vmem:[%s18707_s3 + $0x298] sm:$0xff]  ;;  %v6357_v31 = vadd.f32 %v18377_v43, %v18121_v63  ;;  %v6358_v63 = vadd.f32 %v18377_v43, %v18146_v12  ;;  %v6359_v61 = vadd.f32 %v18377_v43, %v18139_v57 }
 0x3a4   :  { %14856 = vmatpush3.bf16.msra.mxu1 %v14855_v0  ;;  %14531 = vmatprep.mubr.msk.f32.mxu1 %vm15472_vm2, %v15473_v34  ;;  %v6407_v0 = vmax.f32 %v6343_v36, 0.0  ;;  %v14879_v53 = vpack.c.bf16 %v6515_v15, %v6514_v6  ;;  %v6533_v6 = vld [vmem:[%s18707_s3 + $0x328] sm:$0xff] }
 0x3a5   :  { %14857 = vmatprep.subr.bf16.mxu1 %v15471_v8  ;;  %v14906_v15 = vpack.c.bf16 %v6533_v6, %v6532_v1 }
 0x3a7   :  { %14532 = vmatmul.mubr.msk.f32.vlgmr.msra.gmra.mrb[130].mxu1 %vm6560_vm3, %v6401_v19  ;;  %v6517_v19 = vld [vmem:[%s18707_s3 + $0x2a8] sm:$0xff] }
 0x3a8   :  { %14859 = vmatpush3.bf16.msra.mxu1 %v14858_v41  ;;  %14538 = vmatprep.mubr.msk.f32.mxu1 %vm15472_vm2, %v15473_v34  ;;  %v6516_v41 = vld [vmem:[%s18707_s3 + $0x2a0] sm:$0xff] }
 0x3a9   :  { %14860 = vmatprep.subr.bf16.mxu1 %v15471_v8  ;;  %v14882_v14 = vpack.c.bf16 %v6517_v19, %v6516_v41  ;;  %v6418_v19 = vmax.f32 %v6354_v23, 0.0  ;;  %v6362_v23 = vadd.f32 %v18377_v43, %v18182_v30 }
 0x3ab   :  { %14539 = vmatmul.mubr.msk.f32.vlgmr.msra.gmra.mrb[132].mxu1 %vm6560_vm3, %v6402_v37  ;;  %v6410_v37 = vmax.f32 %v6346_v20, 0.0 }
 0x3ac   :  { %14862 = vmatpush3.bf16.msra.mxu1 %v14861_v22  ;;  %14545 = vmatprep.mubr.msk.f32.mxu1 %vm15472_vm2, %v15473_v34  ;;  %v6519_v22 = vld [vmem:[%s18707_s3 + $0x2b8] sm:$0xff] }
 0x3ad   :  { %14863 = vmatprep.subr.bf16.mxu1 %v15471_v8  ;;  %v14885_v11 = vpack.c.bf16 %v6519_v22, %v6518_v4  ;;  %v6419_v4 = vmax.f32 %v6355_v62, 0.0  ;;  %v6538_v22 = vld [vmem:[%s18707_s3 + $0x350] sm:$0xff] }
 0x3af   :  { %14546 = vmatmul.mubr.msk.f32.vlgmr.msra.gmra.mrb[134].mxu1 %vm6560_vm3, %v6403_v7  ;;  %v6411_v7 = vmax.f32 %v6347_v40, 0.0 }
 0x3b0   :  { %14865 = vmatpush3.bf16.msra.mxu1 %v14864_v51  ;;  %14552 = vmatprep.mubr.msk.f32.mxu1 %vm15472_vm2, %v15473_v34  ;;  %v14888_v51 = vpack.c.bf16 %v6521_v33, %v6520_v3  ;;  %v6540_v3 = vld [vmem:[%s18707_s3 + $0x360] sm:$0xff]  ;;  %v6541_v33 = vld [vmem:[%s18707_s3 + $0x368] sm:$0xff] }
 0x3b1   :  { %14866 = vmatprep.subr.bf16.mxu1 %v15471_v8 }
 0x3b3   :  { %14553 = vmatmul.mubr.msk.f32.vlgmr.msra.gmra.mrb[136].mxu1 %vm6560_vm3, %v6404_v18  ;;  %v6525_v18 = vld [vmem:[%s18707_s3 + $0x2e8] sm:$0xff] }
 0x3b4   :  { %14868 = vmatpush3.bf16.msra.mxu1 %v14867_v50  ;;  %14559 = vmatprep.mubr.msk.f32.mxu1 %vm15472_vm2, %v15473_v34  ;;  %v6412_v50 = vmax.f32 %v6348_v42, 0.0  ;;  %v14894_v60 = vpack.c.bf16 %v6525_v18, %v6524_v45  ;;  %v6542_v42 = vld [vmem:[%s18707_s3 + $0x370] sm:$0xff]  ;;  %v6544_v45 = vld [vmem:[%s18707_s3 + $0x380] sm:$0xff]  ;;  %v6545_v18 = vld [vmem:[%s18707_s3 + $0x388] sm:$0xff] }
 0x3b5   :  { %14869 = vmatprep.subr.bf16.mxu1 %v15471_v8  ;;  %v14921_v12 = vpack.c.bf16 %v6543_v10, %v6542_v42 }
 0x3b7   :  { %14560 = vmatmul.mubr.msk.f32.vlgmr.msra.gmra.mrb[138].mxu1 %vm6560_vm3, %v6405_v13  ;;  %v6527_v13 = vld [vmem:[%s18707_s3 + $0x2f8] sm:$0xff] }
 0x3b8   :  { %14871 = vmatpush3.bf16.msra.mxu1 %v14870_v2  ;;  %14566 = vmatprep.mubr.msk.f32.mxu1 %vm15472_vm2, %v15473_v34  ;;  %v6526_v2 = vld [vmem:[%s18707_s3 + $0x2f0] sm:$0xff] }
 0x3b9   :  { %14872 = vmatprep.subr.bf16.mxu1 %v15471_v8  ;;  %v14897_v49 = vpack.c.bf16 %v6527_v13, %v6526_v2  ;;  %v14924_v13 = vpack.c.bf16 %v6545_v18, %v6544_v45 }
 0x3bb   :  { %14567 = vmatmul.mubr.msk.f32.vlgmr.msra.gmra.mrb[140].mxu1 %vm6560_vm3, %v6406_v46  ;;  %v6415_v46 = vmax.f32 %v6351_v55, 0.0  ;;  %v6360_v55 = vadd.f32 %v18377_v43, %v18164_v16 }
 0x3bc   :  { %14874 = vmatpush3.bf16.msra.mxu1 %v14873_v27  ;;  %14573 = vmatprep.mubr.msk.f32.mxu1 %vm15472_vm2, %v15473_v34  ;;  %v6529_v27 = vld [vmem:[%s18707_s3 + $0x308] sm:$0xff] }
 0x3bd   :  { %14875 = vmatprep.subr.bf16.mxu1 %v15471_v8  ;;  %v14900_v36 = vpack.c.bf16 %v6529_v27, %v6528_v26  ;;  %v6547_v26 = vld [vmem:[%s18707_s3 + $0x398] sm:$0xff] }
 0x3bf   :  { %14574 = vmatmul.mubr.msk.f32.vlgmr.msra.gmra.mrb[142].mxu1 %vm6560_vm3, %v6407_v0  ;;  %v6416_v0 = vmax.f32 %v6352_v54, 0.0 }
 0x3c0   :  { %14877 = vmatpush3.bf16.msra.mxu1 %v14876_v24  ;;  %14580 = vmatprep.mubr.msk.f32.mxu1 %vm15472_vm2, %v15473_v34  ;;  %v14903_v24 = vpack.c.bf16 %v6531_v48, %v6530_v52  ;;  %v6361_v52 = vadd.f32 %v18377_v43, %v18157_v35  ;;  %v6424_v48 = vmax.f32 %v6360_v55, 0.0 }
 0x3c1   :  { %14878 = vmatprep.subr.bf16.mxu1 %v15471_v8 }
 0x3c3   :  { %14581 = vmatmul.mubr.msk.f32.vlgmr.msra.gmra.mrb[144].mxu1 %vm6560_vm3, %v6408_v38  ;;  %v6535_v38 = vld [vmem:[%s18707_s3 + $0x338] sm:$0xff] }
 0x3c4   :  { %14880 = vmatpush3.bf16.msra.mxu1 %v14879_v53  ;;  %14587 = vmatprep.mubr.msk.f32.mxu1 %vm15472_vm2, %v15473_v34  ;;  %v6417_v53 = vmax.f32 %v6353_v28, 0.0  ;;  %v14909_v41 = vpack.c.bf16 %v6535_v38, %v6534_v39  ;;  %v6549_v28 = vld [vmem:[%s18707_s3 + $0x3a8] sm:$0xff]  ;;  %v6550_v39 = vld [vmem:[%s18707_s3 + $0x3b0] sm:$0xff]  ;;  %v6551_v38 = vld [vmem:[%s18707_s3 + $0x3b8] sm:$0xff] }
 0x3c5   :  { %14881 = vmatprep.subr.bf16.mxu1 %v15471_v8  ;;  %v14933_v30 = vpack.c.bf16 %v6551_v38, %v6550_v39 }
 0x3c7   :  { %14588 = vmatmul.mubr.msk.f32.vlgmr.msra.gmra.mrb[146].mxu1 %vm6560_vm3, %v6409_v44  ;;  %v6537_v44 = vld [vmem:[%s18707_s3 + $0x348] sm:$0xff] }
 0x3c8   :  { %14883 = vmatpush3.bf16.msra.mxu1 %v14882_v14  ;;  %14594 = vmatprep.mubr.msk.f32.mxu1 %vm15472_vm2, %v15473_v34  ;;  %v6536_v14 = vld [vmem:[%s18707_s3 + $0x340] sm:$0xff] }
 0x3c9   :  { %14884 = vmatprep.subr.bf16.mxu1 %v15471_v8  ;;  %v14912_v20 = vpack.c.bf16 %v6537_v44, %v6536_v14  ;;  %v6363_v44 = vadd.f32 %v18377_v43, %v18175_v17 }
 0x3cb   :  { %14595 = vmatmul.mubr.msk.f32.vlgmr.msra.gmra.mrb[148].mxu1 %vm6560_vm3, %v6410_v37  ;;  %v6420_v37 = vmax.f32 %v6356_v59, 0.0  ;;  %v6553_v59 = vld [vmem:[%s18707_s3 + $0x3c8] sm:$0xff] }
 0x3cc   :  { %14886 = vmatpush3.bf16.msra.mxu1 %v14885_v11  ;;  %14601 = vmatprep.mubr.msk.f32.mxu1 %vm15472_vm2, %v15473_v34  ;;  %v6539_v11 = vld [vmem:[%s18707_s3 + $0x358] sm:$0xff] }
 0x3cd   :  { %14887 = vmatprep.subr.bf16.mxu1 %v15471_v8  ;;  %v14915_v40 = vpack.c.bf16 %v6539_v11, %v6538_v22 }
 0x3cf   :  { %14602 = vmatmul.mubr.msk.f32.vlgmr.msra.gmra.mrb[150].mxu1 %vm6560_vm3, %v6411_v7  ;;  %v6421_v7 = vmax.f32 %v6357_v31, 0.0 }
 0x3d0   :  { %14889 = vmatpush3.bf16.msra.mxu1 %v14888_v51  ;;  %14608 = vmatprep.mubr.msk.f32.mxu1 %vm15472_vm2, %v15473_v34  ;;  %v14918_v51 = vpack.c.bf16 %v6541_v33, %v6540_v3  ;;  %v6364_v3 = vadd.f32 %v18377_v43, %v18200_v5  ;;  %v6554_v33 = vld [vmem:[%s18707_s3 + $0x3d0] sm:$0xff] }
 0x3d1   :  { %14890 = vmatprep.subr.bf16.mxu1 %v15471_v8 }
 0x3d3   :  { %14609 = vmatmul.mubr.msk.f32.vlgmr.msra.gmra.mrb[152].mxu1 %vm6560_vm3, %v6412_v50  ;;  %v6422_v50 = vmax.f32 %v6358_v63, 0.0 }
 0x3d4   :  { %14892 = vmatpush3.bf16.msra.mxu1 %v14891_v25  ;;  %14615 = vmatprep.mubr.msk.f32.mxu1 %vm15472_vm2, %v15473_v34 }
 0x3d5   :  { %14893 = vmatprep.subr.bf16.mxu1 %v15471_v8 }
 0x3d7   :  { %14616 = vmatmul.mubr.msk.f32.vlgmr.msra.gmra.mrb[154].mxu1 %vm6560_vm3, %v6413_v29 }
 0x3d8   :  { %14895 = vmatpush3.bf16.msra.mxu1 %v14894_v60  ;;  %14622 = vmatprep.mubr.msk.f32.mxu1 %vm15472_vm2, %v15473_v34 }
 0x3d9   :  { %14896 = vmatprep.subr.bf16.mxu1 %v15471_v8 }
 0x3db   :  { %14623 = vmatmul.mubr.msk.f32.vlgmr.msra.gmra.mrb[156].mxu1 %vm6560_vm3, %v6414_v32  ;;  %v6546_v32 = vld [vmem:[%s18707_s3 + $0x390] sm:$0xff] }
 0x3dc   :  { %14898 = vmatpush3.bf16.msra.mxu1 %v14897_v49  ;;  %14629 = vmatprep.mubr.msk.f32.mxu1 %vm15472_vm2, %v15473_v34  ;;  %v6423_v49 = vmax.f32 %v6359_v61, 0.0  ;;  %v14927_v16 = vpack.c.bf16 %v6547_v26, %v6546_v32  ;;  %v6557_v61 = vld [vmem:[%s18707_s3 + $0x3e8] sm:$0xff]  ;;  %v6367_v26 = vadd.f32 %v18377_v43, %v18211_v9 }
 0x3dd   :  { %14899 = vmatprep.subr.bf16.mxu1 %v15471_v8 }
 0x3df   :  { %14630 = vmatmul.mubr.msk.f32.vlgmr.msra.gmra.mrb[158].mxu1 %vm6560_vm3, %v6415_v46 }
 0x3e0   :  { %14901 = vmatpush3.bf16.msra.mxu1 %v14900_v36  ;;  %14636 = vmatprep.mubr.msk.f32.mxu1 %vm15472_vm2, %v15473_v34 }
 0x3e1   :  { %14902 = vmatprep.subr.bf16.mxu1 %v15471_v8 }
 0x3e3   :  { %14637 = vmatmul.mubr.msk.f32.vlgmr.msra.gmra.mrb[160].mxu1 %vm6560_vm3, %v6416_v0 }
 0x3e4   :  { %14904 = vmatpush3.bf16.msra.mxu1 %v14903_v24  ;;  %14643 = vmatprep.mubr.msk.f32.mxu1 %vm15472_vm2, %v15473_v34  ;;  %v6548_v24 = vld [vmem:[%s18707_s3 + $0x3a0] sm:$0xff] }
 0x3e5   :  { %14905 = vmatprep.subr.bf16.mxu1 %v15471_v8  ;;  %v14930_v35 = vpack.c.bf16 %v6549_v28, %v6548_v24 }
 0x3e7   :  { %14644 = vmatmul.mubr.msk.f32.vlgmr.msra.gmra.mrb[162].mxu1 %vm6560_vm3, %v6417_v53  ;;  %v6425_v53 = vmax.f32 %v6361_v52, 0.0  ;;  %v6431_v52 = vmax.f32 %v6367_v26, 0.0 }
 0x3e8   :  { %14907 = vmatpush3.bf16.msra.mxu1 %v14906_v15  ;;  %14650 = vmatprep.mubr.msk.f32.mxu1 %vm15472_vm2, %v15473_v34 }
 0x3e9   :  { %14908 = vmatprep.subr.bf16.mxu1 %v15471_v8 }
 0x3eb   :  { %14651 = vmatmul.mubr.msk.f32.vlgmr.msra.gmra.mrb[164].mxu1 %vm6560_vm3, %v6418_v19 }
 0x3ec   :  { %14910 = vmatpush3.bf16.msra.mxu1 %v14909_v41  ;;  %14657 = vmatprep.mubr.msk.f32.mxu1 %vm15472_vm2, %v15473_v34 }
 0x3ed   :  { %14911 = vmatprep.subr.bf16.mxu1 %v15471_v8 }
 0x3ef   :  { %14658 = vmatmul.mubr.msk.f32.vlgmr.msra.gmra.mrb[166].mxu1 %vm6560_vm3, %v6419_v4  ;;  %v6552_v4 = vld [vmem:[%s18707_s3 + $0x3c0] sm:$0xff] }
 0x3f0   :  { %14913 = vmatpush3.bf16.msra.mxu1 %v14912_v20  ;;  %14664 = vmatprep.mubr.msk.f32.mxu1 %vm15472_vm2, %v15473_v34  ;;  %v6426_v20 = vmax.f32 %v6362_v23, 0.0  ;;  %v14936_v17 = vpack.c.bf16 %v6553_v59, %v6552_v4 }
 0x3f1   :  { %14914 = vmatprep.subr.bf16.mxu1 %v15471_v8 }
 0x3f3   :  { %14665 = vmatmul.mubr.msk.f32.vlgmr.msra.gmra.mrb[168].mxu1 %vm6560_vm3, %v6420_v37  ;;  %v6427_v37 = vmax.f32 %v6363_v44, 0.0 }
 0x3f4   :  { %14916 = vmatpush3.bf16.msra.mxu1 %v14915_v40  ;;  %14671 = vmatprep.mubr.msk.f32.mxu1 %vm15472_vm2, %v15473_v34 }
 0x3f5   :  { %14917 = vmatprep.subr.bf16.mxu1 %v15471_v8 }
 0x3f6   :  { %v6630_v21 = vpop.f32.mrb[64].mxu1 }
 0x3f7   :  { %v14302_v25 = vpop.f32.mrb[65].mxu1  ;;  %14672 = vmatmul.mubr.msk.f32.vlgmr.msra.gmra.mrb[170].mxu1 %vm6560_vm3, %v6421_v7  ;;  %v11234_v29 = vsel %vm11233_vm4, %v6630_v21, 0.0  ;;  %v6365_v21 = vadd.f32 %v18377_v43, %v18193_v56 }
 0x3f8   :  { %14919 = vmatpush3.bf16.msra.mxu1 %v14918_v51  ;;  %14678 = vmatprep.mubr.msk.f32.mxu1 %vm15472_vm2, %v15473_v34  ;;  %v6555_v51 = vld [vmem:[%s18707_s3 + $0x3d8] sm:$0xff]  ;;  %v6428_v25 = vmax.f32 %v6364_v3, 0.0 }
 0x3f9   :  { %14920 = vmatprep.subr.bf16.mxu1 %v15471_v8  ;;  %v14939_v5 = vpack.c.bf16 %v6555_v51, %v6554_v33 }
 0x3fa   :  { %v6703_v60 = vpop.f32.mrb[66].mxu1 }
 0x3fb   :  { %v11235_v47 = vsel %vm11233_vm4, %v6703_v60, 0.0  ;;  %v14309_v2 = vpop.f32.mrb[67].mxu1  ;;  %14679 = vmatmul.mubr.msk.f32.vlgmr.msra.gmra.mrb[172].mxu1 %vm6560_vm3, %v6422_v50 }
 0x3fc   :  { %v11236_v57 = vadd.f32 %v11235_v47, %v11234_v29  ;;  %14922 = vmatpush3.bf16.msra.mxu1 %v14921_v12  ;;  %14685 = vmatprep.mubr.msk.f32.mxu1 %vm15472_vm2, %v15473_v34  ;;  %v6556_v12 = vld [vmem:[%s18707_s3 + $0x3e0] sm:$0xff]  ;;  %v6429_v29 = vmax.f32 %v6365_v21, 0.0  ;;  %v6366_v47 = vadd.f32 %v18377_v43, %v18218_v58  ;;  %v6558_v2 = vld [vmem:[%s18707_s3 + $0x3f0] sm:$0xff] }
 0x3fd   :  { %14923 = vmatprep.subr.bf16.mxu1 %v15471_v8  ;;  %v14942_v56 = vpack.c.bf16 %v6557_v61, %v6556_v12 }
 0x3fe   :  { %v6776_v27 = vpop.f32.mrb[68].mxu1 }
 0x3ff   :  { %v11237_v36 = vsel %vm11233_vm4, %v6776_v27, 0.0  ;;  %v14316_v46 = vpop.f32.mrb[69].mxu1  ;;  %14686 = vmatmul.mubr.msk.f32.vlgmr.msra.gmra.mrb[174].mxu1 %vm6560_vm3, %v6423_v49  ;;  %v6430_v27 = vmax.f32 %v6366_v47, 0.0 }
 0x400   :  { %v11238_v54 = vadd.f32 %v11237_v36, %v11236_v57  ;;  %14925 = vmatpush3.bf16.msra.mxu1 %v14924_v13  ;;  %14692 = vmatprep.mubr.msk.f32.mxu1 %vm15472_vm2, %v15473_v34  ;;  %v6559_v57 = vld [vmem:[%s18707_s3 + $0x3f8] sm:$0xff] }
 0x401   :  { %14926 = vmatprep.subr.bf16.mxu1 %v15471_v8  ;;  %v14945_v58 = vpack.c.bf16 %v6559_v57, %v6558_v2 }
 0x402   :  { %v6849_v0 = vpop.f32.mrb[70].mxu1 }
 0x403   :  { %v11239_v1 = vsel %vm11233_vm4, %v6849_v0, 0.0  ;;  %v14323_v6 = vpop.f32.mrb[71].mxu1  ;;  %14693 = vmatmul.mubr.msk.f32.vlgmr.msra.gmra.mrb[176].mxu1 %vm6560_vm3, %v6424_v48 }
 0x404   :  { %v11240_v15 = vadd.f32 %v11239_v1, %v11238_v54  ;;  %14928 = vmatpush3.bf16.msra.mxu1 %v14927_v16  ;;  %14699 = vmatprep.mubr.msk.f32.mxu1 %vm15472_vm2, %v15473_v34 }
 0x405   :  { %14929 = vmatprep.subr.bf16.mxu1 %v15471_v8 }
 0x406   :  { %v6922_v41 = vpop.f32.mrb[72].mxu1 }
 0x407   :  { %v11241_v62 = vsel %vm11233_vm4, %v6922_v41, 0.0  ;;  %v14330_v19 = vpop.f32.mrb[73].mxu1  ;;  %14700 = vmatmul.mubr.msk.f32.vlgmr.msra.gmra.mrb[178].mxu1 %vm6560_vm3, %v6425_v53 }
 0x408   :  { %v11242_v14 = vadd.f32 %v11241_v62, %v11240_v15  ;;  %14931 = vmatpush3.bf16.msra.mxu1 %v14930_v35  ;;  %14706 = vmatprep.mubr.msk.f32.mxu1 %vm15472_vm2, %v15473_v34 }
 0x409   :  { %14932 = vmatprep.subr.bf16.mxu1 %v15471_v8 }
 0x40a   :  { %v6995_v22 = vpop.f32.mrb[74].mxu1 }
 0x40b   :  { %v11243_v11 = vsel %vm11233_vm4, %v6995_v22, 0.0  ;;  %v14337_v40 = vpop.f32.mrb[75].mxu1  ;;  %14707 = vmatmul.mubr.msk.f32.vlgmr.msra.gmra.mrb[180].mxu1 %vm6560_vm3, %v6426_v20 }
 0x40c   :  { %v11244_v31 = vadd.f32 %v11243_v11, %v11242_v14  ;;  %14934 = vmatpush3.bf16.msra.mxu1 %v14933_v30  ;;  %14713 = vmatprep.mubr.msk.f32.mxu1 %vm15472_vm2, %v15473_v34 }
 0x40d   :  { %14935 = vmatprep.subr.bf16.mxu1 %v15471_v8 }
 0x40e   :  { %v7068_v7 = vpop.f32.mrb[76].mxu1 }
 0x40f   :  { %v11245_v63 = vsel %vm11233_vm4, %v7068_v7, 0.0  ;;  %v14344_v42 = vpop.f32.mrb[77].mxu1  ;;  %14714 = vmatmul.mubr.msk.f32.vlgmr.msra.gmra.mrb[182].mxu1 %vm6560_vm3, %v6427_v37 }
 0x410   :  { %v11246_v10 = vadd.f32 %v11245_v63, %v11244_v31  ;;  %14937 = vmatpush3.bf16.msra.mxu1 %v14936_v17  ;;  %14720 = vmatprep.mubr.msk.f32.mxu1 %vm15472_vm2, %v15473_v34 }
 0x411   :  { %14938 = vmatprep.subr.bf16.mxu1 %v15471_v8 }
 0x412   :  { %v7141_v50 = vpop.f32.mrb[78].mxu1 }
 0x413   :  { %v11247_v45 = vsel %vm11233_vm4, %v7141_v50, 0.0  ;;  %v14351_v18 = vpop.f32.mrb[79].mxu1  ;;  %14721 = vmatmul.mubr.msk.f32.vlgmr.msra.gmra.mrb[184].mxu1 %vm6560_vm3, %v6428_v25 }
 0x414   :  { %v11248_v60 = vadd.f32 %v11247_v45, %v11246_v10  ;;  %14940 = vmatpush3.bf16.msra.mxu1 %v14939_v5  ;;  %14727 = vmatprep.mubr.msk.f32.mxu1 %vm15472_vm2, %v15473_v34 }
 0x415   :  { %14941 = vmatprep.subr.bf16.mxu1 %v15471_v8 }
 0x416   :  { %v7214_v13 = vpop.f32.mrb[80].mxu1 }
 0x417   :  { %v11249_v49 = vsel %vm11233_vm4, %v7214_v13, 0.0  ;;  %v14358_v55 = vpop.f32.mrb[81].mxu1  ;;  %14728 = vmatmul.mubr.msk.f32.vlgmr.msra.gmra.mrb[186].mxu1 %vm6560_vm3, %v6429_v29 }
 0x418   :  { %v11250_v32 = vadd.f32 %v11249_v49, %v11248_v60  ;;  %14943 = vmatpush3.bf16.msra.mxu1 %v14942_v56  ;;  %14734 = vmatprep.mubr.msk.f32.mxu1 %vm15472_vm2, %v15473_v34 }
 0x419   :  { %14944 = vmatprep.subr.bf16.mxu1 %v15471_v8 }
 0x41a   :  { %v7287_v36 = vpop.f32.mrb[82].mxu1 }
 0x41b   :  { %v11251_v46 = vsel %vm11233_vm4, %v7287_v36, 0.0  ;;  %v14365_v54 = vpop.f32.mrb[83].mxu1  ;;  %14735 = vmatmul.mubr.msk.f32.vlgmr.msra.gmra.mrb[188].mxu1 %vm6560_vm3, %v6430_v27 }
 0x41c   :  { %v11252_v16 = vadd.f32 %v11251_v46, %v11250_v32  ;;  %14946 = vmatpush3.bf16.msra.mxu1 %v14945_v58  ;;  %14741 = vmatprep.mubr.msk.f32.mxu1 %vm15472_vm2, %v15473_v34 }
 0x41d   :  { %14947 = vmatprep.subr.bf16.mxu1 %v15471_v8 }
 0x41e   :  { %v7360_v48 = vpop.f32.mrb[84].mxu1 }
 0x41f   :  { %v11253_v9 = vsel %vm11233_vm4, %v7360_v48, 0.0  ;;  %v14372_v43 = vpop.f32.mrb[85].mxu1  ;;  %14742 = vmatmul.mubr.msk.f32.vlgmr.msra.gmra.mrb[190].mxu1 %vm6560_vm3, %v6431_v52 }
 0x420   :  { %v11254_v24 = vadd.f32 %v11253_v9, %v11252_v16  ;;  %14752 = vmatprep.mubr.msk.f32.mxu1 %vm15472_vm2, %v15473_v34 }
 0x422   :  { %v7433_v28 = vpop.f32.mrb[86].mxu1 }
 0x423   :  { %v11255_v0 = vsel %vm11233_vm4, %v7433_v28, 0.0  ;;  %v14379_v1 = vpop.f32.mrb[87].mxu1 }
 0x424   :  { %v11256_v6 = vadd.f32 %v11255_v0, %v11254_v24 }
 0x426   :  { %v7506_v15 = vpop.f32.mrb[88].mxu1 }
 0x427   :  { %v11257_v35 = vsel %vm11233_vm4, %v7506_v15, 0.0  ;;  %v14386_v53 = vpop.f32.mrb[89].mxu1 }
 0x428   :  { %v11258_v23 = vadd.f32 %v11257_v35, %v11256_v6 }
 0x42a   :  { %v7579_v39 = vpop.f32.mrb[90].mxu1 }
 0x42b   :  { %v11259_v38 = vsel %vm11233_vm4, %v7579_v39, 0.0  ;;  %v14393_v41 = vpop.f32.mrb[91].mxu1 }
 0x42c   :  { %v11260_v62 = vadd.f32 %v11259_v38, %v11258_v23 }
 0x42e   :  { %v7652_v19 = vpop.f32.mrb[92].mxu1 }
 0x42f   :  { %v11261_v14 = vsel %vm11233_vm4, %v7652_v19, 0.0  ;;  %v14400_v30 = vpop.f32.mrb[93].mxu1 }
 0x430   :  { %v11262_v34 = vadd.f32 %v11261_v14, %v11260_v62 }
 0x432   :  { %v7725_v44 = vpop.f32.mrb[94].mxu1 }
 0x433   :  { %v11263_v20 = vsel %vm11233_vm4, %v7725_v44, 0.0  ;;  %v14407_v4 = vpop.f32.mrb[95].mxu1 }
 0x434   :  { %v11264_v59 = vadd.f32 %v11263_v20, %v11262_v34  ;;  %v11370_v20 = vld [vmem:[%s18709_s5] sm:$0xff]  ;;  %v11371_v4 = vld [vmem:[%s18709_s5 + $0x8] sm:$0xff] }
 0x436   :  { %v7798_v22 = vpop.f32.mrb[96].mxu1 }
 0x437   :  { %v11265_v11 = vsel %vm11233_vm4, %v7798_v22, 0.0  ;;  %v14414_v40 = vpop.f32.mrb[97].mxu1 }
 0x438   :  { %v11266_v31 = vadd.f32 %v11265_v11, %v11264_v59  ;;  %v14948_v59 = vpack.c.bf16 %v11371_v4, %v11370_v20 }
 0x43a   :  { %v7871_v17 = vpop.f32.mrb[98].mxu1  ;;  %14949 = vmatpush3.bf16.msra.mxu1 %v14948_v59 }
 0x43b   :  { %v11267_v37 = vsel %vm11233_vm4, %v7871_v17, 0.0  ;;  %v14421_v3 = vpop.f32.mrb[99].mxu1  ;;  %14950 = vmatprep.subr.bf16.mxu1 %v15471_v8  ;;  %v11372_v17 = vld [vmem:[%s18709_s5 + $0x10] sm:$0xff] }
 0x43c   :  { %v11268_v33 = vadd.f32 %v11267_v37, %v11266_v31  ;;  %v11373_v37 = vld [vmem:[%s18709_s5 + $0x18] sm:$0xff] }
 0x43d   :  { %v14951_v3 = vpack.c.bf16 %v11373_v37, %v11372_v17 }
 0x43e   :  { %v7944_v51 = vpop.f32.mrb[100].mxu1 }
 0x43f   :  { %v11269_v7 = vsel %vm11233_vm4, %v7944_v51, 0.0  ;;  %v14428_v63 = vpop.f32.mrb[101].mxu1  ;;  %14952 = vmatpush3.bf16.msra.mxu1 %v14951_v3 }
 0x440   :  { %v11270_v42 = vadd.f32 %v11269_v7, %v11268_v33 }
 0x442   :  { %v8017_v10 = vpop.f32.mrb[102].mxu1 }
 0x443   :  { %v11271_v5 = vsel %vm11233_vm4, %v8017_v10, 0.0  ;;  %v14435_v21 = vpop.f32.mrb[103].mxu1 }
 0x444   :  { %v11272_v25 = vadd.f32 %v11271_v5, %v11270_v42 }
 0x446   :  { %v8090_v12 = vpop.f32.mrb[104].mxu1 }
 0x447   :  { %v11273_v61 = vsel %vm11233_vm4, %v8090_v12, 0.0  ;;  %v14442_v50 = vpop.f32.mrb[105].mxu1 }
 0x448   :  { %v11274_v45 = vadd.f32 %v11273_v61, %v11272_v25 }
 0x44a   :  { %v8163_v18 = vpop.f32.mrb[106].mxu1 }
 0x44b   :  { %v11275_v60 = vsel %vm11233_vm4, %v8163_v18, 0.0  ;;  %v14449_v56 = vpop.f32.mrb[107].mxu1 }
 0x44c   :  { %v11276_v29 = vadd.f32 %v11275_v60, %v11274_v45 }
 0x44e   :  { %v8236_v47 = vpop.f32.mrb[108].mxu1 }
 0x44f   :  { %v11277_v2 = vsel %vm11233_vm4, %v8236_v47, 0.0  ;;  %v14456_v57 = vpop.f32.mrb[109].mxu1 }
 0x450   :  { %v11278_v13 = vadd.f32 %v11277_v2, %v11276_v29 }
 0x452   :  { %v8309_v49 = vpop.f32.mrb[110].mxu1 }
 0x453   :  { %v11279_v55 = vsel %vm11233_vm4, %v8309_v49, 0.0  ;;  %v14463_v32 = vpop.f32.mrb[111].mxu1 }
 0x454   :  { %v11280_v58 = vadd.f32 %v11279_v55, %v11278_v13 }
 0x456   :  { %v8382_v26 = vpop.f32.mrb[112].mxu1 }
 0x457   :  { %v11281_v27 = vsel %vm11233_vm4, %v8382_v26, 0.0  ;;  %v14470_v36 = vpop.f32.mrb[113].mxu1 }
 0x458   :  { %v11282_v46 = vadd.f32 %v11281_v27, %v11280_v58 }
 0x45a   :  { %v8455_v54 = vpop.f32.mrb[114].mxu1 }
 0x45b   :  { %v11283_v16 = vsel %vm11233_vm4, %v8455_v54, 0.0  ;;  %v14477_v52 = vpop.f32.mrb[115].mxu1 }
 0x45c   :  { %v11284_v48 = vadd.f32 %v11283_v16, %v11282_v46 }
 0x45e   :  { %v8528_v9 = vpop.f32.mrb[116].mxu1 }
 0x45f   :  { %v11285_v43 = vsel %vm11233_vm4, %v8528_v9, 0.0  ;;  %v14484_v24 = vpop.f32.mrb[117].mxu1 }
 0x460   :  { %v11286_v28 = vadd.f32 %v11285_v43, %v11284_v48 }
 0x462   :  { %v8601_v0 = vpop.f32.mrb[118].mxu1 }
 0x463   :  { %v11287_v1 = vsel %vm11233_vm4, %v8601_v0, 0.0  ;;  %v14491_v6 = vpop.f32.mrb[119].mxu1 }
 0x464   :  { %v11288_v15 = vadd.f32 %v11287_v1, %v11286_v28 }
 0x466   :  { %v8674_v35 = vpop.f32.mrb[120].mxu1 }
 0x467   :  { %v11289_v53 = vsel %vm11233_vm4, %v8674_v35, 0.0  ;;  %v14498_v23 = vpop.f32.mrb[121].mxu1 }
 0x468   :  { %v11290_v39 = vadd.f32 %v11289_v53, %v11288_v15 }
 0x46a   :  { %v8747_v38 = vpop.f32.mrb[122].mxu1 }
 0x46b   :  { %v11291_v41 = vsel %vm11233_vm4, %v8747_v38, 0.0  ;;  %v14505_v62 = vpop.f32.mrb[123].mxu1 }
 0x46c   :  { %v11292_v19 = vadd.f32 %v11291_v41, %v11290_v39 }
 0x46e   :  { %v8820_v14 = vpop.f32.mrb[124].mxu1 }
 0x46f   :  { %v11293_v30 = vsel %vm11233_vm4, %v8820_v14, 0.0  ;;  %v14512_v34 = vpop.f32.mrb[125].mxu1 }
 0x470   :  { %v11294_v44 = vadd.f32 %v11293_v30, %v11292_v19 }
 0x472   :  { %v8893_v22 = vpop.f32.mrb[126].mxu1 }
 0x473   :  { %v11295_v11 = vsel %vm11233_vm4, %v8893_v22, 0.0  ;;  %v14519_v40 = vpop.f32.mrb[127].mxu1 }
 0x474   :  { %v11296_v31 = vadd.f32 %v11295_v11, %v11294_v44 }
 0x476   :  { %v8966_v33 = vpop.f32.mrb[128].mxu1 }
 0x477   :  { %v11297_v51 = vsel %vm11233_vm4, %v8966_v33, 0.0  ;;  %v14526_v7 = vpop.f32.mrb[129].mxu1 }
 0x478   :  { %v11298_v63 = vadd.f32 %v11297_v51, %v11296_v31 }
 0x47a   :  { %v9039_v42 = vpop.f32.mrb[130].mxu1 }
 0x47b   :  { %v11299_v10 = vsel %vm11233_vm4, %v9039_v42, 0.0  ;;  %v14533_v5 = vpop.f32.mrb[131].mxu1 }
 0x47c   :  { %v11300_v8 = vadd.f32 %v11299_v10, %v11298_v63 }
 0x47e   :  { %v9112_v21 = vpop.f32.mrb[132].mxu1 }
 0x47f   :  { %v11301_v25 = vsel %vm11233_vm4, %v9112_v21, 0.0  ;;  %v14540_v12 = vpop.f32.mrb[133].mxu1 }
 0x480   :  { %v11302_v61 = vadd.f32 %v11301_v25, %v11300_v8 }
 0x482   :  { %v9185_v50 = vpop.f32.mrb[134].mxu1 }
 0x483   :  { %v11303_v45 = vsel %vm11233_vm4, %v9185_v50, 0.0  ;;  %v14547_v18 = vpop.f32.mrb[135].mxu1 }
 0x484   :  { %v11304_v60 = vadd.f32 %v11303_v45, %v11302_v61 }
 0x486   :  { %v9258_v56 = vpop.f32.mrb[136].mxu1 }
 0x487   :  { %v11305_v29 = vsel %vm11233_vm4, %v9258_v56, 0.0  ;;  %v14554_v47 = vpop.f32.mrb[137].mxu1 }
 0x488   :  { %v11306_v2 = vadd.f32 %v11305_v29, %v11304_v60 }
 0x48a   :  { %v9331_v57 = vpop.f32.mrb[138].mxu1 }
 0x48b   :  { %v11307_v13 = vsel %vm11233_vm4, %v9331_v57, 0.0  ;;  %v14561_v49 = vpop.f32.mrb[139].mxu1 }
 0x48c   :  { %v11308_v55 = vadd.f32 %v11307_v13, %v11306_v2 }
 0x48e   :  { %v9404_v32 = vpop.f32.mrb[140].mxu1 }
 0x48f   :  { %v11309_v58 = vsel %vm11233_vm4, %v9404_v32, 0.0  ;;  %v14568_v26 = vpop.f32.mrb[141].mxu1 }
 0x490   :  { %v11310_v27 = vadd.f32 %v11309_v58, %v11308_v55 }
 0x492   :  { %v9477_v36 = vpop.f32.mrb[142].mxu1 }
 0x493   :  { %v11311_v46 = vsel %vm11233_vm4, %v9477_v36, 0.0  ;;  %v14575_v54 = vpop.f32.mrb[143].mxu1 }
 0x494   :  { %v11312_v16 = vadd.f32 %v11311_v46, %v11310_v27 }
 0x496   :  { %v9550_v52 = vpop.f32.mrb[144].mxu1 }
 0x497   :  { %v11313_v48 = vsel %vm11233_vm4, %v9550_v52, 0.0  ;;  %v14582_v9 = vpop.f32.mrb[145].mxu1 }
 0x498   :  { %v11314_v43 = vadd.f32 %v11313_v48, %v11312_v16 }
 0x49a   :  { %v9623_v24 = vpop.f32.mrb[146].mxu1 }
 0x49b   :  { %v11315_v28 = vsel %vm11233_vm4, %v9623_v24, 0.0  ;;  %v14589_v0 = vpop.f32.mrb[147].mxu1 }
 0x49c   :  { %v11316_v1 = vadd.f32 %v11315_v28, %v11314_v43 }
 0x49e   :  { %v9696_v6 = vpop.f32.mrb[148].mxu1 }
 0x49f   :  { %v11317_v15 = vsel %vm11233_vm4, %v9696_v6, 0.0  ;;  %v14596_v35 = vpop.f32.mrb[149].mxu1 }
 0x4a0   :  { %v11318_v53 = vadd.f32 %v11317_v15, %v11316_v1 }
 0x4a2   :  { %v9769_v23 = vpop.f32.mrb[150].mxu1 }
 0x4a3   :  { %v11319_v39 = vsel %vm11233_vm4, %v9769_v23, 0.0  ;;  %v14603_v38 = vpop.f32.mrb[151].mxu1 }
 0x4a4   :  { %v11320_v41 = vadd.f32 %v11319_v39, %v11318_v53 }
 0x4a6   :  { %v9842_v62 = vpop.f32.mrb[152].mxu1 }
 0x4a7   :  { %v11321_v19 = vsel %vm11233_vm4, %v9842_v62, 0.0  ;;  %v14610_v14 = vpop.f32.mrb[153].mxu1 }
 0x4a8   :  { %v11322_v30 = vadd.f32 %v11321_v19, %v11320_v41 }
 0x4aa   :  { %v9915_v34 = vpop.f32.mrb[154].mxu1 }
 0x4ab   :  { %v11323_v44 = vsel %vm11233_vm4, %v9915_v34, 0.0  ;;  %v14617_v20 = vpop.f32.mrb[155].mxu1 }
 0x4ac   :  { %v11324_v4 = vadd.f32 %v11323_v44, %v11322_v30 }
 0x4ae   :  { %v9988_v59 = vpop.f32.mrb[156].mxu1 }
 0x4af   :  { %v11325_v22 = vsel %vm11233_vm4, %v9988_v59, 0.0  ;;  %v14624_v11 = vpop.f32.mrb[157].mxu1 }
 0x4b0   :  { %v11326_v40 = vadd.f32 %v11325_v22, %v11324_v4 }
 0x4b2   :  { %v10061_v31 = vpop.f32.mrb[158].mxu1 }
 0x4b3   :  { %v11327_v17 = vsel %vm11233_vm4, %v10061_v31, 0.0  ;;  %v14631_v37 = vpop.f32.mrb[159].mxu1 }
 0x4b4   :  { %v11328_v3 = vadd.f32 %v11327_v17, %v11326_v40  ;;  %v12629_v37 = vld [vmem:[%s18710_s4] ss:$0 sm:$0xff] }
 0x4b6   :  { %v10134_v33 = vpop.f32.mrb[160].mxu1 }
 0x4b7   :  { %v11329_v51 = vsel %vm11233_vm4, %v10134_v33, 0.0  ;;  %v14638_v7 = vpop.f32.mrb[161].mxu1 }
 0x4b8   :  { %v11330_v63 = vadd.f32 %v11329_v51, %v11328_v3 }
 0x4ba   :  { %v10207_v42 = vpop.f32.mrb[162].mxu1 }
 0x4bb   :  { %v11331_v10 = vsel %vm11233_vm4, %v10207_v42, 0.0  ;;  %v14645_v5 = vpop.f32.mrb[163].mxu1 }
 0x4bc   :  { %v11332_v8 = vadd.f32 %v11331_v10, %v11330_v63  ;;  %v12630_v63 = vld [vmem:[%s18711_s6] ss:$0 sm:$0xff] }
 0x4be   :  { %v10280_v21 = vpop.f32.mrb[164].mxu1 }
 0x4bf   :  { %v11333_v25 = vsel %vm11233_vm4, %v10280_v21, 0.0  ;;  %v14652_v12 = vpop.f32.mrb[165].mxu1 }
 0x4c0   :  { %v11334_v61 = vadd.f32 %v11333_v25, %v11332_v8 }
 0x4c2   :  { %v10353_v50 = vpop.f32.mrb[166].mxu1 }
 0x4c3   :  { %v11335_v45 = vsel %vm11233_vm4, %v10353_v50, 0.0  ;;  %v14659_v18 = vpop.f32.mrb[167].mxu1 }
 0x4c4   :  { %v11336_v60 = vadd.f32 %v11335_v45, %v11334_v61 }
 0x4c6   :  { %v10426_v56 = vpop.f32.mrb[168].mxu1 }
 0x4c7   :  { %v11337_v29 = vsel %vm11233_vm4, %v10426_v56, 0.0  ;;  %v14666_v47 = vpop.f32.mrb[169].mxu1 }
 0x4c8   :  { %v11338_v2 = vadd.f32 %v11337_v29, %v11336_v60 }
 0x4ca   :  { %v10499_v57 = vpop.f32.mrb[170].mxu1 }
 0x4cb   :  { %v11339_v13 = vsel %vm11233_vm4, %v10499_v57, 0.0  ;;  %v14673_v49 = vpop.f32.mrb[171].mxu1 }
 0x4cc   :  { %v11340_v55 = vadd.f32 %v11339_v13, %v11338_v2 }
 0x4ce   :  { %v10572_v32 = vpop.f32.mrb[172].mxu1 }
 0x4cf   :  { %v11341_v58 = vsel %vm11233_vm4, %v10572_v32, 0.0  ;;  %v14680_v26 = vpop.f32.mrb[173].mxu1 }
 0x4d0   :  { %v11342_v27 = vadd.f32 %v11341_v58, %v11340_v55 }
 0x4d2   :  { %v10645_v36 = vpop.f32.mrb[174].mxu1 }
 0x4d3   :  { %v11343_v46 = vsel %vm11233_vm4, %v10645_v36, 0.0  ;;  %v14687_v54 = vpop.f32.mrb[175].mxu1 }
 0x4d4   :  { %v11344_v16 = vadd.f32 %v11343_v46, %v11342_v27 }
 0x4d6   :  { %v10718_v52 = vpop.f32.mrb[176].mxu1 }
 0x4d7   :  { %v11345_v48 = vsel %vm11233_vm4, %v10718_v52, 0.0  ;;  %v14694_v9 = vpop.f32.mrb[177].mxu1 }
 0x4d8   :  { %v11346_v43 = vadd.f32 %v11345_v48, %v11344_v16 }
 0x4da   :  { %v10791_v24 = vpop.f32.mrb[178].mxu1 }
 0x4db   :  { %v11347_v28 = vsel %vm11233_vm4, %v10791_v24, 0.0  ;;  %v14701_v0 = vpop.f32.mrb[179].mxu1 }
 0x4dc   :  { %v11348_v1 = vadd.f32 %v11347_v28, %v11346_v43 }
 0x4de   :  { %v10864_v6 = vpop.f32.mrb[180].mxu1 }
 0x4df   :  { %v11349_v15 = vsel %vm11233_vm4, %v10864_v6, 0.0  ;;  %v14708_v35 = vpop.f32.mrb[181].mxu1 }
 0x4e0   :  { %v11350_v53 = vadd.f32 %v11349_v15, %v11348_v1 }
 0x4e2   :  { %v10937_v23 = vpop.f32.mrb[182].mxu1 }
 0x4e3   :  { %v11351_v39 = vsel %vm11233_vm4, %v10937_v23, 0.0  ;;  %v14715_v38 = vpop.f32.mrb[183].mxu1 }
 0x4e4   :  { %v11352_v41 = vadd.f32 %v11351_v39, %v11350_v53 }
 0x4e6   :  { %v11010_v62 = vpop.f32.mrb[184].mxu1 }
 0x4e7   :  { %v11353_v19 = vsel %vm11233_vm4, %v11010_v62, 0.0  ;;  %v14722_v14 = vpop.f32.mrb[185].mxu1 }
 0x4e8   :  { %v11354_v30 = vadd.f32 %v11353_v19, %v11352_v41 }
 0x4ea   :  { %v11083_v34 = vpop.f32.mrb[186].mxu1 }
 0x4eb   :  { %v11355_v44 = vsel %vm11233_vm4, %v11083_v34, 0.0  ;;  %v14729_v20 = vpop.f32.mrb[187].mxu1 }
 0x4ec   :  { %v11356_v4 = vadd.f32 %v11355_v44, %v11354_v30 }
 0x4ee   :  { %v11156_v59 = vpop.f32.mrb[188].mxu1 }
 0x4ef   :  { %v11357_v22 = vsel %vm11233_vm4, %v11156_v59, 0.0  ;;  %v14736_v11 = vpop.f32.mrb[189].mxu1 }
 0x4f0   :  { %v11358_v40 = vadd.f32 %v11357_v22, %v11356_v4 }
 0x4f2   :  { %v11229_v31 = vpop.f32.mrb[190].mxu1 }
 0x4f3   :  { %v11359_v17 = vsel %vm11233_vm4, %v11229_v31, 0.0  ;;  %v14743_v3 = vpop.f32.mrb[191].mxu1 }
 0x4f4   :  { %v11360_v33 = vadd.f32 %v11359_v17, %v11358_v40 }
 0x4f6   :  { %v11368_v51 = vadd.f32 %v12629_v37, %v11360_v33 }
 0x4f8   :  { %v11369_v7 = vmax.f32 %v11368_v51, 0.0 }
 0x4fa   :  { %14753 = vmatmul.mubr.msk.f32.vlgmr.msra.gmra.mrb[192].mxu1 %vm11233_vm4, %v11369_v7 }
 0x5cd   :  { %v11450_v42 = vpop.f32.mrb[192].mxu1 }
 0x5ce   :  { %v11451_v10 = vadd.f32 %v12630_v63, %v11450_v42  ;;  %v14754_v5 = vpop.f32.mrb[193].mxu1 }
 0x5d0   :  { %11454 = vst.msk [vmem:[%s18712_s7] sm:$0xff] %vm11233_vm4, %v11451_v10 }

</bundles_post_ra>
